<compile_context>
chip_gen: v6e
topology: v6e:2x2x1
jax: 0.10.0
libtpu: 0.0.40
codegen_flags: <defaults>
</compile_context>

<pallas_src>
import functools
import math

import numpy as np
import jax
import jax.numpy as jnp
from jax.experimental import pallas as pl
from jax.experimental.pallas import tpu as pltpu


def _cbam_kernel(x_ref, w1t_ref, w2t_ref, mask_ref, wsa_ref, o_ref, *, H, W, K):
    # x_ref   : (Bt, C, HW)  VMEM input block (lane-dense)
    # w1t_ref : (C, hid_pad) VMEM  -- fc1 weight, transposed, zero-padded
    # w2t_ref : (hid_pad, C) VMEM  -- fc2 weight, transposed, zero-padded
    # mask_ref: (2*K, HW)    VMEM  -- rows 0..K-1: row-validity masks (di=-P..P)
    #                                rows K..2K-1: col-validity masks (dj=-P..P)
    # wsa_ref : (2*K*K,)     SMEM  -- KxK spatial conv weight, flat [c][i][j]
    # o_ref   : (Bt, C, HW)  VMEM output block
    P = (K - 1) // 2
    HW = H * W
    Bt = x_ref.shape[0]
    C = x_ref.shape[1]

    x_nat = x_ref[...]                                   # native dtype, loaded once

    # ---------------- Channel attention ----------------
    avg = jnp.sum(x_nat, axis=-1, dtype=jnp.float32) * (1.0 / float(HW))   # (Bt, C)
    mx = jnp.max(x_nat, axis=-1).astype(jnp.float32)                       # (Bt, C)
    p2 = jnp.concatenate([avg, mx], axis=0)                                # (2Bt, C)

    h = jnp.dot(p2, w1t_ref[...], preferred_element_type=jnp.float32)
    h = jnp.maximum(h, 0.0)                                                # (2Bt, hid_pad)
    o = jnp.dot(h, w2t_ref[...], preferred_element_type=jnp.float32)       # (2Bt, C)
    ca = jax.nn.sigmoid(o[:Bt] + o[Bt:])                                   # (Bt, C) f32

    # Stage x * ca through the output block: the full-size value is not kept
    # live across the spatial-attention section below.
    o_ref[...] = (x_nat * ca[:, :, None].astype(x_nat.dtype)).astype(o_ref.dtype)

    # ---------------- Spatial attention ----------------
    x_ca = o_ref[...]                                                      # staged block
    sp_mean = jnp.sum(x_ca, axis=1, dtype=jnp.float32) * (1.0 / float(C))  # (Bt, HW)
    sp_max = jnp.max(x_ca, axis=1).astype(jnp.float32)                     # (Bt, HW)

    # boundary masks (host-precomputed), hoisted out of the tap loop
    rmask = [mask_ref[pl.ds(i, 1), :] for i in range(K)]        # (1, HW) each
    cmask = [mask_ref[pl.ds(K + j, 1), :] for j in range(K)]    # (1, HW) each

    def lane_shift(v, off):
        # v_shifted[p] == v[(p + off) mod HW]  (lane rotation on the XLU)
        s = (-off) % HW
        return v if s == 0 else pltpu.roll(v, shift=s, axis=1)

    zero = jnp.zeros((Bt, HW), jnp.float32)
    accs = [zero, zero, zero, zero]                 # 4 independent accumulators
    k = 0
    for c, src in enumerate((sp_mean, sp_max)):     # conv in-channel 0=mean, 1=max
        for ii in range(K):
            di = ii - P
            slab = src if di == 0 else lane_shift(src, di * W) * rmask[ii]
            for jj in range(K):
                dj = jj - P
                wv = wsa_ref[c * K * K + ii * K + jj]          # SMEM scalar
                tap = slab if dj == 0 else lane_shift(slab, dj) * cmask[jj]
                accs[k % 4] = accs[k % 4] + wv * tap
                k += 1
    conv = (accs[0] + accs[1]) + (accs[2] + accs[3])            # (Bt, HW) f32
    sa = jax.nn.sigmoid(conv)

    o_ref[...] = (o_ref[...] * sa[:, None, :].astype(o_ref.dtype)).astype(o_ref.dtype)


def _make_spatial_masks(H, W, K):
    """(2K, HW) f32: rows 0..K-1 row-validity masks, rows K..2K-1 col-validity."""
    P = (K - 1) // 2
    HW = H * W
    rows = np.arange(HW) // W
    cols = np.arange(HW) % W
    row_m = np.stack([((rows + d) >= 0) & ((rows + d) < H) for d in range(-P, P + 1)])
    col_m = np.stack([((cols + d) >= 0) & ((cols + d) < W) for d in range(-P, P + 1)])
    return np.concatenate([row_m, col_m], axis=0).astype(np.float32)


def cbam_block_pallas(x, w1, w2, wsa, *, block_bytes=4 << 20):
    """CBAM forward. x: (B,C,H,W); w1: (C//r, C); w2: (C, C//r); wsa: (1,2,K,K)."""
    B, C, H, W = x.shape
    HW = H * W
    hid = w1.shape[0]
    hid_pad = -(-hid // 128) * 128                      # pad hidden dim; exact math
    K = int(wsa.shape[-1])
    assert K % 2 == 1

    x_flat = x.reshape(B, C, HW)                        # free row-major relabel
    w1t = jnp.zeros((C, hid_pad), jnp.float32).at[:, :hid].set(
        jnp.asarray(w1, jnp.float32).T)
    w2t = jnp.zeros((hid_pad, C), jnp.float32).at[:hid, :].set(
        jnp.asarray(w2, jnp.float32).T)
    masks = jnp.asarray(_make_spatial_masks(H, W, K))   # (2K, HW) f32
    wsa_flat = jnp.asarray(wsa, jnp.float32).reshape(-1)  # (2*K*K,) [c][i][j]

    # Byte-targeted batch tiling (no divisibility requirement); keep >= 2 grid
    # steps when B allows so the "parallel" batch axis can use both TCs (v7x).
    per_batch_bytes = C * HW * x.dtype.itemsize
    bt = max(1, min(B, block_bytes // per_batch_bytes))
    if B >= 2:
        bt = min(bt, -(-B // 2))
    grid = (pl.cdiv(B, bt),)

    blk_bytes = bt * per_batch_bytes
    vmem_limit = int(min(48 << 20, max(32 << 20, 6 * blk_bytes + (8 << 20))))

    kernel = functools.partial(_cbam_kernel, H=H, W=W, K=K)

    out_flat = pl.pallas_call(
        kernel,
        out_shape=jax.ShapeDtypeStruct((B, C, HW), x.dtype),
        grid=grid,
        in_specs=[
            pl.BlockSpec((bt, C, HW), lambda b: (b, 0, 0)),
            pl.BlockSpec((C, hid_pad), lambda b: (0, 0)),
            pl.BlockSpec((hid_pad, C), lambda b: (0, 0)),
            pl.BlockSpec((2 * K, HW), lambda b: (0, 0)),
            pl.BlockSpec(memory_space=pltpu.MemorySpace.SMEM),
        ],
        out_specs=pl.BlockSpec((bt, C, HW), lambda b: (b, 0, 0)),
        compiler_params=pltpu.CompilerParams(
            dimension_semantics=("parallel",),
            vmem_limit_bytes=vmem_limit),
    )(x_flat, w1t, w2t, masks, wsa_flat)
    return out_flat.reshape(B, C, H, W)


def cbam_block_ref(x, w1, w2, wsa):
    """Pure-JAX reference matching the PyTorch module semantics."""
    avg = jnp.mean(x, axis=(2, 3))                      # (B, C)
    mx = jnp.max(x, axis=(2, 3))                        # (B, C)

    def fc(p):
        h = jnp.maximum(p @ w1.T, 0.0)                  # (B, hid)
        return h @ w2.T                                 # (B, C)

    ca = jax.nn.sigmoid(fc(avg) + fc(mx))               # (B, C)
    x_ca = x * ca[:, :, None, None]

    sp_mean = jnp.mean(x_ca, axis=1, keepdims=True)
    sp_max = jnp.max(x_ca, axis=1, keepdims=True)
    cat = jnp.concatenate([sp_mean, sp_max], axis=1)    # (B, 2, H, W)
    conv = jax.lax.conv_general_dilated(
        cat, wsa, window_strides=(1, 1), padding=((3, 3), (3, 3)),
        dimension_numbers=("NCHW", "OIHW", "NCHW"))
    sa = jax.nn.sigmoid(conv)                           # (B, 1, H, W)
    return x_ca * sa


if __name__ == "__main__":
    B, C, H, W = 2, 16, 16, 16
    ratio, ksize = 8, 7
    hid = C // ratio

    key = jax.random.PRNGKey(0)
    k1, k2, k3, k4 = jax.random.split(key, 4)

    # deterministic synthetic parameters (Conv2d weight shapes from __init__)
    w1 = jax.random.normal(k1, (hid, C), jnp.float32) * (1.0 / math.sqrt(C))
    w2 = jax.random.normal(k2, (C, hid), jnp.float32) * (1.0 / math.sqrt(hid))
    wsa = jax.random.normal(k3, (1, 2, ksize, ksize), jnp.float32) * (
        1.0 / math.sqrt(2 * ksize * ksize))
    x = jax.random.normal(k4, (B, C, H, W), jnp.float32)

    out = jax.block_until_ready(cbam_block_pallas(x, w1, w2, wsa))
    ref = jax.block_until_ready(cbam_block_ref(x, w1, w2, wsa))

    assert out.shape == (B, C, H, W)
    assert jnp.allclose(out, ref, rtol=1e-3, atol=2e-3), "mismatch vs reference"

    print("KERNEL_OK")
</pallas_src>

<mosaic_0001>
module attributes {stable_mosaic.version = 11 : i64} {
  func.func @_cbam_kernel(%arg0: i32, %arg1: memref<1x16x256xf32, #tpu.memory_space<vmem>>, %arg2: memref<16x128xf32, #tpu.memory_space<vmem>>, %arg3: memref<128x16xf32, #tpu.memory_space<vmem>>, %arg4: memref<14x256xf32, #tpu.memory_space<vmem>>, %arg5: memref<98xf32, #tpu.memory_space<smem>>, %arg6: memref<1x16x256xf32, #tpu.memory_space<vmem>>) attributes {dimension_semantics = [#tpu.dimension_semantics<parallel>], iteration_bounds = array<i64: 2>, scalar_prefetch = 0 : i64, scratch_operands = 0 : i64, tpu.core_type = #tpu.core_type<tc>, window_params = [{transform_indices = @transform_0, window_bounds = array<i64: 1, 16, 256>}, {pipeline_mode = #tpu.pipeline_mode<synchronous>, transform_indices = @transform_1, window_bounds = array<i64: 16, 128>}, {pipeline_mode = #tpu.pipeline_mode<synchronous>, transform_indices = @transform_2, window_bounds = array<i64: 128, 16>}, {pipeline_mode = #tpu.pipeline_mode<synchronous>, transform_indices = @transform_3, window_bounds = array<i64: 14, 256>}, {transform_indices = @transform_4, window_bounds = array<i64: 98>}, {transform_indices = @transform_5, window_bounds = array<i64: 1, 16, 256>}]} {
    %c0 = arith.constant 0 : index
    %c0_0 = arith.constant 0 : index
    %c0_1 = arith.constant 0 : index
    %0 = vector.load %arg1[%c0, %c0_0, %c0_1] : memref<1x16x256xf32, #tpu.memory_space<vmem>>, vector<1x16x256xf32>
    %cst = arith.constant dense<0.000000e+00> : vector<1x16xf32>
    %1 = vector.multi_reduction <add>, %0, %cst [2] : vector<1x16x256xf32> to vector<1x16xf32>
    %cst_2 = arith.constant 3.906250e-03 : f32
    %2 = vector.broadcast %cst_2 : f32 to vector<1x16xf32>
    %3 = arith.mulf %1, %2 : vector<1x16xf32>
    %cst_3 = arith.constant dense<0xFF800000> : vector<1x16xf32>
    %4 = vector.multi_reduction <maximumf>, %0, %cst_3 [2] : vector<1x16x256xf32> to vector<1x16xf32>
    %5 = tpu.concatenate %3, %4 in 0 : vector<1x16xf32>, vector<1x16xf32> -> vector<2x16xf32>
    %c0_4 = arith.constant 0 : index
    %c0_5 = arith.constant 0 : index
    %6 = vector.load %arg2[%c0_4, %c0_5] : memref<16x128xf32, #tpu.memory_space<vmem>>, vector<16x128xf32>
    %cst_6 = arith.constant dense<0.000000e+00> : vector<2x128xf32>
    %7 = tpu.matmul %5, %6, %cst_6 {dimension_numbers = #tpu.dot_dimension_numbers<[1], [0], [0], [1], [0, 0, 1, 1], [], []>} : vector<2x16xf32>, vector<16x128xf32>, vector<2x128xf32> -> vector<2x128xf32>
    %cst_7 = arith.constant 0.000000e+00 : f32
    %8 = vector.broadcast %cst_7 : f32 to vector<2x128xf32>
    %9 = arith.maximumf %7, %8 : vector<2x128xf32>
    %c0_8 = arith.constant 0 : index
    %c0_9 = arith.constant 0 : index
    %10 = vector.load %arg3[%c0_8, %c0_9] : memref<128x16xf32, #tpu.memory_space<vmem>>, vector<128x16xf32>
    %cst_10 = arith.constant dense<0.000000e+00> : vector<2x16xf32>
    %11 = tpu.matmul %9, %10, %cst_10 {dimension_numbers = #tpu.dot_dimension_numbers<[1], [0], [0], [1], [0, 0, 1, 1], [], []>} : vector<2x128xf32>, vector<128x16xf32>, vector<2x16xf32> -> vector<2x16xf32>
    %12 = vector.extract_strided_slice %11 {offsets = [0, 0], sizes = [1, 16], strides = [1, 1]} : vector<2x16xf32> to vector<1x16xf32>
    %13 = vector.extract_strided_slice %11 {offsets = [1, 0], sizes = [1, 16], strides = [1, 1]} : vector<2x16xf32> to vector<1x16xf32>
    %14 = arith.addf %12, %13 : vector<1x16xf32>
    %15 = arith.negf %14 : vector<1x16xf32>
    %16 = math.exp %15 : vector<1x16xf32>
    %cst_11 = arith.constant 1.000000e+00 : f32
    %17 = vector.broadcast %cst_11 : f32 to vector<1x16xf32>
    %18 = arith.addf %17, %16 : vector<1x16xf32>
    %19 = arith.divf %17, %18 : vector<1x16xf32>
    %20 = vector.shape_cast %19 : vector<1x16xf32> to vector<1x16x1xf32>
    %21 = vector.broadcast %20 : vector<1x16x1xf32> to vector<1x16x256xf32>
    %22 = arith.mulf %0, %21 : vector<1x16x256xf32>
    %c0_12 = arith.constant 0 : index
    %c0_13 = arith.constant 0 : index
    %c0_14 = arith.constant 0 : index
    %23 = vector.load %arg6[%c0_12, %c0_13, %c0_14] : memref<1x16x256xf32, #tpu.memory_space<vmem>>, vector<1x16x256xf32>
    tpu.vector_store %arg6[%c0_12, %c0_13, %c0_14], %22 {strides = array<i32>} : memref<1x16x256xf32, #tpu.memory_space<vmem>>, vector<1x16x256xf32>,
    %c0_15 = arith.constant 0 : index
    %c0_16 = arith.constant 0 : index
    %c0_17 = arith.constant 0 : index
    %24 = vector.load %arg6[%c0_15, %c0_16, %c0_17] : memref<1x16x256xf32, #tpu.memory_space<vmem>>, vector<1x16x256xf32>
    %cst_18 = arith.constant dense<0.000000e+00> : vector<1x256xf32>
    %25 = vector.multi_reduction <add>, %24, %cst_18 [1] : vector<1x16x256xf32> to vector<1x256xf32>
    %cst_19 = arith.constant 6.250000e-02 : f32
    %26 = vector.broadcast %cst_19 : f32 to vector<1x256xf32>
    %27 = arith.mulf %25, %26 : vector<1x256xf32>
    %cst_20 = arith.constant dense<0xFF800000> : vector<1x256xf32>
    %28 = vector.multi_reduction <maximumf>, %24, %cst_20 [1] : vector<1x16x256xf32> to vector<1x256xf32>
    %c0_21 = arith.constant 0 : index
    %c0_22 = arith.constant 0 : index
    %29 = vector.load %arg4[%c0_21, %c0_22] : memref<14x256xf32, #tpu.memory_space<vmem>>, vector<1x256xf32>
    %c1 = arith.constant 1 : index
    %c0_23 = arith.constant 0 : index
    %30 = vector.load %arg4[%c1, %c0_23] : memref<14x256xf32, #tpu.memory_space<vmem>>, vector<1x256xf32>
    %c2 = arith.constant 2 : index
    %c0_24 = arith.constant 0 : index
    %31 = vector.load %arg4[%c2, %c0_24] : memref<14x256xf32, #tpu.memory_space<vmem>>, vector<1x256xf32>
    %c4 = arith.constant 4 : index
    %c0_25 = arith.constant 0 : index
    %32 = vector.load %arg4[%c4, %c0_25] : memref<14x256xf32, #tpu.memory_space<vmem>>, vector<1x256xf32>
    %c5 = arith.constant 5 : index
    %c0_26 = arith.constant 0 : index
    %33 = vector.load %arg4[%c5, %c0_26] : memref<14x256xf32, #tpu.memory_space<vmem>>, vector<1x256xf32>
    %c6 = arith.constant 6 : index
    %c0_27 = arith.constant 0 : index
    %34 = vector.load %arg4[%c6, %c0_27] : memref<14x256xf32, #tpu.memory_space<vmem>>, vector<1x256xf32>
    %c7 = arith.constant 7 : index
    %c0_28 = arith.constant 0 : index
    %35 = vector.load %arg4[%c7, %c0_28] : memref<14x256xf32, #tpu.memory_space<vmem>>, vector<1x256xf32>
    %c8 = arith.constant 8 : index
    %c0_29 = arith.constant 0 : index
    %36 = vector.load %arg4[%c8, %c0_29] : memref<14x256xf32, #tpu.memory_space<vmem>>, vector<1x256xf32>
    %c9 = arith.constant 9 : index
    %c0_30 = arith.constant 0 : index
    %37 = vector.load %arg4[%c9, %c0_30] : memref<14x256xf32, #tpu.memory_space<vmem>>, vector<1x256xf32>
    %c11 = arith.constant 11 : index
    %c0_31 = arith.constant 0 : index
    %38 = vector.load %arg4[%c11, %c0_31] : memref<14x256xf32, #tpu.memory_space<vmem>>, vector<1x256xf32>
    %c12 = arith.constant 12 : index
    %c0_32 = arith.constant 0 : index
    %39 = vector.load %arg4[%c12, %c0_32] : memref<14x256xf32, #tpu.memory_space<vmem>>, vector<1x256xf32>
    %c13 = arith.constant 13 : index
    %c0_33 = arith.constant 0 : index
    %40 = vector.load %arg4[%c13, %c0_33] : memref<14x256xf32, #tpu.memory_space<vmem>>, vector<1x256xf32>
    %cst_34 = arith.constant 0.000000e+00 : f32
    %41 = vector.broadcast %cst_34 : f32 to vector<1x256xf32>
    %c48_i32 = arith.constant 48 : i32
    %42 = tpu.dynamic_rotate %27 by %c48_i32 dim 1 : vector<1x256xf32>, i32 -> vector<1x256xf32>
    %43 = arith.mulf %42, %29 : vector<1x256xf32>
    %c0_35 = arith.constant 0 : index
    %44 = memref.load %arg5[%c0_35] : memref<98xf32, #tpu.memory_space<smem>>
    %c3_i32 = arith.constant 3 : i32
    %45 = tpu.dynamic_rotate %43 by %c3_i32 dim 1 : vector<1x256xf32>, i32 -> vector<1x256xf32>
    %46 = arith.mulf %45, %35 : vector<1x256xf32>
    %47 = vector.broadcast %44 : f32 to vector<1x256xf32>
    %48 = arith.mulf %47, %46 : vector<1x256xf32>
    %49 = arith.addf %41, %48 : vector<1x256xf32>
    %c1_36 = arith.constant 1 : index
    %50 = memref.load %arg5[%c1_36] : memref<98xf32, #tpu.memory_space<smem>>
    %c2_i32 = arith.constant 2 : i32
    %51 = tpu.dynamic_rotate %43 by %c2_i32 dim 1 : vector<1x256xf32>, i32 -> vector<1x256xf32>
    %52 = arith.mulf %51, %36 : vector<1x256xf32>
    %53 = vector.broadcast %50 : f32 to vector<1x256xf32>
    %54 = arith.mulf %53, %52 : vector<1x256xf32>
    %55 = arith.addf %41, %54 : vector<1x256xf32>
    %c2_37 = arith.constant 2 : index
    %56 = memref.load %arg5[%c2_37] : memref<98xf32, #tpu.memory_space<smem>>
    %c1_i32 = arith.constant 1 : i32
    %57 = tpu.dynamic_rotate %43 by %c1_i32 dim 1 : vector<1x256xf32>, i32 -> vector<1x256xf32>
    %58 = arith.mulf %57, %37 : vector<1x256xf32>
    %59 = vector.broadcast %56 : f32 to vector<1x256xf32>
    %60 = arith.mulf %59, %58 : vector<1x256xf32>
    %61 = arith.addf %41, %60 : vector<1x256xf32>
    %c3 = arith.constant 3 : index
    %62 = memref.load %arg5[%c3] : memref<98xf32, #tpu.memory_space<smem>>
    %63 = vector.broadcast %62 : f32 to vector<1x256xf32>
    %64 = arith.mulf %63, %43 : vector<1x256xf32>
    %65 = arith.addf %41, %64 : vector<1x256xf32>
    %c4_38 = arith.constant 4 : index
    %66 = memref.load %arg5[%c4_38] : memref<98xf32, #tpu.memory_space<smem>>
    %c255_i32 = arith.constant 255 : i32
    %67 = tpu.dynamic_rotate %43 by %c255_i32 dim 1 : vector<1x256xf32>, i32 -> vector<1x256xf32>
    %68 = arith.mulf %67, %38 : vector<1x256xf32>
    %69 = vector.broadcast %66 : f32 to vector<1x256xf32>
    %70 = arith.mulf %69, %68 : vector<1x256xf32>
    %71 = arith.addf %49, %70 : vector<1x256xf32>
    %c5_39 = arith.constant 5 : index
    %72 = memref.load %arg5[%c5_39] : memref<98xf32, #tpu.memory_space<smem>>
    %c254_i32 = arith.constant 254 : i32
    %73 = tpu.dynamic_rotate %43 by %c254_i32 dim 1 : vector<1x256xf32>, i32 -> vector<1x256xf32>
    %74 = arith.mulf %73, %39 : vector<1x256xf32>
    %75 = vector.broadcast %72 : f32 to vector<1x256xf32>
    %76 = arith.mulf %75, %74 : vector<1x256xf32>
    %77 = arith.addf %55, %76 : vector<1x256xf32>
    %c6_40 = arith.constant 6 : index
    %78 = memref.load %arg5[%c6_40] : memref<98xf32, #tpu.memory_space<smem>>
    %c253_i32 = arith.constant 253 : i32
    %79 = tpu.dynamic_rotate %43 by %c253_i32 dim 1 : vector<1x256xf32>, i32 -> vector<1x256xf32>
    %80 = arith.mulf %79, %40 : vector<1x256xf32>
    %81 = vector.broadcast %78 : f32 to vector<1x256xf32>
    %82 = arith.mulf %81, %80 : vector<1x256xf32>
    %83 = arith.addf %61, %82 : vector<1x256xf32>
    %c32_i32 = arith.constant 32 : i32
    %84 = tpu.dynamic_rotate %27 by %c32_i32 dim 1 : vector<1x256xf32>, i32 -> vector<1x256xf32>
    %85 = arith.mulf %84, %30 : vector<1x256xf32>
    %c7_41 = arith.constant 7 : index
    %86 = memref.load %arg5[%c7_41] : memref<98xf32, #tpu.memory_space<smem>>
    %c3_i32_42 = arith.constant 3 : i32
    %87 = tpu.dynamic_rotate %85 by %c3_i32_42 dim 1 : vector<1x256xf32>, i32 -> vector<1x256xf32>
    %88 = arith.mulf %87, %35 : vector<1x256xf32>
    %89 = vector.broadcast %86 : f32 to vector<1x256xf32>
    %90 = arith.mulf %89, %88 : vector<1x256xf32>
    %91 = arith.addf %65, %90 : vector<1x256xf32>
    %c8_43 = arith.constant 8 : index
    %92 = memref.load %arg5[%c8_43] : memref<98xf32, #tpu.memory_space<smem>>
    %c2_i32_44 = arith.constant 2 : i32
    %93 = tpu.dynamic_rotate %85 by %c2_i32_44 dim 1 : vector<1x256xf32>, i32 -> vector<1x256xf32>
    %94 = arith.mulf %93, %36 : vector<1x256xf32>
    %95 = vector.broadcast %92 : f32 to vector<1x256xf32>
    %96 = arith.mulf %95, %94 : vector<1x256xf32>
    %97 = arith.addf %71, %96 : vector<1x256xf32>
    %c9_45 = arith.constant 9 : index
    %98 = memref.load %arg5[%c9_45] : memref<98xf32, #tpu.memory_space<smem>>
    %c1_i32_46 = arith.constant 1 : i32
    %99 = tpu.dynamic_rotate %85 by %c1_i32_46 dim 1 : vector<1x256xf32>, i32 -> vector<1x256xf32>
    %100 = arith.mulf %99, %37 : vector<1x256xf32>
    %101 = vector.broadcast %98 : f32 to vector<1x256xf32>
    %102 = arith.mulf %101, %100 : vector<1x256xf32>
    %103 = arith.addf %77, %102 : vector<1x256xf32>
    %c10 = arith.constant 10 : index
    %104 = memref.load %arg5[%c10] : memref<98xf32, #tpu.memory_space<smem>>
    %105 = vector.broadcast %104 : f32 to vector<1x256xf32>
    %106 = arith.mulf %105, %85 : vector<1x256xf32>
    %107 = arith.addf %83, %106 : vector<1x256xf32>
    %c11_47 = arith.constant 11 : index
    %108 = memref.load %arg5[%c11_47] : memref<98xf32, #tpu.memory_space<smem>>
    %c255_i32_48 = arith.constant 255 : i32
    %109 = tpu.dynamic_rotate %85 by %c255_i32_48 dim 1 : vector<1x256xf32>, i32 -> vector<1x256xf32>
    %110 = arith.mulf %109, %38 : vector<1x256xf32>
    %111 = vector.broadcast %108 : f32 to vector<1x256xf32>
    %112 = arith.mulf %111, %110 : vector<1x256xf32>
    %113 = arith.addf %91, %112 : vector<1x256xf32>
    %c12_49 = arith.constant 12 : index
    %114 = memref.load %arg5[%c12_49] : memref<98xf32, #tpu.memory_space<smem>>
    %c254_i32_50 = arith.constant 254 : i32
    %115 = tpu.dynamic_rotate %85 by %c254_i32_50 dim 1 : vector<1x256xf32>, i32 -> vector<1x256xf32>
    %116 = arith.mulf %115, %39 : vector<1x256xf32>
    %117 = vector.broadcast %114 : f32 to vector<1x256xf32>
    %118 = arith.mulf %117, %116 : vector<1x256xf32>
    %119 = arith.addf %97, %118 : vector<1x256xf32>
    %c13_51 = arith.constant 13 : index
    %120 = memref.load %arg5[%c13_51] : memref<98xf32, #tpu.memory_space<smem>>
    %c253_i32_52 = arith.constant 253 : i32
    %121 = tpu.dynamic_rotate %85 by %c253_i32_52 dim 1 : vector<1x256xf32>, i32 -> vector<1x256xf32>
    %122 = arith.mulf %121, %40 : vector<1x256xf32>
    %123 = vector.broadcast %120 : f32 to vector<1x256xf32>
    %124 = arith.mulf %123, %122 : vector<1x256xf32>
    %125 = arith.addf %103, %124 : vector<1x256xf32>
    %c16_i32 = arith.constant 16 : i32
    %126 = tpu.dynamic_rotate %27 by %c16_i32 dim 1 : vector<1x256xf32>, i32 -> vector<1x256xf32>
    %127 = arith.mulf %126, %31 : vector<1x256xf32>
    %c14 = arith.constant 14 : index
    %128 = memref.load %arg5[%c14] : memref<98xf32, #tpu.memory_space<smem>>
    %c3_i32_53 = arith.constant 3 : i32
    %129 = tpu.dynamic_rotate %127 by %c3_i32_53 dim 1 : vector<1x256xf32>, i32 -> vector<1x256xf32>
    %130 = arith.mulf %129, %35 : vector<1x256xf32>
    %131 = vector.broadcast %128 : f32 to vector<1x256xf32>
    %132 = arith.mulf %131, %130 : vector<1x256xf32>
    %133 = arith.addf %107, %132 : vector<1x256xf32>
    %c15 = arith.constant 15 : index
    %134 = memref.load %arg5[%c15] : memref<98xf32, #tpu.memory_space<smem>>
    %c2_i32_54 = arith.constant 2 : i32
    %135 = tpu.dynamic_rotate %127 by %c2_i32_54 dim 1 : vector<1x256xf32>, i32 -> vector<1x256xf32>
    %136 = arith.mulf %135, %36 : vector<1x256xf32>
    %137 = vector.broadcast %134 : f32 to vector<1x256xf32>
    %138 = arith.mulf %137, %136 : vector<1x256xf32>
    %139 = arith.addf %113, %138 : vector<1x256xf32>
    %c16 = arith.constant 16 : index
    %140 = memref.load %arg5[%c16] : memref<98xf32, #tpu.memory_space<smem>>
    %c1_i32_55 = arith.constant 1 : i32
    %141 = tpu.dynamic_rotate %127 by %c1_i32_55 dim 1 : vector<1x256xf32>, i32 -> vector<1x256xf32>
    %142 = arith.mulf %141, %37 : vector<1x256xf32>
    %143 = vector.broadcast %140 : f32 to vector<1x256xf32>
    %144 = arith.mulf %143, %142 : vector<1x256xf32>
    %145 = arith.addf %119, %144 : vector<1x256xf32>
    %c17 = arith.constant 17 : index
    %146 = memref.load %arg5[%c17] : memref<98xf32, #tpu.memory_space<smem>>
    %147 = vector.broadcast %146 : f32 to vector<1x256xf32>
    %148 = arith.mulf %147, %127 : vector<1x256xf32>
    %149 = arith.addf %125, %148 : vector<1x256xf32>
    %c18 = arith.constant 18 : index
    %150 = memref.load %arg5[%c18] : memref<98xf32, #tpu.memory_space<smem>>
    %c255_i32_56 = arith.constant 255 : i32
    %151 = tpu.dynamic_rotate %127 by %c255_i32_56 dim 1 : vector<1x256xf32>, i32 -> vector<1x256xf32>
    %152 = arith.mulf %151, %38 : vector<1x256xf32>
    %153 = vector.broadcast %150 : f32 to vector<1x256xf32>
    %154 = arith.mulf %153, %152 : vector<1x256xf32>
    %155 = arith.addf %133, %154 : vector<1x256xf32>
    %c19 = arith.constant 19 : index
    %156 = memref.load %arg5[%c19] : memref<98xf32, #tpu.memory_space<smem>>
    %c254_i32_57 = arith.constant 254 : i32
    %157 = tpu.dynamic_rotate %127 by %c254_i32_57 dim 1 : vector<1x256xf32>, i32 -> vector<1x256xf32>
    %158 = arith.mulf %157, %39 : vector<1x256xf32>
    %159 = vector.broadcast %156 : f32 to vector<1x256xf32>
    %160 = arith.mulf %159, %158 : vector<1x256xf32>
    %161 = arith.addf %139, %160 : vector<1x256xf32>
    %c20 = arith.constant 20 : index
    %162 = memref.load %arg5[%c20] : memref<98xf32, #tpu.memory_space<smem>>
    %c253_i32_58 = arith.constant 253 : i32
    %163 = tpu.dynamic_rotate %127 by %c253_i32_58 dim 1 : vector<1x256xf32>, i32 -> vector<1x256xf32>
    %164 = arith.mulf %163, %40 : vector<1x256xf32>
    %165 = vector.broadcast %162 : f32 to vector<1x256xf32>
    %166 = arith.mulf %165, %164 : vector<1x256xf32>
    %167 = arith.addf %145, %166 : vector<1x256xf32>
    %c21 = arith.constant 21 : index
    %168 = memref.load %arg5[%c21] : memref<98xf32, #tpu.memory_space<smem>>
    %c3_i32_59 = arith.constant 3 : i32
    %169 = tpu.dynamic_rotate %27 by %c3_i32_59 dim 1 : vector<1x256xf32>, i32 -> vector<1x256xf32>
    %170 = arith.mulf %169, %35 : vector<1x256xf32>
    %171 = vector.broadcast %168 : f32 to vector<1x256xf32>
    %172 = arith.mulf %171, %170 : vector<1x256xf32>
    %173 = arith.addf %149, %172 : vector<1x256xf32>
    %c22 = arith.constant 22 : index
    %174 = memref.load %arg5[%c22] : memref<98xf32, #tpu.memory_space<smem>>
    %c2_i32_60 = arith.constant 2 : i32
    %175 = tpu.dynamic_rotate %27 by %c2_i32_60 dim 1 : vector<1x256xf32>, i32 -> vector<1x256xf32>
    %176 = arith.mulf %175, %36 : vector<1x256xf32>
    %177 = vector.broadcast %174 : f32 to vector<1x256xf32>
    %178 = arith.mulf %177, %176 : vector<1x256xf32>
    %179 = arith.addf %155, %178 : vector<1x256xf32>
    %c23 = arith.constant 23 : index
    %180 = memref.load %arg5[%c23] : memref<98xf32, #tpu.memory_space<smem>>
    %c1_i32_61 = arith.constant 1 : i32
    %181 = tpu.dynamic_rotate %27 by %c1_i32_61 dim 1 : vector<1x256xf32>, i32 -> vector<1x256xf32>
    %182 = arith.mulf %181, %37 : vector<1x256xf32>
    %183 = vector.broadcast %180 : f32 to vector<1x256xf32>
    %184 = arith.mulf %183, %182 : vector<1x256xf32>
    %185 = arith.addf %161, %184 : vector<1x256xf32>
    %c24 = arith.constant 24 : index
    %186 = memref.load %arg5[%c24] : memref<98xf32, #tpu.memory_space<smem>>
    %187 = vector.broadcast %186 : f32 to vector<1x256xf32>
    %188 = arith.mulf %187, %27 : vector<1x256xf32>
    %189 = arith.addf %167, %188 : vector<1x256xf32>
    %c25 = arith.constant 25 : index
    %190 = memref.load %arg5[%c25] : memref<98xf32, #tpu.memory_space<smem>>
    %c255_i32_62 = arith.constant 255 : i32
    %191 = tpu.dynamic_rotate %27 by %c255_i32_62 dim 1 : vector<1x256xf32>, i32 -> vector<1x256xf32>
    %192 = arith.mulf %191, %38 : vector<1x256xf32>
    %193 = vector.broadcast %190 : f32 to vector<1x256xf32>
    %194 = arith.mulf %193, %192 : vector<1x256xf32>
    %195 = arith.addf %173, %194 : vector<1x256xf32>
    %c26 = arith.constant 26 : index
    %196 = memref.load %arg5[%c26] : memref<98xf32, #tpu.memory_space<smem>>
    %c254_i32_63 = arith.constant 254 : i32
    %197 = tpu.dynamic_rotate %27 by %c254_i32_63 dim 1 : vector<1x256xf32>, i32 -> vector<1x256xf32>
    %198 = arith.mulf %197, %39 : vector<1x256xf32>
    %199 = vector.broadcast %196 : f32 to vector<1x256xf32>
    %200 = arith.mulf %199, %198 : vector<1x256xf32>
    %201 = arith.addf %179, %200 : vector<1x256xf32>
    %c27 = arith.constant 27 : index
    %202 = memref.load %arg5[%c27] : memref<98xf32, #tpu.memory_space<smem>>
    %c253_i32_64 = arith.constant 253 : i32
    %203 = tpu.dynamic_rotate %27 by %c253_i32_64 dim 1 : vector<1x256xf32>, i32 -> vector<1x256xf32>
    %204 = arith.mulf %203, %40 : vector<1x256xf32>
    %205 = vector.broadcast %202 : f32 to vector<1x256xf32>
    %206 = arith.mulf %205, %204 : vector<1x256xf32>
    %207 = arith.addf %185, %206 : vector<1x256xf32>
    %c240_i32 = arith.constant 240 : i32
    %208 = tpu.dynamic_rotate %27 by %c240_i32 dim 1 : vector<1x256xf32>, i32 -> vector<1x256xf32>
    %209 = arith.mulf %208, %32 : vector<1x256xf32>
    %c28 = arith.constant 28 : index
    %210 = memref.load %arg5[%c28] : memref<98xf32, #tpu.memory_space<smem>>
    %c3_i32_65 = arith.constant 3 : i32
    %211 = tpu.dynamic_rotate %209 by %c3_i32_65 dim 1 : vector<1x256xf32>, i32 -> vector<1x256xf32>
    %212 = arith.mulf %211, %35 : vector<1x256xf32>
    %213 = vector.broadcast %210 : f32 to vector<1x256xf32>
    %214 = arith.mulf %213, %212 : vector<1x256xf32>
    %215 = arith.addf %189, %214 : vector<1x256xf32>
    %c29 = arith.constant 29 : index
    %216 = memref.load %arg5[%c29] : memref<98xf32, #tpu.memory_space<smem>>
    %c2_i32_66 = arith.constant 2 : i32
    %217 = tpu.dynamic_rotate %209 by %c2_i32_66 dim 1 : vector<1x256xf32>, i32 -> vector<1x256xf32>
    %218 = arith.mulf %217, %36 : vector<1x256xf32>
    %219 = vector.broadcast %216 : f32 to vector<1x256xf32>
    %220 = arith.mulf %219, %218 : vector<1x256xf32>
    %221 = arith.addf %195, %220 : vector<1x256xf32>
    %c30 = arith.constant 30 : index
    %222 = memref.load %arg5[%c30] : memref<98xf32, #tpu.memory_space<smem>>
    %c1_i32_67 = arith.constant 1 : i32
    %223 = tpu.dynamic_rotate %209 by %c1_i32_67 dim 1 : vector<1x256xf32>, i32 -> vector<1x256xf32>
    %224 = arith.mulf %223, %37 : vector<1x256xf32>
    %225 = vector.broadcast %222 : f32 to vector<1x256xf32>
    %226 = arith.mulf %225, %224 : vector<1x256xf32>
    %227 = arith.addf %201, %226 : vector<1x256xf32>
    %c31 = arith.constant 31 : index
    %228 = memref.load %arg5[%c31] : memref<98xf32, #tpu.memory_space<smem>>
    %229 = vector.broadcast %228 : f32 to vector<1x256xf32>
    %230 = arith.mulf %229, %209 : vector<1x256xf32>
    %231 = arith.addf %207, %230 : vector<1x256xf32>
    %c32 = arith.constant 32 : index
    %232 = memref.load %arg5[%c32] : memref<98xf32, #tpu.memory_space<smem>>
    %c255_i32_68 = arith.constant 255 : i32
    %233 = tpu.dynamic_rotate %209 by %c255_i32_68 dim 1 : vector<1x256xf32>, i32 -> vector<1x256xf32>
    %234 = arith.mulf %233, %38 : vector<1x256xf32>
    %235 = vector.broadcast %232 : f32 to vector<1x256xf32>
    %236 = arith.mulf %235, %234 : vector<1x256xf32>
    %237 = arith.addf %215, %236 : vector<1x256xf32>
    %c33 = arith.constant 33 : index
    %238 = memref.load %arg5[%c33] : memref<98xf32, #tpu.memory_space<smem>>
    %c254_i32_69 = arith.constant 254 : i32
    %239 = tpu.dynamic_rotate %209 by %c254_i32_69 dim 1 : vector<1x256xf32>, i32 -> vector<1x256xf32>
    %240 = arith.mulf %239, %39 : vector<1x256xf32>
    %241 = vector.broadcast %238 : f32 to vector<1x256xf32>
    %242 = arith.mulf %241, %240 : vector<1x256xf32>
    %243 = arith.addf %221, %242 : vector<1x256xf32>
    %c34 = arith.constant 34 : index
    %244 = memref.load %arg5[%c34] : memref<98xf32, #tpu.memory_space<smem>>
    %c253_i32_70 = arith.constant 253 : i32
    %245 = tpu.dynamic_rotate %209 by %c253_i32_70 dim 1 : vector<1x256xf32>, i32 -> vector<1x256xf32>
    %246 = arith.mulf %245, %40 : vector<1x256xf32>
    %247 = vector.broadcast %244 : f32 to vector<1x256xf32>
    %248 = arith.mulf %247, %246 : vector<1x256xf32>
    %249 = arith.addf %227, %248 : vector<1x256xf32>
    %c224_i32 = arith.constant 224 : i32
    %250 = tpu.dynamic_rotate %27 by %c224_i32 dim 1 : vector<1x256xf32>, i32 -> vector<1x256xf32>
    %251 = arith.mulf %250, %33 : vector<1x256xf32>
    %c35 = arith.constant 35 : index
    %252 = memref.load %arg5[%c35] : memref<98xf32, #tpu.memory_space<smem>>
    %c3_i32_71 = arith.constant 3 : i32
    %253 = tpu.dynamic_rotate %251 by %c3_i32_71 dim 1 : vector<1x256xf32>, i32 -> vector<1x256xf32>
    %254 = arith.mulf %253, %35 : vector<1x256xf32>
    %255 = vector.broadcast %252 : f32 to vector<1x256xf32>
    %256 = arith.mulf %255, %254 : vector<1x256xf32>
    %257 = arith.addf %231, %256 : vector<1x256xf32>
    %c36 = arith.constant 36 : index
    %258 = memref.load %arg5[%c36] : memref<98xf32, #tpu.memory_space<smem>>
    %c2_i32_72 = arith.constant 2 : i32
    %259 = tpu.dynamic_rotate %251 by %c2_i32_72 dim 1 : vector<1x256xf32>, i32 -> vector<1x256xf32>
    %260 = arith.mulf %259, %36 : vector<1x256xf32>
    %261 = vector.broadcast %258 : f32 to vector<1x256xf32>
    %262 = arith.mulf %261, %260 : vector<1x256xf32>
    %263 = arith.addf %237, %262 : vector<1x256xf32>
    %c37 = arith.constant 37 : index
    %264 = memref.load %arg5[%c37] : memref<98xf32, #tpu.memory_space<smem>>
    %c1_i32_73 = arith.constant 1 : i32
    %265 = tpu.dynamic_rotate %251 by %c1_i32_73 dim 1 : vector<1x256xf32>, i32 -> vector<1x256xf32>
    %266 = arith.mulf %265, %37 : vector<1x256xf32>
    %267 = vector.broadcast %264 : f32 to vector<1x256xf32>
    %268 = arith.mulf %267, %266 : vector<1x256xf32>
    %269 = arith.addf %243, %268 : vector<1x256xf32>
    %c38 = arith.constant 38 : index
    %270 = memref.load %arg5[%c38] : memref<98xf32, #tpu.memory_space<smem>>
    %271 = vector.broadcast %270 : f32 to vector<1x256xf32>
    %272 = arith.mulf %271, %251 : vector<1x256xf32>
    %273 = arith.addf %249, %272 : vector<1x256xf32>
    %c39 = arith.constant 39 : index
    %274 = memref.load %arg5[%c39] : memref<98xf32, #tpu.memory_space<smem>>
    %c255_i32_74 = arith.constant 255 : i32
    %275 = tpu.dynamic_rotate %251 by %c255_i32_74 dim 1 : vector<1x256xf32>, i32 -> vector<1x256xf32>
    %276 = arith.mulf %275, %38 : vector<1x256xf32>
    %277 = vector.broadcast %274 : f32 to vector<1x256xf32>
    %278 = arith.mulf %277, %276 : vector<1x256xf32>
    %279 = arith.addf %257, %278 : vector<1x256xf32>
    %c40 = arith.constant 40 : index
    %280 = memref.load %arg5[%c40] : memref<98xf32, #tpu.memory_space<smem>>
    %c254_i32_75 = arith.constant 254 : i32
    %281 = tpu.dynamic_rotate %251 by %c254_i32_75 dim 1 : vector<1x256xf32>, i32 -> vector<1x256xf32>
    %282 = arith.mulf %281, %39 : vector<1x256xf32>
    %283 = vector.broadcast %280 : f32 to vector<1x256xf32>
    %284 = arith.mulf %283, %282 : vector<1x256xf32>
    %285 = arith.addf %263, %284 : vector<1x256xf32>
    %c41 = arith.constant 41 : index
    %286 = memref.load %arg5[%c41] : memref<98xf32, #tpu.memory_space<smem>>
    %c253_i32_76 = arith.constant 253 : i32
    %287 = tpu.dynamic_rotate %251 by %c253_i32_76 dim 1 : vector<1x256xf32>, i32 -> vector<1x256xf32>
    %288 = arith.mulf %287, %40 : vector<1x256xf32>
    %289 = vector.broadcast %286 : f32 to vector<1x256xf32>
    %290 = arith.mulf %289, %288 : vector<1x256xf32>
    %291 = arith.addf %269, %290 : vector<1x256xf32>
    %c208_i32 = arith.constant 208 : i32
    %292 = tpu.dynamic_rotate %27 by %c208_i32 dim 1 : vector<1x256xf32>, i32 -> vector<1x256xf32>
    %293 = arith.mulf %292, %34 : vector<1x256xf32>
    %c42 = arith.constant 42 : index
    %294 = memref.load %arg5[%c42] : memref<98xf32, #tpu.memory_space<smem>>
    %c3_i32_77 = arith.constant 3 : i32
    %295 = tpu.dynamic_rotate %293 by %c3_i32_77 dim 1 : vector<1x256xf32>, i32 -> vector<1x256xf32>
    %296 = arith.mulf %295, %35 : vector<1x256xf32>
    %297 = vector.broadcast %294 : f32 to vector<1x256xf32>
    %298 = arith.mulf %297, %296 : vector<1x256xf32>
    %299 = arith.addf %273, %298 : vector<1x256xf32>
    %c43 = arith.constant 43 : index
    %300 = memref.load %arg5[%c43] : memref<98xf32, #tpu.memory_space<smem>>
    %c2_i32_78 = arith.constant 2 : i32
    %301 = tpu.dynamic_rotate %293 by %c2_i32_78 dim 1 : vector<1x256xf32>, i32 -> vector<1x256xf32>
    %302 = arith.mulf %301, %36 : vector<1x256xf32>
    %303 = vector.broadcast %300 : f32 to vector<1x256xf32>
    %304 = arith.mulf %303, %302 : vector<1x256xf32>
    %305 = arith.addf %279, %304 : vector<1x256xf32>
    %c44 = arith.constant 44 : index
    %306 = memref.load %arg5[%c44] : memref<98xf32, #tpu.memory_space<smem>>
    %c1_i32_79 = arith.constant 1 : i32
    %307 = tpu.dynamic_rotate %293 by %c1_i32_79 dim 1 : vector<1x256xf32>, i32 -> vector<1x256xf32>
    %308 = arith.mulf %307, %37 : vector<1x256xf32>
    %309 = vector.broadcast %306 : f32 to vector<1x256xf32>
    %310 = arith.mulf %309, %308 : vector<1x256xf32>
    %311 = arith.addf %285, %310 : vector<1x256xf32>
    %c45 = arith.constant 45 : index
    %312 = memref.load %arg5[%c45] : memref<98xf32, #tpu.memory_space<smem>>
    %313 = vector.broadcast %312 : f32 to vector<1x256xf32>
    %314 = arith.mulf %313, %293 : vector<1x256xf32>
    %315 = arith.addf %291, %314 : vector<1x256xf32>
    %c46 = arith.constant 46 : index
    %316 = memref.load %arg5[%c46] : memref<98xf32, #tpu.memory_space<smem>>
    %c255_i32_80 = arith.constant 255 : i32
    %317 = tpu.dynamic_rotate %293 by %c255_i32_80 dim 1 : vector<1x256xf32>, i32 -> vector<1x256xf32>
    %318 = arith.mulf %317, %38 : vector<1x256xf32>
    %319 = vector.broadcast %316 : f32 to vector<1x256xf32>
    %320 = arith.mulf %319, %318 : vector<1x256xf32>
    %321 = arith.addf %299, %320 : vector<1x256xf32>
    %c47 = arith.constant 47 : index
    %322 = memref.load %arg5[%c47] : memref<98xf32, #tpu.memory_space<smem>>
    %c254_i32_81 = arith.constant 254 : i32
    %323 = tpu.dynamic_rotate %293 by %c254_i32_81 dim 1 : vector<1x256xf32>, i32 -> vector<1x256xf32>
    %324 = arith.mulf %323, %39 : vector<1x256xf32>
    %325 = vector.broadcast %322 : f32 to vector<1x256xf32>
    %326 = arith.mulf %325, %324 : vector<1x256xf32>
    %327 = arith.addf %305, %326 : vector<1x256xf32>
    %c48 = arith.constant 48 : index
    %328 = memref.load %arg5[%c48] : memref<98xf32, #tpu.memory_space<smem>>
    %c253_i32_82 = arith.constant 253 : i32
    %329 = tpu.dynamic_rotate %293 by %c253_i32_82 dim 1 : vector<1x256xf32>, i32 -> vector<1x256xf32>
    %330 = arith.mulf %329, %40 : vector<1x256xf32>
    %331 = vector.broadcast %328 : f32 to vector<1x256xf32>
    %332 = arith.mulf %331, %330 : vector<1x256xf32>
    %333 = arith.addf %311, %332 : vector<1x256xf32>
    %c48_i32_83 = arith.constant 48 : i32
    %334 = tpu.dynamic_rotate %28 by %c48_i32_83 dim 1 : vector<1x256xf32>, i32 -> vector<1x256xf32>
    %335 = arith.mulf %334, %29 : vector<1x256xf32>
    %c49 = arith.constant 49 : index
    %336 = memref.load %arg5[%c49] : memref<98xf32, #tpu.memory_space<smem>>
    %c3_i32_84 = arith.constant 3 : i32
    %337 = tpu.dynamic_rotate %335 by %c3_i32_84 dim 1 : vector<1x256xf32>, i32 -> vector<1x256xf32>
    %338 = arith.mulf %337, %35 : vector<1x256xf32>
    %339 = vector.broadcast %336 : f32 to vector<1x256xf32>
    %340 = arith.mulf %339, %338 : vector<1x256xf32>
    %341 = arith.addf %315, %340 : vector<1x256xf32>
    %c50 = arith.constant 50 : index
    %342 = memref.load %arg5[%c50] : memref<98xf32, #tpu.memory_space<smem>>
    %c2_i32_85 = arith.constant 2 : i32
    %343 = tpu.dynamic_rotate %335 by %c2_i32_85 dim 1 : vector<1x256xf32>, i32 -> vector<1x256xf32>
    %344 = arith.mulf %343, %36 : vector<1x256xf32>
    %345 = vector.broadcast %342 : f32 to vector<1x256xf32>
    %346 = arith.mulf %345, %344 : vector<1x256xf32>
    %347 = arith.addf %321, %346 : vector<1x256xf32>
    %c51 = arith.constant 51 : index
    %348 = memref.load %arg5[%c51] : memref<98xf32, #tpu.memory_space<smem>>
    %c1_i32_86 = arith.constant 1 : i32
    %349 = tpu.dynamic_rotate %335 by %c1_i32_86 dim 1 : vector<1x256xf32>, i32 -> vector<1x256xf32>
    %350 = arith.mulf %349, %37 : vector<1x256xf32>
    %351 = vector.broadcast %348 : f32 to vector<1x256xf32>
    %352 = arith.mulf %351, %350 : vector<1x256xf32>
    %353 = arith.addf %327, %352 : vector<1x256xf32>
    %c52 = arith.constant 52 : index
    %354 = memref.load %arg5[%c52] : memref<98xf32, #tpu.memory_space<smem>>
    %355 = vector.broadcast %354 : f32 to vector<1x256xf32>
    %356 = arith.mulf %355, %335 : vector<1x256xf32>
    %357 = arith.addf %333, %356 : vector<1x256xf32>
    %c53 = arith.constant 53 : index
    %358 = memref.load %arg5[%c53] : memref<98xf32, #tpu.memory_space<smem>>
    %c255_i32_87 = arith.constant 255 : i32
    %359 = tpu.dynamic_rotate %335 by %c255_i32_87 dim 1 : vector<1x256xf32>, i32 -> vector<1x256xf32>
    %360 = arith.mulf %359, %38 : vector<1x256xf32>
    %361 = vector.broadcast %358 : f32 to vector<1x256xf32>
    %362 = arith.mulf %361, %360 : vector<1x256xf32>
    %363 = arith.addf %341, %362 : vector<1x256xf32>
    %c54 = arith.constant 54 : index
    %364 = memref.load %arg5[%c54] : memref<98xf32, #tpu.memory_space<smem>>
    %c254_i32_88 = arith.constant 254 : i32
    %365 = tpu.dynamic_rotate %335 by %c254_i32_88 dim 1 : vector<1x256xf32>, i32 -> vector<1x256xf32>
    %366 = arith.mulf %365, %39 : vector<1x256xf32>
    %367 = vector.broadcast %364 : f32 to vector<1x256xf32>
    %368 = arith.mulf %367, %366 : vector<1x256xf32>
    %369 = arith.addf %347, %368 : vector<1x256xf32>
    %c55 = arith.constant 55 : index
    %370 = memref.load %arg5[%c55] : memref<98xf32, #tpu.memory_space<smem>>
    %c253_i32_89 = arith.constant 253 : i32
    %371 = tpu.dynamic_rotate %335 by %c253_i32_89 dim 1 : vector<1x256xf32>, i32 -> vector<1x256xf32>
    %372 = arith.mulf %371, %40 : vector<1x256xf32>
    %373 = vector.broadcast %370 : f32 to vector<1x256xf32>
    %374 = arith.mulf %373, %372 : vector<1x256xf32>
    %375 = arith.addf %353, %374 : vector<1x256xf32>
    %c32_i32_90 = arith.constant 32 : i32
    %376 = tpu.dynamic_rotate %28 by %c32_i32_90 dim 1 : vector<1x256xf32>, i32 -> vector<1x256xf32>
    %377 = arith.mulf %376, %30 : vector<1x256xf32>
    %c56 = arith.constant 56 : index
    %378 = memref.load %arg5[%c56] : memref<98xf32, #tpu.memory_space<smem>>
    %c3_i32_91 = arith.constant 3 : i32
    %379 = tpu.dynamic_rotate %377 by %c3_i32_91 dim 1 : vector<1x256xf32>, i32 -> vector<1x256xf32>
    %380 = arith.mulf %379, %35 : vector<1x256xf32>
    %381 = vector.broadcast %378 : f32 to vector<1x256xf32>
    %382 = arith.mulf %381, %380 : vector<1x256xf32>
    %383 = arith.addf %357, %382 : vector<1x256xf32>
    %c57 = arith.constant 57 : index
    %384 = memref.load %arg5[%c57] : memref<98xf32, #tpu.memory_space<smem>>
    %c2_i32_92 = arith.constant 2 : i32
    %385 = tpu.dynamic_rotate %377 by %c2_i32_92 dim 1 : vector<1x256xf32>, i32 -> vector<1x256xf32>
    %386 = arith.mulf %385, %36 : vector<1x256xf32>
    %387 = vector.broadcast %384 : f32 to vector<1x256xf32>
    %388 = arith.mulf %387, %386 : vector<1x256xf32>
    %389 = arith.addf %363, %388 : vector<1x256xf32>
    %c58 = arith.constant 58 : index
    %390 = memref.load %arg5[%c58] : memref<98xf32, #tpu.memory_space<smem>>
    %c1_i32_93 = arith.constant 1 : i32
    %391 = tpu.dynamic_rotate %377 by %c1_i32_93 dim 1 : vector<1x256xf32>, i32 -> vector<1x256xf32>
    %392 = arith.mulf %391, %37 : vector<1x256xf32>
    %393 = vector.broadcast %390 : f32 to vector<1x256xf32>
    %394 = arith.mulf %393, %392 : vector<1x256xf32>
    %395 = arith.addf %369, %394 : vector<1x256xf32>
    %c59 = arith.constant 59 : index
    %396 = memref.load %arg5[%c59] : memref<98xf32, #tpu.memory_space<smem>>
    %397 = vector.broadcast %396 : f32 to vector<1x256xf32>
    %398 = arith.mulf %397, %377 : vector<1x256xf32>
    %399 = arith.addf %375, %398 : vector<1x256xf32>
    %c60 = arith.constant 60 : index
    %400 = memref.load %arg5[%c60] : memref<98xf32, #tpu.memory_space<smem>>
    %c255_i32_94 = arith.constant 255 : i32
    %401 = tpu.dynamic_rotate %377 by %c255_i32_94 dim 1 : vector<1x256xf32>, i32 -> vector<1x256xf32>
    %402 = arith.mulf %401, %38 : vector<1x256xf32>
    %403 = vector.broadcast %400 : f32 to vector<1x256xf32>
    %404 = arith.mulf %403, %402 : vector<1x256xf32>
    %405 = arith.addf %383, %404 : vector<1x256xf32>
    %c61 = arith.constant 61 : index
    %406 = memref.load %arg5[%c61] : memref<98xf32, #tpu.memory_space<smem>>
    %c254_i32_95 = arith.constant 254 : i32
    %407 = tpu.dynamic_rotate %377 by %c254_i32_95 dim 1 : vector<1x256xf32>, i32 -> vector<1x256xf32>
    %408 = arith.mulf %407, %39 : vector<1x256xf32>
    %409 = vector.broadcast %406 : f32 to vector<1x256xf32>
    %410 = arith.mulf %409, %408 : vector<1x256xf32>
    %411 = arith.addf %389, %410 : vector<1x256xf32>
    %c62 = arith.constant 62 : index
    %412 = memref.load %arg5[%c62] : memref<98xf32, #tpu.memory_space<smem>>
    %c253_i32_96 = arith.constant 253 : i32
    %413 = tpu.dynamic_rotate %377 by %c253_i32_96 dim 1 : vector<1x256xf32>, i32 -> vector<1x256xf32>
    %414 = arith.mulf %413, %40 : vector<1x256xf32>
    %415 = vector.broadcast %412 : f32 to vector<1x256xf32>
    %416 = arith.mulf %415, %414 : vector<1x256xf32>
    %417 = arith.addf %395, %416 : vector<1x256xf32>
    %c16_i32_97 = arith.constant 16 : i32
    %418 = tpu.dynamic_rotate %28 by %c16_i32_97 dim 1 : vector<1x256xf32>, i32 -> vector<1x256xf32>
    %419 = arith.mulf %418, %31 : vector<1x256xf32>
    %c63 = arith.constant 63 : index
    %420 = memref.load %arg5[%c63] : memref<98xf32, #tpu.memory_space<smem>>
    %c3_i32_98 = arith.constant 3 : i32
    %421 = tpu.dynamic_rotate %419 by %c3_i32_98 dim 1 : vector<1x256xf32>, i32 -> vector<1x256xf32>
    %422 = arith.mulf %421, %35 : vector<1x256xf32>
    %423 = vector.broadcast %420 : f32 to vector<1x256xf32>
    %424 = arith.mulf %423, %422 : vector<1x256xf32>
    %425 = arith.addf %399, %424 : vector<1x256xf32>
    %c64 = arith.constant 64 : index
    %426 = memref.load %arg5[%c64] : memref<98xf32, #tpu.memory_space<smem>>
    %c2_i32_99 = arith.constant 2 : i32
    %427 = tpu.dynamic_rotate %419 by %c2_i32_99 dim 1 : vector<1x256xf32>, i32 -> vector<1x256xf32>
    %428 = arith.mulf %427, %36 : vector<1x256xf32>
    %429 = vector.broadcast %426 : f32 to vector<1x256xf32>
    %430 = arith.mulf %429, %428 : vector<1x256xf32>
    %431 = arith.addf %405, %430 : vector<1x256xf32>
    %c65 = arith.constant 65 : index
    %432 = memref.load %arg5[%c65] : memref<98xf32, #tpu.memory_space<smem>>
    %c1_i32_100 = arith.constant 1 : i32
    %433 = tpu.dynamic_rotate %419 by %c1_i32_100 dim 1 : vector<1x256xf32>, i32 -> vector<1x256xf32>
    %434 = arith.mulf %433, %37 : vector<1x256xf32>
    %435 = vector.broadcast %432 : f32 to vector<1x256xf32>
    %436 = arith.mulf %435, %434 : vector<1x256xf32>
    %437 = arith.addf %411, %436 : vector<1x256xf32>
    %c66 = arith.constant 66 : index
    %438 = memref.load %arg5[%c66] : memref<98xf32, #tpu.memory_space<smem>>
    %439 = vector.broadcast %438 : f32 to vector<1x256xf32>
    %440 = arith.mulf %439, %419 : vector<1x256xf32>
    %441 = arith.addf %417, %440 : vector<1x256xf32>
    %c67 = arith.constant 67 : index
    %442 = memref.load %arg5[%c67] : memref<98xf32, #tpu.memory_space<smem>>
    %c255_i32_101 = arith.constant 255 : i32
    %443 = tpu.dynamic_rotate %419 by %c255_i32_101 dim 1 : vector<1x256xf32>, i32 -> vector<1x256xf32>
    %444 = arith.mulf %443, %38 : vector<1x256xf32>
    %445 = vector.broadcast %442 : f32 to vector<1x256xf32>
    %446 = arith.mulf %445, %444 : vector<1x256xf32>
    %447 = arith.addf %425, %446 : vector<1x256xf32>
    %c68 = arith.constant 68 : index
    %448 = memref.load %arg5[%c68] : memref<98xf32, #tpu.memory_space<smem>>
    %c254_i32_102 = arith.constant 254 : i32
    %449 = tpu.dynamic_rotate %419 by %c254_i32_102 dim 1 : vector<1x256xf32>, i32 -> vector<1x256xf32>
    %450 = arith.mulf %449, %39 : vector<1x256xf32>
    %451 = vector.broadcast %448 : f32 to vector<1x256xf32>
    %452 = arith.mulf %451, %450 : vector<1x256xf32>
    %453 = arith.addf %431, %452 : vector<1x256xf32>
    %c69 = arith.constant 69 : index
    %454 = memref.load %arg5[%c69] : memref<98xf32, #tpu.memory_space<smem>>
    %c253_i32_103 = arith.constant 253 : i32
    %455 = tpu.dynamic_rotate %419 by %c253_i32_103 dim 1 : vector<1x256xf32>, i32 -> vector<1x256xf32>
    %456 = arith.mulf %455, %40 : vector<1x256xf32>
    %457 = vector.broadcast %454 : f32 to vector<1x256xf32>
    %458 = arith.mulf %457, %456 : vector<1x256xf32>
    %459 = arith.addf %437, %458 : vector<1x256xf32>
    %c70 = arith.constant 70 : index
    %460 = memref.load %arg5[%c70] : memref<98xf32, #tpu.memory_space<smem>>
    %c3_i32_104 = arith.constant 3 : i32
    %461 = tpu.dynamic_rotate %28 by %c3_i32_104 dim 1 : vector<1x256xf32>, i32 -> vector<1x256xf32>
    %462 = arith.mulf %461, %35 : vector<1x256xf32>
    %463 = vector.broadcast %460 : f32 to vector<1x256xf32>
    %464 = arith.mulf %463, %462 : vector<1x256xf32>
    %465 = arith.addf %441, %464 : vector<1x256xf32>
    %c71 = arith.constant 71 : index
    %466 = memref.load %arg5[%c71] : memref<98xf32, #tpu.memory_space<smem>>
    %c2_i32_105 = arith.constant 2 : i32
    %467 = tpu.dynamic_rotate %28 by %c2_i32_105 dim 1 : vector<1x256xf32>, i32 -> vector<1x256xf32>
    %468 = arith.mulf %467, %36 : vector<1x256xf32>
    %469 = vector.broadcast %466 : f32 to vector<1x256xf32>
    %470 = arith.mulf %469, %468 : vector<1x256xf32>
    %471 = arith.addf %447, %470 : vector<1x256xf32>
    %c72 = arith.constant 72 : index
    %472 = memref.load %arg5[%c72] : memref<98xf32, #tpu.memory_space<smem>>
    %c1_i32_106 = arith.constant 1 : i32
    %473 = tpu.dynamic_rotate %28 by %c1_i32_106 dim 1 : vector<1x256xf32>, i32 -> vector<1x256xf32>
    %474 = arith.mulf %473, %37 : vector<1x256xf32>
    %475 = vector.broadcast %472 : f32 to vector<1x256xf32>
    %476 = arith.mulf %475, %474 : vector<1x256xf32>
    %477 = arith.addf %453, %476 : vector<1x256xf32>
    %c73 = arith.constant 73 : index
    %478 = memref.load %arg5[%c73] : memref<98xf32, #tpu.memory_space<smem>>
    %479 = vector.broadcast %478 : f32 to vector<1x256xf32>
    %480 = arith.mulf %479, %28 : vector<1x256xf32>
    %481 = arith.addf %459, %480 : vector<1x256xf32>
    %c74 = arith.constant 74 : index
    %482 = memref.load %arg5[%c74] : memref<98xf32, #tpu.memory_space<smem>>
    %c255_i32_107 = arith.constant 255 : i32
    %483 = tpu.dynamic_rotate %28 by %c255_i32_107 dim 1 : vector<1x256xf32>, i32 -> vector<1x256xf32>
    %484 = arith.mulf %483, %38 : vector<1x256xf32>
    %485 = vector.broadcast %482 : f32 to vector<1x256xf32>
    %486 = arith.mulf %485, %484 : vector<1x256xf32>
    %487 = arith.addf %465, %486 : vector<1x256xf32>
    %c75 = arith.constant 75 : index
    %488 = memref.load %arg5[%c75] : memref<98xf32, #tpu.memory_space<smem>>
    %c254_i32_108 = arith.constant 254 : i32
    %489 = tpu.dynamic_rotate %28 by %c254_i32_108 dim 1 : vector<1x256xf32>, i32 -> vector<1x256xf32>
    %490 = arith.mulf %489, %39 : vector<1x256xf32>
    %491 = vector.broadcast %488 : f32 to vector<1x256xf32>
    %492 = arith.mulf %491, %490 : vector<1x256xf32>
    %493 = arith.addf %471, %492 : vector<1x256xf32>
    %c76 = arith.constant 76 : index
    %494 = memref.load %arg5[%c76] : memref<98xf32, #tpu.memory_space<smem>>
    %c253_i32_109 = arith.constant 253 : i32
    %495 = tpu.dynamic_rotate %28 by %c253_i32_109 dim 1 : vector<1x256xf32>, i32 -> vector<1x256xf32>
    %496 = arith.mulf %495, %40 : vector<1x256xf32>
    %497 = vector.broadcast %494 : f32 to vector<1x256xf32>
    %498 = arith.mulf %497, %496 : vector<1x256xf32>
    %499 = arith.addf %477, %498 : vector<1x256xf32>
    %c240_i32_110 = arith.constant 240 : i32
    %500 = tpu.dynamic_rotate %28 by %c240_i32_110 dim 1 : vector<1x256xf32>, i32 -> vector<1x256xf32>
    %501 = arith.mulf %500, %32 : vector<1x256xf32>
    %c77 = arith.constant 77 : index
    %502 = memref.load %arg5[%c77] : memref<98xf32, #tpu.memory_space<smem>>
    %c3_i32_111 = arith.constant 3 : i32
    %503 = tpu.dynamic_rotate %501 by %c3_i32_111 dim 1 : vector<1x256xf32>, i32 -> vector<1x256xf32>
    %504 = arith.mulf %503, %35 : vector<1x256xf32>
    %505 = vector.broadcast %502 : f32 to vector<1x256xf32>
    %506 = arith.mulf %505, %504 : vector<1x256xf32>
    %507 = arith.addf %481, %506 : vector<1x256xf32>
    %c78 = arith.constant 78 : index
    %508 = memref.load %arg5[%c78] : memref<98xf32, #tpu.memory_space<smem>>
    %c2_i32_112 = arith.constant 2 : i32
    %509 = tpu.dynamic_rotate %501 by %c2_i32_112 dim 1 : vector<1x256xf32>, i32 -> vector<1x256xf32>
    %510 = arith.mulf %509, %36 : vector<1x256xf32>
    %511 = vector.broadcast %508 : f32 to vector<1x256xf32>
    %512 = arith.mulf %511, %510 : vector<1x256xf32>
    %513 = arith.addf %487, %512 : vector<1x256xf32>
    %c79 = arith.constant 79 : index
    %514 = memref.load %arg5[%c79] : memref<98xf32, #tpu.memory_space<smem>>
    %c1_i32_113 = arith.constant 1 : i32
    %515 = tpu.dynamic_rotate %501 by %c1_i32_113 dim 1 : vector<1x256xf32>, i32 -> vector<1x256xf32>
    %516 = arith.mulf %515, %37 : vector<1x256xf32>
    %517 = vector.broadcast %514 : f32 to vector<1x256xf32>
    %518 = arith.mulf %517, %516 : vector<1x256xf32>
    %519 = arith.addf %493, %518 : vector<1x256xf32>
    %c80 = arith.constant 80 : index
    %520 = memref.load %arg5[%c80] : memref<98xf32, #tpu.memory_space<smem>>
    %521 = vector.broadcast %520 : f32 to vector<1x256xf32>
    %522 = arith.mulf %521, %501 : vector<1x256xf32>
    %523 = arith.addf %499, %522 : vector<1x256xf32>
    %c81 = arith.constant 81 : index
    %524 = memref.load %arg5[%c81] : memref<98xf32, #tpu.memory_space<smem>>
    %c255_i32_114 = arith.constant 255 : i32
    %525 = tpu.dynamic_rotate %501 by %c255_i32_114 dim 1 : vector<1x256xf32>, i32 -> vector<1x256xf32>
    %526 = arith.mulf %525, %38 : vector<1x256xf32>
    %527 = vector.broadcast %524 : f32 to vector<1x256xf32>
    %528 = arith.mulf %527, %526 : vector<1x256xf32>
    %529 = arith.addf %507, %528 : vector<1x256xf32>
    %c82 = arith.constant 82 : index
    %530 = memref.load %arg5[%c82] : memref<98xf32, #tpu.memory_space<smem>>
    %c254_i32_115 = arith.constant 254 : i32
    %531 = tpu.dynamic_rotate %501 by %c254_i32_115 dim 1 : vector<1x256xf32>, i32 -> vector<1x256xf32>
    %532 = arith.mulf %531, %39 : vector<1x256xf32>
    %533 = vector.broadcast %530 : f32 to vector<1x256xf32>
    %534 = arith.mulf %533, %532 : vector<1x256xf32>
    %535 = arith.addf %513, %534 : vector<1x256xf32>
    %c83 = arith.constant 83 : index
    %536 = memref.load %arg5[%c83] : memref<98xf32, #tpu.memory_space<smem>>
    %c253_i32_116 = arith.constant 253 : i32
    %537 = tpu.dynamic_rotate %501 by %c253_i32_116 dim 1 : vector<1x256xf32>, i32 -> vector<1x256xf32>
    %538 = arith.mulf %537, %40 : vector<1x256xf32>
    %539 = vector.broadcast %536 : f32 to vector<1x256xf32>
    %540 = arith.mulf %539, %538 : vector<1x256xf32>
    %541 = arith.addf %519, %540 : vector<1x256xf32>
    %c224_i32_117 = arith.constant 224 : i32
    %542 = tpu.dynamic_rotate %28 by %c224_i32_117 dim 1 : vector<1x256xf32>, i32 -> vector<1x256xf32>
    %543 = arith.mulf %542, %33 : vector<1x256xf32>
    %c84 = arith.constant 84 : index
    %544 = memref.load %arg5[%c84] : memref<98xf32, #tpu.memory_space<smem>>
    %c3_i32_118 = arith.constant 3 : i32
    %545 = tpu.dynamic_rotate %543 by %c3_i32_118 dim 1 : vector<1x256xf32>, i32 -> vector<1x256xf32>
    %546 = arith.mulf %545, %35 : vector<1x256xf32>
    %547 = vector.broadcast %544 : f32 to vector<1x256xf32>
    %548 = arith.mulf %547, %546 : vector<1x256xf32>
    %549 = arith.addf %523, %548 : vector<1x256xf32>
    %c85 = arith.constant 85 : index
    %550 = memref.load %arg5[%c85] : memref<98xf32, #tpu.memory_space<smem>>
    %c2_i32_119 = arith.constant 2 : i32
    %551 = tpu.dynamic_rotate %543 by %c2_i32_119 dim 1 : vector<1x256xf32>, i32 -> vector<1x256xf32>
    %552 = arith.mulf %551, %36 : vector<1x256xf32>
    %553 = vector.broadcast %550 : f32 to vector<1x256xf32>
    %554 = arith.mulf %553, %552 : vector<1x256xf32>
    %555 = arith.addf %529, %554 : vector<1x256xf32>
    %c86 = arith.constant 86 : index
    %556 = memref.load %arg5[%c86] : memref<98xf32, #tpu.memory_space<smem>>
    %c1_i32_120 = arith.constant 1 : i32
    %557 = tpu.dynamic_rotate %543 by %c1_i32_120 dim 1 : vector<1x256xf32>, i32 -> vector<1x256xf32>
    %558 = arith.mulf %557, %37 : vector<1x256xf32>
    %559 = vector.broadcast %556 : f32 to vector<1x256xf32>
    %560 = arith.mulf %559, %558 : vector<1x256xf32>
    %561 = arith.addf %535, %560 : vector<1x256xf32>
    %c87 = arith.constant 87 : index
    %562 = memref.load %arg5[%c87] : memref<98xf32, #tpu.memory_space<smem>>
    %563 = vector.broadcast %562 : f32 to vector<1x256xf32>
    %564 = arith.mulf %563, %543 : vector<1x256xf32>
    %565 = arith.addf %541, %564 : vector<1x256xf32>
    %c88 = arith.constant 88 : index
    %566 = memref.load %arg5[%c88] : memref<98xf32, #tpu.memory_space<smem>>
    %c255_i32_121 = arith.constant 255 : i32
    %567 = tpu.dynamic_rotate %543 by %c255_i32_121 dim 1 : vector<1x256xf32>, i32 -> vector<1x256xf32>
    %568 = arith.mulf %567, %38 : vector<1x256xf32>
    %569 = vector.broadcast %566 : f32 to vector<1x256xf32>
    %570 = arith.mulf %569, %568 : vector<1x256xf32>
    %571 = arith.addf %549, %570 : vector<1x256xf32>
    %c89 = arith.constant 89 : index
    %572 = memref.load %arg5[%c89] : memref<98xf32, #tpu.memory_space<smem>>
    %c254_i32_122 = arith.constant 254 : i32
    %573 = tpu.dynamic_rotate %543 by %c254_i32_122 dim 1 : vector<1x256xf32>, i32 -> vector<1x256xf32>
    %574 = arith.mulf %573, %39 : vector<1x256xf32>
    %575 = vector.broadcast %572 : f32 to vector<1x256xf32>
    %576 = arith.mulf %575, %574 : vector<1x256xf32>
    %577 = arith.addf %555, %576 : vector<1x256xf32>
    %c90 = arith.constant 90 : index
    %578 = memref.load %arg5[%c90] : memref<98xf32, #tpu.memory_space<smem>>
    %c253_i32_123 = arith.constant 253 : i32
    %579 = tpu.dynamic_rotate %543 by %c253_i32_123 dim 1 : vector<1x256xf32>, i32 -> vector<1x256xf32>
    %580 = arith.mulf %579, %40 : vector<1x256xf32>
    %581 = vector.broadcast %578 : f32 to vector<1x256xf32>
    %582 = arith.mulf %581, %580 : vector<1x256xf32>
    %583 = arith.addf %561, %582 : vector<1x256xf32>
    %c208_i32_124 = arith.constant 208 : i32
    %584 = tpu.dynamic_rotate %28 by %c208_i32_124 dim 1 : vector<1x256xf32>, i32 -> vector<1x256xf32>
    %585 = arith.mulf %584, %34 : vector<1x256xf32>
    %c91 = arith.constant 91 : index
    %586 = memref.load %arg5[%c91] : memref<98xf32, #tpu.memory_space<smem>>
    %c3_i32_125 = arith.constant 3 : i32
    %587 = tpu.dynamic_rotate %585 by %c3_i32_125 dim 1 : vector<1x256xf32>, i32 -> vector<1x256xf32>
    %588 = arith.mulf %587, %35 : vector<1x256xf32>
    %589 = vector.broadcast %586 : f32 to vector<1x256xf32>
    %590 = arith.mulf %589, %588 : vector<1x256xf32>
    %591 = arith.addf %565, %590 : vector<1x256xf32>
    %c92 = arith.constant 92 : index
    %592 = memref.load %arg5[%c92] : memref<98xf32, #tpu.memory_space<smem>>
    %c2_i32_126 = arith.constant 2 : i32
    %593 = tpu.dynamic_rotate %585 by %c2_i32_126 dim 1 : vector<1x256xf32>, i32 -> vector<1x256xf32>
    %594 = arith.mulf %593, %36 : vector<1x256xf32>
    %595 = vector.broadcast %592 : f32 to vector<1x256xf32>
    %596 = arith.mulf %595, %594 : vector<1x256xf32>
    %597 = arith.addf %571, %596 : vector<1x256xf32>
    %c93 = arith.constant 93 : index
    %598 = memref.load %arg5[%c93] : memref<98xf32, #tpu.memory_space<smem>>
    %c1_i32_127 = arith.constant 1 : i32
    %599 = tpu.dynamic_rotate %585 by %c1_i32_127 dim 1 : vector<1x256xf32>, i32 -> vector<1x256xf32>
    %600 = arith.mulf %599, %37 : vector<1x256xf32>
    %601 = vector.broadcast %598 : f32 to vector<1x256xf32>
    %602 = arith.mulf %601, %600 : vector<1x256xf32>
    %603 = arith.addf %577, %602 : vector<1x256xf32>
    %c94 = arith.constant 94 : index
    %604 = memref.load %arg5[%c94] : memref<98xf32, #tpu.memory_space<smem>>
    %605 = vector.broadcast %604 : f32 to vector<1x256xf32>
    %606 = arith.mulf %605, %585 : vector<1x256xf32>
    %607 = arith.addf %583, %606 : vector<1x256xf32>
    %c95 = arith.constant 95 : index
    %608 = memref.load %arg5[%c95] : memref<98xf32, #tpu.memory_space<smem>>
    %c255_i32_128 = arith.constant 255 : i32
    %609 = tpu.dynamic_rotate %585 by %c255_i32_128 dim 1 : vector<1x256xf32>, i32 -> vector<1x256xf32>
    %610 = arith.mulf %609, %38 : vector<1x256xf32>
    %611 = vector.broadcast %608 : f32 to vector<1x256xf32>
    %612 = arith.mulf %611, %610 : vector<1x256xf32>
    %613 = arith.addf %591, %612 : vector<1x256xf32>
    %c96 = arith.constant 96 : index
    %614 = memref.load %arg5[%c96] : memref<98xf32, #tpu.memory_space<smem>>
    %c254_i32_129 = arith.constant 254 : i32
    %615 = tpu.dynamic_rotate %585 by %c254_i32_129 dim 1 : vector<1x256xf32>, i32 -> vector<1x256xf32>
    %616 = arith.mulf %615, %39 : vector<1x256xf32>
    %617 = vector.broadcast %614 : f32 to vector<1x256xf32>
    %618 = arith.mulf %617, %616 : vector<1x256xf32>
    %619 = arith.addf %597, %618 : vector<1x256xf32>
    %c97 = arith.constant 97 : index
    %620 = memref.load %arg5[%c97] : memref<98xf32, #tpu.memory_space<smem>>
    %c253_i32_130 = arith.constant 253 : i32
    %621 = tpu.dynamic_rotate %585 by %c253_i32_130 dim 1 : vector<1x256xf32>, i32 -> vector<1x256xf32>
    %622 = arith.mulf %621, %40 : vector<1x256xf32>
    %623 = vector.broadcast %620 : f32 to vector<1x256xf32>
    %624 = arith.mulf %623, %622 : vector<1x256xf32>
    %625 = arith.addf %603, %624 : vector<1x256xf32>
    %626 = arith.addf %619, %625 : vector<1x256xf32>
    %627 = arith.addf %607, %613 : vector<1x256xf32>
    %628 = arith.addf %626, %627 : vector<1x256xf32>
    %629 = arith.negf %628 : vector<1x256xf32>
    %630 = math.exp %629 : vector<1x256xf32>
    %cst_131 = arith.constant 1.000000e+00 : f32
    %631 = vector.broadcast %cst_131 : f32 to vector<1x256xf32>
    %632 = arith.addf %631, %630 : vector<1x256xf32>
    %633 = arith.divf %631, %632 : vector<1x256xf32>
    %c0_132 = arith.constant 0 : index
    %c0_133 = arith.constant 0 : index
    %c0_134 = arith.constant 0 : index
    %634 = vector.load %arg6[%c0_132, %c0_133, %c0_134] : memref<1x16x256xf32, #tpu.memory_space<vmem>>, vector<1x16x256xf32>
    %635 = vector.shape_cast %633 : vector<1x256xf32> to vector<1x1x256xf32>
    %636 = vector.broadcast %635 : vector<1x1x256xf32> to vector<1x16x256xf32>
    %637 = arith.mulf %634, %636 : vector<1x16x256xf32>
    %c0_135 = arith.constant 0 : index
    %c0_136 = arith.constant 0 : index
    %c0_137 = arith.constant 0 : index
    %638 = vector.load %arg6[%c0_135, %c0_136, %c0_137] : memref<1x16x256xf32, #tpu.memory_space<vmem>>, vector<1x16x256xf32>
    tpu.vector_store %arg6[%c0_135, %c0_136, %c0_137], %637 {strides = array<i32>} : memref<1x16x256xf32, #tpu.memory_space<vmem>>, vector<1x16x256xf32>,
    return
  }
  func.func @transform_0(%arg0: i32) -> (i32, i32, i32) {
    %c0_i32 = arith.constant 0 : i32
    %c0_i32_0 = arith.constant 0 : i32
    %c0_i32_1 = arith.constant 0 : i32
    return %arg0, %c0_i32, %c0_i32_0 : i32, i32, i32
  }
  func.func @transform_1(%arg0: i32) -> (i32, i32) {
    %c0_i32 = arith.constant 0 : i32
    %c0_i32_0 = arith.constant 0 : i32
    %c0_i32_1 = arith.constant 0 : i32
    return %c0_i32, %c0_i32_0 : i32, i32
  }
  func.func @transform_2(%arg0: i32) -> (i32, i32) {
    %c0_i32 = arith.constant 0 : i32
    %c0_i32_0 = arith.constant 0 : i32
    %c0_i32_1 = arith.constant 0 : i32
    return %c0_i32, %c0_i32_0 : i32, i32
  }
  func.func @transform_3(%arg0: i32) -> (i32, i32) {
    %c0_i32 = arith.constant 0 : i32
    %c0_i32_0 = arith.constant 0 : i32
    %c0_i32_1 = arith.constant 0 : i32
    return %c0_i32, %c0_i32_0 : i32, i32
  }
  func.func @transform_4(%arg0: i32) -> i32 {
    %c0_i32 = arith.constant 0 : i32
    %c0_i32_0 = arith.constant 0 : i32
    return %c0_i32 : i32
  }
  func.func @transform_5(%arg0: i32) -> (i32, i32, i32) {
    %c0_i32 = arith.constant 0 : i32
    %c0_i32_0 = arith.constant 0 : i32
    %c0_i32_1 = arith.constant 0 : i32
    return %arg0, %c0_i32, %c0_i32_0 : i32, i32, i32
  }
}

</mosaic_0001>

<bundles_post_ra>
// kernel: tpu_custom_call.1
= control target key start
LH: loop header
LB: loop body
LE: loop exit
PB: predicated region body
PF: predicated region fallthrough
CT: control target
= control target key end

     0   :  { %s5452_s0 = inlined_call_operand.vmem [shape: f32[2,16,256], index: 0, kind: input, shape index: {}]   ;;  %s5453_s1 = inlined_call_operand.vmem [shape: f32[16,128], index: 1, kind: input, shape index: {}]   ;;  %s5454_s2 = inlined_call_operand.vmem [shape: f32[128,16], index: 2, kind: input, shape index: {}]   ;;  %s5455_s3 = inlined_call_operand.vmem [shape: f32[14,256], index: 3, kind: input, shape index: {}]   ;;  %s5456_s4 = inlined_call_operand.vmem [shape: f32[98], index: 4, kind: input, shape index: {}]   ;;  %s5457_s5 = inlined_call_operand.hbm [shape: f32[2,16,256], index: 5, kind: output, shape index: {}]  }
   0x1   :  { %5579 = sst [smem:[#allocation129_spill]] %s5452_s0 }
   0x2   :  { %5580 = sst [smem:[#allocation130_spill]] %s5453_s1 }
   0x3   :  { %5581 = sst [smem:[#allocation131_spill]] %s5454_s2 }
   0x4   :  { %5582 = sst [smem:[#allocation132_spill]] %s5455_s3 }
   0x5   :  { %5583 = sst [smem:[#allocation133_spill]] %s5456_s4 }
   0x6   :  { %5584 = sst [smem:[#allocation134_spill]] %s5457_s5 }
   0x7   :  { %10 = vsyncpa [#allocation4], 0 }
   0x8   :  { %11 = vsyncpa [#allocation3], 0 }
   0x9   :  { %13 = vsyncpa [#allocation3 + $0x1], 0  ;;  %s2551_s18 = smov 0   ;;  %s2553_s19 = smov 0  }
   0xa   :  { %s2555_s20 = smov 0   ;;  %s2557_s21 = smov 0  }
   0xb LB: > { %5585 = sst [smem:[#allocation8_spill]] %s2490_s18  ;;  %s2572_s22 = sadd.s32 4294967295, %s2502_s21   ;;  %s2502_s21 = sphi %s2557_s21, %s6121_s21   ;;  %s2498_s20 = sphi %s2555_s20, %s6124_s20   ;;  %s2494_s19 = sphi %s2553_s19, %s6123_s19   ;;  %s2490_s18 = sphi %s2551_s18, %s6122_s18  }
   0xc   : > { %5586 = sst [smem:[#allocation9_spill]] %s2494_s19  ;;  %s2156_s23 = sadd.s32 4294967294, %s2502_s21  }
   0xd   : > { %5587 = sst [smem:[#allocation10_spill]] %s2498_s20  ;;  %s2576_s24 = sadd.s32 1, %s2502_s21  }
   0xe   : > { %5588 = sst [smem:[#allocation11_spill]] %s2502_s21  ;;  %s136_s25 = sadd.s32 1, %s2498_s20 }
   0xf   : > { %5589 = sst [smem:[#allocation12_spill]] %s2572_s22  ;;  %s133_s26 = ssub.s32 %s2502_s21, %s2576_s24 }
  0x10   : > { %5590 = sst [smem:[#allocation13_spill]] %s2576_s24  ;;  %p146_p0 = scmp.ne.s32.totalorder %s2498_s20, %s2494_s19 }
  0x11   : > { %p134_p1 = scmp.eq.s32.totalorder %s133_s26, 0  ;;  %p147_p2 = scmp.eq.s32.totalorder %s2572_s22, 1 }
  0x12   : > { %p152_p3 = scmp.ne.s32.totalorder %s2494_s19, %s2490_s18  ;;  %p153_p4 = scmp.eq.s32.totalorder %s2156_s23, 1 }
  0x13   : > { %s2587_s27 = scalar_select %p134_p1, %s2498_s20, %s136_s25  }
  0x14   : > { %p2589_p5 = por %p147_p2, %p146_p0  ;;  %p2593_p6 = por %p153_p4, %p152_p3 }
  0x15   : > { %5591 = sst [smem:[#allocation14_spill]] %s2587_s27  ;;  %p2157_p7 = scmp.ge.s32.totalorder %s2502_s21, 1 }
  0x16   : > { %s5592_s28 = scalar_select %p2589_p5, 1, 0 }
  0x17   : > { %s5594_s29 = scalar_select %p2593_p6, 1, 0 }
  0x18   : > { %5593 = sst [smem:[#allocation15_spill]] %s5592_s28  ;;  %p160_p8 = scmp.lt.s32.totalorder %s2502_s21, 3 }
  0x19   : > { %5595 = sst [smem:[#allocation16_spill]] %s5594_s29  ;;  %p2360_p9 = scmp.eq.s32.totalorder %s2572_s22, 0 }
  0x1a   : > { %p2600_p10 = pnand %p2157_p7, %p160_p8  ;;  %s5597_s4 = sld [smem:[#allocation133_spill]] }
  0x1c   : > { %p2352_p11 = pneg %p2600_p10 }
  0x1e   : > { %p2353_p12 = pnand %p2360_p9, %p2352_p11 }
  0x20   : > { %s182_s8 = sshll.u32 %s5597_s4, 4  ;;  %p2425_p0 = pneg %p2353_p12  ;;  %s183_s8 = int_to_ptr.vmem [resolvable:$true] %s182_s8 }
  0x21   : > { %s2423_s9 = scalar_lea.vmem %s183_s8, 16  ;;  %p2431_p3 = scmp.lt.s32.totalorder %s183_s8, %s183_s8 }
  0x22   : > { %p2424_p13 = scmp.ne.s32.totalorder %s183_s8, %s2423_s9  ;;  %p2432_p4 = scmp.lt.s32.totalorder %s2423_s9, %s2423_s9 }
  0x24   : > { %p2426_p1 = pnand %p2425_p0, %p2424_p13  ;;  %p2433_p7 = por %p2432_p4, %p2431_p3 }
  0x26   : > { %p2427_p2 = pneg %p2426_p1 }
  0x28   : > { %p2434_p8 = pnand %p2433_p7, %p2427_p2 }
  0x2a   : > { %2437 = shalt.err (!%p2434_p8)
}
  0x2b   : > { %s2504_s10 = smov [#allocation2]   ;;  %203 = sbr.rel (%p2600_p10) target bundleno = 1375 (0x55f), region = 40 }
  0x2c   : > { %2355 = dma.vmem_to_smem (!%p2353_p12), %s183_s8, 16, %s2504_s10, [#allocation4]  }
  0x30   : > { %2481 = dma.done.wait (%p2360_p9), [#allocation4], 16  }
  0x31   : > { %2483 = vsyncadd (%p2360_p9), [#allocation4], 4294967280 }
  0x32   : > { %209 = sfence }
  0x33   : > { %p232_p11 = scmp.lt.s32.totalorder %s2572_s22, 1  ;;  %s5598_s0 = sld [smem:[#allocation129_spill]]  ;;  %v2505_v8 = vmov 0.0   ;;  %vm2506_vm0 = vmmov 0   ;;  %v257_v25 = vlaneseq  ;;  %vm268_vm1 = vcmask 130112  }
  0x34   : > { %2304 = vmatprep.subr.mxu0 %v2505_v8  ;;  %s5599_s1 = sld [smem:[#allocation130_spill]]  ;;  %2311 = vmatprep.subr.mxu1 %v2505_v8  ;;  %vm283_vm2 = vcmask 1040384   ;;  %vm287_vm3 = vcmask 130048   ;;  %s2507_s26 = smov 48  }
  0x35   : > { %s233_s11 = scalar_select %p232_p11, %s2572_s22, 1  ;;  %2308 = vmatprep.mubr.msk.f32.mxu0 %vm2506_vm0, %v2505_v8  ;;  %2343 = vmatprep.mubr.msk.f32.mxu1 %vm2506_vm0, %v2505_v8  ;;  %v2705_v26 = vand.u32 127, %v257_v25  ;;  %v2708_v28 = vshrl.u32 %v257_v25, 7 }
  0x36   : > { %s5600_s2 = sld [smem:[#allocation131_spill]]  ;;  %s2508_s30 = smov 32  }
  0x37   : > { %s2282_s12 = sshll.u32 %s233_s11, 5  ;;  %v263_v27 = vadd.s32 4294967288, %v2705_v26  ;;  %v261_v32 = vsub.s32 %v2705_v26, %v2708_v28  ;;  %v2721_v56 = vsub.s32 0, %v2708_v28  ;;  %s5493_s6 = smov 16   ;;  %vm538_vm4 = vcmp.lt.s32.totalorder %v2705_v26, 48 }
  0x38   : > { %s2510_s7 = smov 112   ;;  %s2511_s8 = smov 96   ;;  %vm720_vm5 = vcmp.lt.s32.totalorder %v2705_v26, 32  ;;  %vm830_vm6 = vcmp.lt.s32.totalorder %v2705_v26, 16  ;;  %vm1030_vm7 = vcmp.lt.s32.totalorder %v2705_v26, 112  ;;  %vm1140_vm8 = vcmp.lt.s32.totalorder %v2705_v26, 96 }
  0x39   : > { %s236_s15 = scalar_lea.vmem %s5598_s0, %s2282_s12  ;;  %v266_v31 = vsub.s32 %v263_v27, %v2708_v28  ;;  %5601 = vst [vmem:[#allocation17_spill] sm:$0xff] %v2721_v56  ;;  %s2512_s9 = smov 80   ;;  %vm1250_vm9 = vcmp.lt.s32.totalorder %v2705_v26, 80  ;;  %vm559_vm10 = vcmp.lt.s32.totalorder %v2705_v26, 3  ;;  %vm695_vm11 = vcmp.lt.s32.totalorder %v2705_v26, 125 }
  0x3a   : > { %v2622_v0 = vld [vmem:[%s236_s15] sm:$0xff]  ;;  %v2624_v1 = vld [vmem:[%s236_s15 + $0x8] sm:$0xff]  ;;  %v2626_v2 = vld [vmem:[%s236_s15 + $0x10] sm:$0xff]  ;;  %s5498_s10 = smov 3   ;;  %s5496_s11 = smov 2   ;;  %vm585_vm12 = vcmp.lt.s32.totalorder %v2705_v26, 2 }
  0x3b   : > { %v249_v3 = vmax.f32 %v2622_v0, %v2624_v1  ;;  %v241_v4 = vadd.f32 %v2624_v1, %v2622_v0  ;;  %v2632_v5 = vld [vmem:[%s236_s15 + $0x18] sm:$0xff]  ;;  %v286_v9 = vld [vmem:[%s5599_s1 + $0x8] sm:$0xff]  ;;  %v285_v10 = vld [vmem:[%s5599_s1] sm:$0xff]  ;;  %s5494_s12 = smov 1   ;;  %s5500_s13 = smov 127   ;;  %vm611_vm13 = vcmp.lt.s32.totalorder %v2705_v26, 1 }
  0x3c   : > { %v252_v6 = vmax.f32 %v2626_v2, %v2632_v5  ;;  %v244_v7 = vadd.f32 %v2632_v5, %v2626_v2  ;;  %2305 = vmatpush3.msra.mxu0 %v286_v9  ;;  %v377_v11 = vld [vmem:[%s5600_s2 + $0x78] sm:$0xff]  ;;  %v376_v12 = vld [vmem:[%s5600_s2 + $0x70] sm:$0xff]  ;;  %v375_v13 = vld [vmem:[%s5600_s2 + $0x68] sm:$0xff]  ;;  %s5508_s14 = smov 126   ;;  %s5506_s15 = smov 125   ;;  %vm643_vm14 = vcmp.lt.s32.totalorder %v2705_v26, 127 }
  0x3d   : > { %250 = vmax.xlane.f32.xlu1 %v249_v3  ;;  %242 = vadd.xlane.f32.xlu0 %v241_v4  ;;  %v374_v14 = vld [vmem:[%s5600_s2 + $0x60] sm:$0xff]  ;;  %v373_v15 = vld [vmem:[%s5600_s2 + $0x58] sm:$0xff]  ;;  %v372_v16 = vld [vmem:[%s5600_s2 + $0x50] sm:$0xff]  ;;  %s5606_s3 = sld [smem:[#allocation132_spill]]  ;;  %s5661_s20 = smov 3   ;;  %vm669_vm15 = vcmp.lt.s32.totalorder %v2705_v26, 126 }
  0x3e   : > { %2306 = vmatprep.subr.mxu0 %v2505_v8  ;;  %2312 = vmatpush3.msra.mxu1 %v377_v11  ;;  %v371_v17 = vld [vmem:[%s5600_s2 + $0x48] sm:$0xff]  ;;  %v370_v18 = vld [vmem:[%s5600_s2 + $0x40] sm:$0xff]  ;;  %v369_v19 = vld [vmem:[%s5600_s2 + $0x38] sm:$0xff]  ;;  %s3281_s17 = sld [smem:[#allocation2 + $0x18]]  ;;  %s5666_s19 = smov 2  }
  0x3f   : > { %2307 = vmatpush3.msra.mxu0 %v285_v10  ;;  %2313 = vmatprep.subr.mxu1 %v2505_v8  ;;  %v368_v20 = vld [vmem:[%s5600_s2 + $0x30] sm:$0xff]  ;;  %v367_v21 = vld [vmem:[%s5600_s2 + $0x28] sm:$0xff]  ;;  %v366_v22 = vld [vmem:[%s5600_s2 + $0x20] sm:$0xff]  ;;  %s3287_s23 = sld [smem:[#allocation2 + $0x49]] }
  0x40   : > { %2314 = vmatpush3.msra.mxu1 %v376_v12  ;;  %v365_v23 = vld [vmem:[%s5600_s2 + $0x18] sm:$0xff]  ;;  %v364_v24 = vld [vmem:[%s5600_s2 + $0x10] sm:$0xff]  ;;  %v363_v44 = vld [vmem:[%s5600_s2 + $0x8] sm:$0xff]  ;;  %s3289_s25 = sld [smem:[#allocation2 + $0x34]] }
  0x41   : > { %253 = vmax.xlane.f32.xlu1 %v252_v6  ;;  %245 = vadd.xlane.f32.xlu0 %v244_v7  ;;  %v362_v45 = vld [vmem:[%s5600_s2] sm:$0xff]  ;;  %s3313_s16 = sld [smem:[#allocation2 + $0x47]] }
  0x42   : > { %2315 = vmatprep.subr.mxu1 %v2505_v8  ;;  %s3351_s0 = sld [smem:[#allocation2 + $0xa]] }
  0x43   : > { %2316 = vmatpush3.msra.mxu1 %v375_v13  ;;  %s3353_s1 = sld [smem:[#allocation2 + $0x11]] }
  0x44   : > { %2317 = vmatprep.subr.mxu1 %v2505_v8  ;;  %s3355_s2 = sld [smem:[#allocation2 + $0x15]] }
  0x45   : > { %2318 = vmatpush3.msra.mxu1 %v374_v14  ;;  %s3367_s4 = sld [smem:[#allocation2 + $0x16]] }
  0x46   : > { %2319 = vmatprep.subr.mxu1 %v2505_v8  ;;  %s3369_s27 = sld [smem:[#allocation2 + $0x17]] }
  0x47   : > { %2320 = vmatpush3.msra.mxu1 %v373_v15  ;;  %s3375_s24 = sld [smem:[#allocation2 + $0x19]] }
  0x48   : > { %2321 = vmatprep.subr.mxu1 %v2505_v8  ;;  %s3377_s29 = sld [smem:[#allocation2 + $0x1a]] }
  0x49   : > { %2322 = vmatpush3.msra.mxu1 %v372_v16  ;;  %s3386_s5 = sld [smem:[#allocation2 + $0x1b]] }
  0x4a   : > { %2323 = vmatprep.subr.mxu1 %v2505_v8  ;;  %s3402_s18 = sld [smem:[#allocation2 + $0x26]] }
  0x4b   : > { %2324 = vmatpush3.msra.mxu1 %v371_v17  ;;  %s3420_s28 = sld [smem:[#allocation2 + $0x2d]] }
  0x4c   : > { %2325 = vmatprep.subr.mxu1 %v2505_v8  ;;  %s3452_s22 = sld [smem:[#allocation2 + $0x32]] }
  0x4d   : > { %2326 = vmatpush3.msra.mxu1 %v370_v18  ;;  %s3471_s21 = sld [smem:[#allocation2 + $0x33]] }
  0x4e   : > { %2327 = vmatprep.subr.mxu1 %v2505_v8  ;;  %5662 = sst [smem:[#allocation75_spill]] %s3377_s29  ;;  %s5674_s29 = smov 1  }
  0x4f   : > { %2328 = vmatpush3.msra.mxu1 %v369_v19  ;;  %5665 = sst [smem:[#allocation78_spill]] %s3386_s5  ;;  %s5682_s5 = smov 126  }
  0x50   : > { %2329 = vmatprep.subr.mxu1 %v2505_v8 }
  0x51   : > { %2330 = vmatpush3.msra.mxu1 %v368_v20 }
  0x52   : > { %2331 = vmatprep.subr.mxu1 %v2505_v8 }
  0x53   : > { %2332 = vmatpush3.msra.mxu1 %v367_v21 }
  0x54   : > { %2333 = vmatprep.subr.mxu1 %v2505_v8 }
  0x55   : > { %2334 = vmatpush3.msra.mxu1 %v366_v22 }
  0x56   : > { %2335 = vmatprep.subr.mxu1 %v2505_v8 }
  0x57   : > { %2336 = vmatpush3.msra.mxu1 %v365_v23 }
  0x58   : > { %2337 = vmatprep.subr.mxu1 %v2505_v8 }
  0x59   : > { %2338 = vmatpush3.msra.mxu1 %v364_v24 }
  0x5a   : > { %2339 = vmatprep.subr.mxu1 %v2505_v8 }
  0x5b   : > { %2340 = vmatpush3.msra.mxu1 %v363_v44 }
  0x5c   : > { %2341 = vmatprep.subr.mxu1 %v2505_v8 }
  0x5d   : > { %2342 = vmatpush3.msra.mxu1 %v362_v45 }
  0xc6   : > { %v251_v29 = vpop.xlane.xlu1 %250  ;;  %v243_v30 = vpop.xlane.xlu0 %242 }
  0xc7   : > { %v247_v33 = vmul.f32 0.00390625, %v243_v30  ;;  %v276_v38 = vrot.slane %v251_v29, %v261_v32 }
  0xc9   : > { %v262_v39 = vrot.slane %v247_v33, %v261_v32  ;;  %v2849_v33 = vsub.s32 1, %v2708_v28 }
  0xca   : > { %v254_v34 = vpop.xlane.xlu1 %253  ;;  %v246_v35 = vpop.xlane.xlu0 %245 }
  0xcb   : > { %v280_v36 = vrot.slane %v254_v34, %v266_v31  ;;  %v248_v37 = vmul.f32 0.00390625, %v246_v35  ;;  %v511_v34 = vld [vmem:[%s5606_s3] ss:$8 sm:$0x3] }
  0xcc   : > { %v2856_v35 = vrot.slane %v511_v34, %v2721_v56 }
  0xcd   : > { %v267_v40 = vrot.slane %v248_v37, %v266_v31  ;;  %v281_v42 = vsel %vm268_vm1, %v280_v36, %v276_v38  ;;  %v2859_v36 = vrot.slane %v511_v34, %v2849_v33 }
  0xcf   : > { %v269_v41 = vsel %vm268_vm1, %v267_v40, %v262_v39 }
  0xd0   : > { %v284_v43 = vsel %vm283_vm2, %v269_v41, %v281_v42 }
  0xd1   : > { %2309 = vmatmul.mubr.msk.f32.vlgmr.msra.gmra.mxu0 %vm287_vm3, %v284_v43 }
 0x191   : > { %v357_v46 = vpop.f32.mrf.mxu0 }
 0x192   : > { %v361_v47 = vmax.f32 %v357_v46, 0.0 }
 0x193   : > { %v2310_v48 = vpop.f32.mrf.mxu0 }
 0x194   : > { %2344 = vmatmul.mubr.f32.vlgmr.msra.gmra.mxu1 %v361_v47 }
 0x254   : > { %v444_v49 = vpop.f32.mrf.mxu1 }
 0x255   : > { %v449_v50 = vrot.slane %v444_v49, 1 }
 0x256   : > { %v2345_v51 = vpop.f32.mrf.mxu1 }
 0x257   : > { %v451_v52 = vadd.f32 %v449_v50, %v444_v49  ;;  %v2167_v50 = vld [vmem:[%s5606_s3 + $0x1] ss:$8 sm:$0x3] }
 0x259   : > { %v2166_v53 = vmul.f32 -1.442695, %v451_v52 }
 0x25b   : > { %2411 = vpow2.f32 %v2166_v53  ;;  %v727_v53 = vrot.slane %v2167_v50, %v2721_v56 }
 0x268   : > { %v2412_v54 = vpop.eup %2411 }
 0x269   : > { %v455_v55 = vadd.f32 1.0, %v2412_v54  ;;  %v731_v54 = vrot.slane %v2167_v50, %v2849_v33 }
 0x26b   : > { %2413 = vrcp.f32 %v455_v55 }
 0x278   : > { %v2414_v57 = vpop.eup %2413 }
 0x279   : > { %v461_v58 = vrot.slane %v2414_v57, %v2721_v56 }
 0x27b   : > { %467 = vbcast.lane.b32.xlu1 %v461_v58, 264  ;;  %463 = vbcast.lane.b32.xlu0 %v461_v58, 256 }
 0x2ed   : > { %v468_v59 = vpop.permute.xlu1 %467  ;;  %v464_v60 = vpop.permute.xlu0 %463 }
 0x2ee   : > { %v2725_v61 = vmul.f32 %v468_v59, %v2626_v2  ;;  %v2728_v62 = vmul.f32 %v468_v59, %v2632_v5  ;;  %v2731_v63 = vmul.f32 %v464_v60, %v2622_v0  ;;  %v2734_v3 = vmul.f32 %v464_v60, %v2624_v1 }
 0x2f0   : > { %5602 = vst [vmem:[#allocation18_spill] sm:$0xff] %v2725_v61  ;;  %5603 = vst [vmem:[#allocation19_spill] sm:$0xff] %v2728_v62  ;;  %v497_v4 = vmax.f32 %v2731_v63, %v2725_v61  ;;  %v504_v6 = vmax.f32 %v2734_v3, %v2728_v62  ;;  %v481_v15 = vadd.f32 %v2725_v61, %v2731_v63 }
 0x2f1   : > { %5604 = vst [vmem:[#allocation20_spill] sm:$0xff] %v2731_v63  ;;  %5605 = vst [vmem:[#allocation21_spill] sm:$0xff] %v2734_v3  ;;  %v488_v17 = vadd.f32 %v2728_v62, %v2734_v3 }
 0x2f2   : > { %v498_v7 = vrot.slane %v497_v4, 4  ;;  %v505_v8 = vrot.slane %v504_v6, 4  ;;  %v482_v16 = vrot.slane %v481_v15, 4 }
 0x2f3   : > { %v489_v19 = vrot.slane %v488_v17, 4 }
 0x2f4   : > { %v499_v9 = vmax.f32 %v497_v4, %v498_v7  ;;  %v506_v2 = vmax.f32 %v504_v6, %v505_v8  ;;  %v483_v18 = vadd.f32 %v482_v16, %v481_v15 }
 0x2f5   : > { %v490_v21 = vadd.f32 %v489_v19, %v488_v17 }
 0x2f6   : > { %v500_v10 = vrot.slane %v499_v9, 2  ;;  %v507_v11 = vrot.slane %v506_v2, 2  ;;  %v484_v20 = vrot.slane %v483_v18, 2 }
 0x2f7   : > { %v491_v23 = vrot.slane %v490_v21, 2 }
 0x2f8   : > { %v501_v5 = vmax.f32 %v499_v9, %v500_v10  ;;  %v508_v12 = vmax.f32 %v506_v2, %v507_v11  ;;  %v485_v22 = vadd.f32 %v484_v20, %v483_v18 }
 0x2f9   : > { %v492_v25 = vadd.f32 %v491_v23, %v490_v21 }
 0x2fa   : > { %v502_v13 = vrot.slane %v501_v5, 1  ;;  %v509_v0 = vrot.slane %v508_v12, 1  ;;  %v486_v24 = vrot.slane %v485_v22, 1 }
 0x2fb   : > { %v493_v29 = vrot.slane %v492_v25, 1 }
 0x2fc   : > { %v2740_v14 = vmax.f32 %v501_v5, %v502_v13  ;;  %v2742_v1 = vmax.f32 %v508_v12, %v509_v0  ;;  %v487_v27 = vadd.f32 %v486_v24, %v485_v22  ;;  %v2168_v12 = vld [vmem:[%s5606_s3 + $0x2] ss:$8 sm:$0x3] }
 0x2fd   : > { %v494_v30 = vadd.f32 %v493_v29, %v492_v25  ;;  %v837_v0 = vrot.slane %v2168_v12, %v2721_v56  ;;  %v841_v15 = vrot.slane %v2168_v12, %v2849_v33 }
 0x2fe   : > { %1358 = vrot.lane.b32.xlu1 %v2742_v1, %s2507_s26  ;;  %1356 = vrot.lane.b32.xlu0 %v2740_v14, %s2507_s26  ;;  %v2796_v31 = vmul.f32 0.0625, %v487_v27 }
 0x2ff   : > { %v2802_v32 = vmul.f32 0.0625, %v494_v30 }
 0x302   : > { %1454 = vrot.lane.b32.xlu1 %v2740_v14, %s2508_s30  ;;  %1456 = vrot.lane.b32.xlu0 %v2742_v1, %s2508_s30 }
 0x306   : > { %1552 = vrot.lane.b32.xlu1 %v2740_v14, %s5493_s6  ;;  %1554 = vrot.lane.b32.xlu0 %v2742_v1, %s5493_s6 }
 0x30a   : > { %1742 = vrot.lane.b32.xlu1 %v2742_v1, %s2510_s7  ;;  %1740 = vrot.lane.b32.xlu0 %v2740_v14, %s2510_s7 }
 0x30e   : > { %1840 = vrot.lane.b32.xlu1 %v2742_v1, %s2511_s8  ;;  %1838 = vrot.lane.b32.xlu0 %v2740_v14, %s2511_s8 }
 0x312   : > { %1938 = vrot.lane.b32.xlu1 %v2742_v1, %s2512_s9  ;;  %1936 = vrot.lane.b32.xlu0 %v2740_v14, %s2512_s9 }
 0x316   : > { %1653 = vrot.lane.b32.xlu1 %v2742_v1, %s5498_s10  ;;  %1651 = vrot.lane.b32.xlu0 %v2740_v14, %s5498_s10 }
 0x31a   : > { %1667 = vrot.lane.b32.xlu1 %v2742_v1, %s5496_s11  ;;  %1665 = vrot.lane.b32.xlu0 %v2740_v14, %s5496_s11 }
 0x31e   : > { %1681 = vrot.lane.b32.xlu1 %v2742_v1, %s5494_s12  ;;  %1679 = vrot.lane.b32.xlu0 %v2740_v14, %s5494_s12 }
 0x322   : > { %1701 = vrot.lane.b32.xlu1 %v2742_v1, %s5500_s13  ;;  %1699 = vrot.lane.b32.xlu0 %v2740_v14, %s5500_s13 }
 0x326   : > { %1715 = vrot.lane.b32.xlu1 %v2742_v1, %s5508_s14  ;;  %1713 = vrot.lane.b32.xlu0 %v2740_v14, %s5508_s14 }
 0x32a   : > { %1729 = vrot.lane.b32.xlu1 %v2742_v1, %s5506_s15  ;;  %1727 = vrot.lane.b32.xlu0 %v2740_v14, %s5506_s15 }
 0x32e   : > { %716 = vrot.lane.b32.xlu0 %v2796_v31, %s2508_s30  ;;  %534 = vrot.lane.b32.xlu1 %v2796_v31, %s2507_s26 }
 0x332   : > { %826 = vrot.lane.b32.xlu0 %v2796_v31, %s5493_s6  ;;  %536 = vrot.lane.b32.xlu1 %v2802_v32, %s2507_s26  ;;  %s3295_s26 = sld [smem:[#allocation2 + $0x3b]] }
 0x336   : > { %937 = vrot.lane.b32.xlu0 %v2796_v31, %s5498_s10  ;;  %718 = vrot.lane.b32.xlu1 %v2802_v32, %s2508_s30  ;;  %s3297_s30 = sld [smem:[#allocation2 + $0x42]] }
 0x33a   : > { %951 = vrot.lane.b32.xlu0 %v2796_v31, %s5496_s11  ;;  %828 = vrot.lane.b32.xlu1 %v2802_v32, %s5493_s6  ;;  %s3319_s6 = sld [smem:[#allocation2 + $0x5e]] }
 0x33e   : > { %965 = vrot.lane.b32.xlu0 %v2796_v31, %s5494_s12  ;;  %939 = vrot.lane.b32.xlu1 %v2802_v32, %s5498_s10 }
 0x342   : > { %985 = vrot.lane.b32.xlu0 %v2796_v31, %s5500_s13  ;;  %953 = vrot.lane.b32.xlu1 %v2802_v32, %s5496_s11 }
 0x346   : > { %999 = vrot.lane.b32.xlu0 %v2796_v31, %s5508_s14  ;;  %967 = vrot.lane.b32.xlu1 %v2802_v32, %s5494_s12 }
 0x34a   : > { %1013 = vrot.lane.b32.xlu0 %v2796_v31, %s5506_s15  ;;  %987 = vrot.lane.b32.xlu1 %v2802_v32, %s5500_s13 }
 0x34e   : > { %1026 = vrot.lane.b32.xlu0 %v2796_v31, %s2510_s7  ;;  %1001 = vrot.lane.b32.xlu1 %v2802_v32, %s5508_s14 }
 0x352   : > { %1136 = vrot.lane.b32.xlu0 %v2796_v31, %s2511_s8  ;;  %1015 = vrot.lane.b32.xlu1 %v2802_v32, %s5506_s15 }
 0x356   : > { %1246 = vrot.lane.b32.xlu0 %v2796_v31, %s2512_s9  ;;  %1028 = vrot.lane.b32.xlu1 %v2802_v32, %s2510_s7  ;;  %s3303_s7 = sld [smem:[#allocation2 + $0x50]] }
 0x35a   : > { %1138 = vrot.lane.b32.xlu1 %v2802_v32, %s2511_s8  ;;  %s3305_s8 = sld [smem:[#allocation2 + $0x57]] }
 0x35e   : > { %1248 = vrot.lane.b32.xlu1 %v2802_v32, %s2512_s9  ;;  %s3307_s9 = sld [smem:[#allocation2 + $0x46]] }
 0x370   : > { %v1359_v37 = vpop.permute.xlu1 %1358  ;;  %v1357_v38 = vpop.permute.xlu0 %1356 }
 0x371   : > { %v1360_v39 = vsel %vm538_vm4, %v1357_v38, %v1359_v37  ;;  %v1361_v28 = vsel %vm538_vm4, %v1359_v37, %v1357_v38 }
 0x372   : > { %v2866_v40 = vmul.f32 %v1361_v28, %v2856_v35  ;;  %v2869_v41 = vmul.f32 %v1360_v39, %v2859_v36 }
 0x374   : > { %v1455_v42 = vpop.permute.xlu1 %1454  ;;  %v1457_v43 = vpop.permute.xlu0 %1456  ;;  %1365 = vrot.lane.b32.xlu0 %v2866_v40, %s5498_s10  ;;  %1367 = vrot.lane.b32.xlu1 %v2869_v41, %s5498_s10 }
 0x375   : > { %v1458_v55 = vsel %vm720_vm5, %v1455_v42, %v1457_v43  ;;  %v1459_v57 = vsel %vm720_vm5, %v1457_v43, %v1455_v42 }
 0x376   : > { %v2921_v60 = vmul.f32 %v1459_v57, %v727_v53  ;;  %v2923_v4 = vmul.f32 %v1458_v55, %v731_v54 }
 0x378   : > { %v1553_v44 = vpop.permute.xlu1 %1552  ;;  %v1555_v45 = vpop.permute.xlu0 %1554  ;;  %1379 = vrot.lane.b32.xlu0 %v2866_v40, %s5496_s11  ;;  %1381 = vrot.lane.b32.xlu1 %v2869_v41, %s5496_s11 }
 0x379   : > { %v1556_v16 = vsel %vm830_vm6, %v1553_v44, %v1555_v45  ;;  %v1557_v17 = vsel %vm830_vm6, %v1555_v45, %v1553_v44 }
 0x37a   : > { %v2979_v20 = vmul.f32 %v1557_v17, %v837_v0  ;;  %v2981_v21 = vmul.f32 %v1556_v16, %v841_v15 }
 0x37c   : > { %v2879_v46 = vpop.permute.xlu1 %1742  ;;  %v2881_v47 = vpop.permute.xlu0 %1740  ;;  %1393 = vrot.lane.b32.xlu0 %v2866_v40, %s5494_s12  ;;  %1395 = vrot.lane.b32.xlu1 %v2869_v41, %s5494_s12 }
 0x37d   : > { %v1744_v57 = vsel %vm1030_vm7, %v2881_v47, %v2879_v46  ;;  %v1745_v12 = vsel %vm1030_vm7, %v2879_v46, %v2881_v47 }
 0x380   : > { %v2887_v48 = vpop.permute.xlu1 %1840  ;;  %v2889_v49 = vpop.permute.xlu0 %1838  ;;  %1413 = vrot.lane.b32.xlu0 %v2866_v40, %s5500_s13  ;;  %1415 = vrot.lane.b32.xlu1 %v2869_v41, %s5500_s13 }
 0x384   : > { %v2899_v51 = vpop.permute.xlu1 %1938  ;;  %v2901_v52 = vpop.permute.xlu0 %1936  ;;  %1427 = vrot.lane.b32.xlu0 %v2866_v40, %s5508_s14  ;;  %1429 = vrot.lane.b32.xlu1 %v2869_v41, %s5508_s14 }
 0x388   : > { %v2913_v58 = vpop.permute.xlu1 %1653  ;;  %v2915_v59 = vpop.permute.xlu0 %1651  ;;  %1441 = vrot.lane.b32.xlu0 %v2866_v40, %s5506_s15  ;;  %1443 = vrot.lane.b32.xlu1 %v2869_v41, %s5506_s15 }
 0x38c   : > { %v2925_v6 = vpop.permute.xlu1 %1667  ;;  %v2927_v7 = vpop.permute.xlu0 %1665  ;;  %1463 = vrot.lane.b32.xlu0 %v2921_v60, %s5498_s10  ;;  %1465 = vrot.lane.b32.xlu1 %v2923_v4, %s5498_s10 }
 0x390   : > { %v2933_v8 = vpop.permute.xlu1 %1681  ;;  %v2935_v9 = vpop.permute.xlu0 %1679  ;;  %1477 = vrot.lane.b32.xlu0 %v2921_v60, %s5496_s11  ;;  %1479 = vrot.lane.b32.xlu1 %v2923_v4, %s5496_s11 }
 0x394   : > { %v2941_v2 = vpop.permute.xlu1 %1701  ;;  %v2943_v10 = vpop.permute.xlu0 %1699  ;;  %1491 = vrot.lane.b32.xlu0 %v2921_v60, %s5494_s12  ;;  %1493 = vrot.lane.b32.xlu1 %v2923_v4, %s5494_s12 }
 0x398   : > { %v2949_v11 = vpop.permute.xlu1 %1715  ;;  %1511 = vrot.lane.b32.xlu0 %v2921_v60, %s5500_s13  ;;  %1513 = vrot.lane.b32.xlu1 %v2923_v4, %s5500_s13  ;;  %v2955_v5 = vpop.permute.xlu0 %1713 }
 0x39c   : > { %v2961_v13 = vpop.permute.xlu1 %1729  ;;  %1525 = vrot.lane.b32.xlu0 %v2921_v60, %s5508_s14  ;;  %1527 = vrot.lane.b32.xlu1 %v2923_v4, %s5508_s14  ;;  %v2973_v18 = vpop.permute.xlu0 %1727 }
 0x3a0   : > { %1539 = vrot.lane.b32.xlu0 %v2921_v60, %s5506_s15  ;;  %1541 = vrot.lane.b32.xlu1 %v2923_v4, %s5506_s15  ;;  %v535_v19 = vpop.permute.xlu1 %534  ;;  %v717_v25 = vpop.permute.xlu0 %716 }
 0x3a4   : > { %1561 = vrot.lane.b32.xlu0 %v2979_v20, %s5498_s10  ;;  %1563 = vrot.lane.b32.xlu1 %v2981_v21, %s5498_s10  ;;  %v537_v22 = vpop.permute.xlu1 %536  ;;  %v827_v39 = vpop.permute.xlu0 %826 }
 0x3a5   : > { %v539_v23 = vsel %vm538_vm4, %v535_v19, %v537_v22  ;;  %v540_v24 = vsel %vm538_vm4, %v537_v22, %v535_v19 }
 0x3a6   : > { %v2992_v27 = vmul.f32 %v2856_v35, %v540_v24  ;;  %v2995_v29 = vmul.f32 %v2859_v36, %v539_v23 }
 0x3a8   : > { %1575 = vrot.lane.b32.xlu0 %v2979_v20, %s5496_s11  ;;  %1577 = vrot.lane.b32.xlu1 %v2981_v21, %s5496_s11  ;;  %v719_v30 = vpop.permute.xlu1 %718  ;;  %v3025_v45 = vpop.permute.xlu0 %937 }
 0x3a9   : > { %v721_v34 = vsel %vm720_vm5, %v717_v25, %v719_v30  ;;  %v722_v37 = vsel %vm720_vm5, %v719_v30, %v717_v25  ;;  %v2170_v25 = vld [vmem:[%s5606_s3 + $0x5] ss:$8 sm:$0x3] }
 0x3aa   : > { %v3005_v38 = vmul.f32 %v727_v53, %v722_v37  ;;  %v3007_v35 = vmul.f32 %v731_v54, %v721_v34  ;;  %v2169_v53 = vld [vmem:[%s5606_s3 + $0x4] ss:$8 sm:$0x3]  ;;  %v3102_v30 = vrot.slane %v2170_v25, %v2721_v56  ;;  %v3105_v34 = vrot.slane %v2170_v25, %v2849_v33 }
 0x3ab   : > { %v3038_v54 = vrot.slane %v2169_v53, %v2721_v56  ;;  %v3041_v55 = vrot.slane %v2169_v53, %v2849_v33  ;;  %v1842_v37 = vsel %vm1140_vm8, %v2889_v49, %v2887_v48 }
 0x3ac   : > { %5607 = vst [vmem:[#allocation22_spill] sm:$0xff] %v3005_v38  ;;  %5608 = vst [vmem:[#allocation23_spill] sm:$0xff] %v3007_v35  ;;  %1589 = vrot.lane.b32.xlu0 %v2979_v20, %s5494_s12  ;;  %1591 = vrot.lane.b32.xlu1 %v2981_v21, %s5494_s12  ;;  %v829_v36 = vpop.permute.xlu1 %828 }
 0x3ad   : > { %v831_v28 = vsel %vm830_vm6, %v827_v39, %v829_v36  ;;  %v832_v42 = vsel %vm830_vm6, %v829_v36, %v827_v39  ;;  %v3060_v16 = vmul.f32 %v1744_v57, %v3038_v54  ;;  %v3063_v17 = vmul.f32 %v1745_v12, %v3041_v55 }
 0x3ae   : > { %v3017_v43 = vmul.f32 %v837_v0, %v832_v42  ;;  %v3019_v44 = vmul.f32 %v841_v15, %v831_v28  ;;  %v3051_v0 = vpop.permute.xlu0 %951  ;;  %v1843_v39 = vsel %vm1140_vm8, %v2887_v48, %v2889_v49  ;;  %v3124_v42 = vmul.f32 %v1842_v37, %v3102_v30 }
 0x3af   : > { %v3127_v53 = vmul.f32 %v1843_v39, %v3105_v34 }
 0x3b0   : > { %5609 = vst [vmem:[#allocation24_spill] sm:$0xff] %v3019_v44  ;;  %1609 = vrot.lane.b32.xlu0 %v2979_v20, %s5500_s13  ;;  %1611 = vrot.lane.b32.xlu1 %v2981_v21, %s5500_s13  ;;  %v3027_v50 = vpop.permute.xlu1 %939 }
 0x3b2   : > { %v3069_v46 = vpop.permute.xlu0 %965 }
 0x3b3   : > { %5610 = vst [vmem:[#allocation25_spill] sm:$0xff] %v3069_v46 }
 0x3b4   : > { %1623 = vrot.lane.b32.xlu0 %v2979_v20, %s5508_s14  ;;  %1625 = vrot.lane.b32.xlu1 %v2981_v21, %s5508_s14  ;;  %v3053_v15 = vpop.permute.xlu1 %953 }
 0x3b6   : > { %v3077_v19 = vpop.permute.xlu0 %985 }
 0x3b7   : > { %5612 = vst [vmem:[#allocation27_spill] sm:$0xff] %v3077_v19 }
 0x3b8   : > { %1637 = vrot.lane.b32.xlu0 %v2979_v20, %s5506_s15  ;;  %1639 = vrot.lane.b32.xlu1 %v2981_v21, %s5506_s15  ;;  %v3071_v47 = vpop.permute.xlu1 %967 }
 0x3b9   : > { %5611 = vst [vmem:[#allocation26_spill] sm:$0xff] %v3071_v47 }
 0x3ba   : > { %v3089_v23 = vpop.permute.xlu0 %999 }
 0x3bb   : > { %5614 = vst [vmem:[#allocation29_spill] sm:$0xff] %v3089_v23 }
 0x3bc   : > { %1749 = vrot.lane.b32.xlu0 %v3060_v16, %s5498_s10  ;;  %1751 = vrot.lane.b32.xlu1 %v3063_v17, %s5498_s10  ;;  %v3079_v22 = vpop.permute.xlu1 %987 }
 0x3bd   : > { %5613 = vst [vmem:[#allocation28_spill] sm:$0xff] %v3079_v22 }
 0x3be   : > { %v3115_v36 = vpop.permute.xlu0 %1013 }
 0x3bf   : > { %5616 = vst [vmem:[#allocation31_spill] sm:$0xff] %v3115_v36 }
 0x3c0   : > { %1763 = vrot.lane.b32.xlu0 %v3060_v16, %s5496_s11  ;;  %1765 = vrot.lane.b32.xlu1 %v3063_v17, %s5496_s11  ;;  %v3091_v24 = vpop.permute.xlu1 %1001 }
 0x3c1   : > { %5615 = vst [vmem:[#allocation30_spill] sm:$0xff] %v3091_v24 }
 0x3c2   : > { %v3133_v48 = vpop.permute.xlu0 %1026 }
 0x3c4   : > { %1777 = vrot.lane.b32.xlu0 %v3060_v16, %s5494_s12  ;;  %1779 = vrot.lane.b32.xlu1 %v3063_v17, %s5494_s12  ;;  %v3117_v28 = vpop.permute.xlu1 %1015 }
 0x3c5   : > { %5617 = vst [vmem:[#allocation32_spill] sm:$0xff] %v3117_v28  ;;  %v2174_v28 = vld [vmem:[%s5606_s3 + $0x11] ss:$8 sm:$0x3] }
 0x3c6   : > { %v3141_v57 = vpop.permute.xlu0 %1136 }
 0x3c8   : > { %1797 = vrot.lane.b32.xlu0 %v3060_v16, %s5500_s13  ;;  %1799 = vrot.lane.b32.xlu1 %v3063_v17, %s5500_s13  ;;  %v3135_v49 = vpop.permute.xlu1 %1028 }
 0x3ca   : > { %v3153_v25 = vpop.permute.xlu0 %1246 }
 0x3cb   : > { %5618 = vst [vmem:[#allocation33_spill] sm:$0xff] %v3153_v25 }
 0x3cc   : > { %1811 = vrot.lane.b32.xlu0 %v3060_v16, %s5508_s14  ;;  %1813 = vrot.lane.b32.xlu1 %v3063_v17, %s5508_s14  ;;  %v3143_v12 = vpop.permute.xlu1 %1138 }
 0x3d0   : > { %1825 = vrot.lane.b32.xlu0 %v3060_v16, %s5506_s15  ;;  %1827 = vrot.lane.b32.xlu1 %v3063_v17, %s5506_s15  ;;  %v3155_v37 = vpop.permute.xlu1 %1248 }
 0x3d1   : > { %5619 = vst [vmem:[#allocation34_spill] sm:$0xff] %v3155_v37 }
 0x3d4   : > { %1847 = vrot.lane.b32.xlu0 %v3124_v42, %s5498_s10  ;;  %1849 = vrot.lane.b32.xlu1 %v3127_v53, %s5498_s10 }
 0x3d8   : > { %1861 = vrot.lane.b32.xlu0 %v3124_v42, %s5496_s11  ;;  %1863 = vrot.lane.b32.xlu1 %v3127_v53, %s5496_s11 }
 0x3dc   : > { %1875 = vrot.lane.b32.xlu0 %v3124_v42, %s5494_s12  ;;  %1877 = vrot.lane.b32.xlu1 %v3127_v53, %s5494_s12 }
 0x3e0   : > { %1895 = vrot.lane.b32.xlu0 %v3124_v42, %s5500_s13  ;;  %1897 = vrot.lane.b32.xlu1 %v3127_v53, %s5500_s13 }
 0x3e4   : > { %1909 = vrot.lane.b32.xlu0 %v3124_v42, %s5508_s14  ;;  %1911 = vrot.lane.b32.xlu1 %v3127_v53, %s5508_s14 }
 0x3e6   : > { %v3161_v39 = vpop.permute.xlu0 %1365  ;;  %v3163_v62 = vpop.permute.xlu1 %1367 }
 0x3e7   : > { %5620 = vst [vmem:[#allocation35_spill] sm:$0xff] %v3161_v39  ;;  %5621 = vst [vmem:[#allocation36_spill] sm:$0xff] %v3163_v62 }
 0x3e8   : > { %1923 = vrot.lane.b32.xlu0 %v3124_v42, %s5506_s15  ;;  %1925 = vrot.lane.b32.xlu1 %v3127_v53, %s5506_s15 }
 0x3ea   : > { %v3169_v3 = vpop.permute.xlu0 %1379  ;;  %v3171_v61 = vpop.permute.xlu1 %1381 }
 0x3eb   : > { %5622 = vst [vmem:[#allocation37_spill] sm:$0xff] %v3169_v3  ;;  %5623 = vst [vmem:[#allocation38_spill] sm:$0xff] %v3171_v61 }
 0x3ec   : > { %555 = vrot.lane.b32.xlu0 %v2992_v27, %s5498_s10  ;;  %557 = vrot.lane.b32.xlu1 %v2995_v29, %s5498_s10 }
 0x3ee   : > { %v3177_v63 = vpop.permute.xlu0 %1393  ;;  %v3179_v39 = vpop.permute.xlu1 %1395 }
 0x3ef   : > { %5624 = vst [vmem:[#allocation39_spill] sm:$0xff] %v3177_v63  ;;  %5625 = vst [vmem:[#allocation40_spill] sm:$0xff] %v3179_v39 }
 0x3f0   : > { %581 = vrot.lane.b32.xlu0 %v2992_v27, %s5496_s11  ;;  %583 = vrot.lane.b32.xlu1 %v2995_v29, %s5496_s11 }
 0x3f2   : > { %v3185_v62 = vpop.permute.xlu0 %1413  ;;  %v3187_v3 = vpop.permute.xlu1 %1415 }
 0x3f3   : > { %5626 = vst [vmem:[#allocation41_spill] sm:$0xff] %v3185_v62  ;;  %5627 = vst [vmem:[#allocation42_spill] sm:$0xff] %v3187_v3 }
 0x3f4   : > { %607 = vrot.lane.b32.xlu0 %v2992_v27, %s5494_s12  ;;  %609 = vrot.lane.b32.xlu1 %v2995_v29, %s5494_s12 }
 0x3f6   : > { %v3193_v61 = vpop.permute.xlu0 %1427  ;;  %v3195_v63 = vpop.permute.xlu1 %1429 }
 0x3f7   : > { %5628 = vst [vmem:[#allocation43_spill] sm:$0xff] %v3193_v61  ;;  %5629 = vst [vmem:[#allocation44_spill] sm:$0xff] %v3195_v63 }
 0x3f8   : > { %639 = vrot.lane.b32.xlu0 %v2992_v27, %s5500_s13  ;;  %641 = vrot.lane.b32.xlu1 %v2995_v29, %s5500_s13 }
 0x3fa   : > { %v3201_v39 = vpop.permute.xlu0 %1441  ;;  %v3203_v62 = vpop.permute.xlu1 %1443 }
 0x3fb   : > { %5630 = vst [vmem:[#allocation45_spill] sm:$0xff] %v3201_v39  ;;  %5631 = vst [vmem:[#allocation46_spill] sm:$0xff] %v3203_v62 }
 0x3fc   : > { %665 = vrot.lane.b32.xlu0 %v2992_v27, %s5508_s14  ;;  %667 = vrot.lane.b32.xlu1 %v2995_v29, %s5508_s14 }
 0x3fe   : > { %v3209_v3 = vpop.permute.xlu0 %1463  ;;  %v3211_v61 = vpop.permute.xlu1 %1465 }
 0x3ff   : > { %5632 = vst [vmem:[#allocation47_spill] sm:$0xff] %v3209_v3  ;;  %5633 = vst [vmem:[#allocation48_spill] sm:$0xff] %v3211_v61 }
 0x400   : > { %691 = vrot.lane.b32.xlu0 %v2992_v27, %s5506_s15  ;;  %693 = vrot.lane.b32.xlu1 %v2995_v29, %s5506_s15 }
 0x402   : > { %v3217_v63 = vpop.permute.xlu0 %1477  ;;  %v3219_v39 = vpop.permute.xlu1 %1479 }
 0x403   : > { %5634 = vst [vmem:[#allocation49_spill] sm:$0xff] %v3217_v63  ;;  %5635 = vst [vmem:[#allocation50_spill] sm:$0xff] %v3219_v39 }
 0x404   : > { %737 = vrot.lane.b32.xlu0 %v3005_v38, %s5498_s10  ;;  %739 = vrot.lane.b32.xlu1 %v3007_v35, %s5498_s10 }
 0x406   : > { %v3225_v62 = vpop.permute.xlu0 %1491  ;;  %v3227_v3 = vpop.permute.xlu1 %1493 }
 0x407   : > { %5636 = vst [vmem:[#allocation51_spill] sm:$0xff] %v3225_v62  ;;  %5637 = vst [vmem:[#allocation52_spill] sm:$0xff] %v3227_v3 }
 0x408   : > { %751 = vrot.lane.b32.xlu0 %v3005_v38, %s5496_s11  ;;  %753 = vrot.lane.b32.xlu1 %v3007_v35, %s5496_s11 }
 0x40a   : > { %v3233_v61 = vpop.permute.xlu0 %1511  ;;  %v3235_v63 = vpop.permute.xlu1 %1513 }
 0x40b   : > { %5638 = vst [vmem:[#allocation53_spill] sm:$0xff] %v3233_v61  ;;  %5639 = vst [vmem:[#allocation54_spill] sm:$0xff] %v3235_v63 }
 0x40c   : > { %765 = vrot.lane.b32.xlu0 %v3005_v38, %s5494_s12  ;;  %767 = vrot.lane.b32.xlu1 %v3007_v35, %s5494_s12 }
 0x40e   : > { %v3241_v39 = vpop.permute.xlu0 %1525  ;;  %v3243_v62 = vpop.permute.xlu1 %1527 }
 0x40f   : > { %5640 = vst [vmem:[#allocation55_spill] sm:$0xff] %v3241_v39  ;;  %5641 = vst [vmem:[#allocation56_spill] sm:$0xff] %v3243_v62 }
 0x410   : > { %785 = vrot.lane.b32.xlu0 %v3005_v38, %s5500_s13  ;;  %787 = vrot.lane.b32.xlu1 %v3007_v35, %s5500_s13 }
 0x412   : > { %v3249_v3 = vpop.permute.xlu0 %1539  ;;  %v3251_v61 = vpop.permute.xlu1 %1541 }
 0x413   : > { %5642 = vst [vmem:[#allocation57_spill] sm:$0xff] %v3249_v3  ;;  %5643 = vst [vmem:[#allocation58_spill] sm:$0xff] %v3251_v61 }
 0x414   : > { %799 = vrot.lane.b32.xlu0 %v3005_v38, %s5508_s14  ;;  %801 = vrot.lane.b32.xlu1 %v3007_v35, %s5508_s14 }
 0x416   : > { %v3257_v63 = vpop.permute.xlu0 %1561  ;;  %v3259_v39 = vpop.permute.xlu1 %1563 }
 0x417   : > { %5644 = vst [vmem:[#allocation59_spill] sm:$0xff] %v3257_v63  ;;  %5645 = vst [vmem:[#allocation60_spill] sm:$0xff] %v3259_v39 }
 0x418   : > { %813 = vrot.lane.b32.xlu0 %v3005_v38, %s5506_s15  ;;  %815 = vrot.lane.b32.xlu1 %v3007_v35, %s5506_s15  ;;  %s3345_s15 = sld [smem:[#allocation2 + $0x3]] }
 0x41a   : > { %v3265_v62 = vpop.permute.xlu0 %1575  ;;  %v3267_v3 = vpop.permute.xlu1 %1577 }
 0x41b   : > { %5646 = vst [vmem:[#allocation61_spill] sm:$0xff] %v3265_v62  ;;  %5647 = vst [vmem:[#allocation62_spill] sm:$0xff] %v3267_v3 }
 0x41c   : > { %847 = vrot.lane.b32.xlu0 %v3017_v43, %s5498_s10  ;;  %849 = vrot.lane.b32.xlu1 %v3019_v44, %s5498_s10  ;;  %s3329_s10 = sld [smem:[#allocation2 + $0x4b]] }
 0x41e   : > { %v3273_v61 = vpop.permute.xlu0 %1589  ;;  %v3275_v63 = vpop.permute.xlu1 %1591 }
 0x41f   : > { %5648 = vst [vmem:[#allocation63_spill] sm:$0xff] %v3273_v61  ;;  %5649 = vst [vmem:[#allocation64_spill] sm:$0xff] %v3275_v63 }
 0x420   : > { %861 = vrot.lane.b32.xlu0 %v3017_v43, %s5496_s11  ;;  %863 = vrot.lane.b32.xlu1 %v3019_v44, %s5496_s11  ;;  %s3323_s11 = sld [smem:[#allocation2 + $0x4a]] }
 0x422   : > { %v3283_v62 = vpop.permute.xlu0 %1609  ;;  %v3285_v3 = vpop.permute.xlu1 %1611 }
 0x423   : > { %5650 = vst [vmem:[#allocation65_spill] sm:$0xff] %v3283_v62  ;;  %5651 = vst [vmem:[#allocation66_spill] sm:$0xff] %v3285_v3 }
 0x424   : > { %875 = vrot.lane.b32.xlu0 %v3017_v43, %s5494_s12  ;;  %877 = vrot.lane.b32.xlu1 %v3019_v44, %s5494_s12  ;;  %s3321_s12 = sld [smem:[#allocation2 + $0x48]] }
 0x426   : > { %v3299_v63 = vpop.permute.xlu0 %1623  ;;  %v3301_v61 = vpop.permute.xlu1 %1625 }
 0x427   : > { %5652 = vst [vmem:[#allocation67_spill] sm:$0xff] %v3299_v63  ;;  %5653 = vst [vmem:[#allocation68_spill] sm:$0xff] %v3301_v61  ;;  %v1032_v61 = vsel %vm1030_vm7, %v3135_v49, %v3133_v48 }
 0x428   : > { %895 = vrot.lane.b32.xlu0 %v3017_v43, %s5500_s13  ;;  %897 = vrot.lane.b32.xlu1 %v3019_v44, %s5500_s13  ;;  %s3331_s13 = sld [smem:[#allocation2 + $0x4c]] }
 0x42a   : > { %v3315_v62 = vpop.permute.xlu0 %1637  ;;  %v3317_v3 = vpop.permute.xlu1 %1639 }
 0x42b   : > { %5654 = vst [vmem:[#allocation69_spill] sm:$0xff] %v3315_v62  ;;  %5655 = vst [vmem:[#allocation70_spill] sm:$0xff] %v3317_v3  ;;  %v1031_v3 = vsel %vm1030_vm7, %v3133_v48, %v3135_v49  ;;  %v3361_v48 = vmul.f32 %v3041_v55, %v1032_v61  ;;  %v979_v55 = vstv %s3281_s17  ;;  %s3435_s17 = sld [smem:[#allocation2 + $0x31]] }
 0x42c   : > { %909 = vrot.lane.b32.xlu0 %v3017_v43, %s5508_s14  ;;  %911 = vrot.lane.b32.xlu1 %v3019_v44, %s5508_s14  ;;  %s5658_s14 = smov 125   ;;  %v3415_v19 = vmul.f32 %v979_v55, %v2802_v32  ;;  %v3418_v22 = vmul.f32 %v979_v55, %v2796_v31  ;;  %v2175_v32 = vld [vmem:[%s5606_s3 + $0x13] ss:$8 sm:$0x3]  ;;  %v3466_v31 = vrot.slane %v2174_v28, %v2721_v56 }
 0x42d   : > { %v2177_v55 = vld [vmem:[%s5606_s3 + $0x15] ss:$8 sm:$0x3]  ;;  %v3489_v25 = vrot.slane %v2175_v32, %v2849_v33 }
 0x42e   : > { %v3333_v63 = vpop.permute.xlu0 %1749  ;;  %v3335_v62 = vpop.permute.xlu1 %1751  ;;  %5670 = vst [vmem:[#allocation82_spill] sm:$0xff] %v3415_v19  ;;  %5671 = vst [vmem:[#allocation83_spill] sm:$0xff] %v3418_v22  ;;  %v3475_v22 = vrot.slane %v2174_v28, %v2849_v33  ;;  %v5694_v28 = vstv %s3297_s30  ;;  %s5702_s30 = smov 3  }
 0x42f   : > { %5656 = vst [vmem:[#allocation71_spill] sm:$0xff] %v3333_v63  ;;  %5657 = vst [vmem:[#allocation72_spill] sm:$0xff] %v3335_v62  ;;  %v3358_v62 = vmul.f32 %v3038_v54, %v1031_v3  ;;  %v2171_v54 = vld [vmem:[%s5606_s3 + $0x6] ss:$8 sm:$0x3] }
 0x430   : > { %923 = vrot.lane.b32.xlu0 %v3017_v43, %s5658_s14  ;;  %925 = vrot.lane.b32.xlu1 %v3019_v44, %s5658_s14  ;;  %v3430_v36 = vrot.slane %v2171_v54, %v2721_v56  ;;  %s3533_s14 = sld [smem:[#allocation2 + $0x38]] }
 0x432   : > { %v3363_v49 = vpop.permute.xlu0 %1763  ;;  %v3365_v63 = vpop.permute.xlu1 %1765 }
 0x433   : > { %5659 = vst [vmem:[#allocation73_spill] sm:$0xff] %v3363_v49  ;;  %5660 = vst [vmem:[#allocation74_spill] sm:$0xff] %v3365_v63  ;;  %v1693_v49 = vstv %s3287_s23  ;;  %v2172_v63 = vld [vmem:[%s5606_s3 + $0x7] ss:$8 sm:$0x3]  ;;  %s3504_s23 = sld [smem:[#allocation2 + $0x36]] }
 0x434   : > { %1047 = vrot.lane.b32.xlu0 %v3358_v62, %s5661_s20  ;;  %1049 = vrot.lane.b32.xlu1 %v3361_v48, %s5661_s20  ;;  %s3397_s20 = sld [smem:[#allocation2 + $0x1f]]  ;;  %v3426_v39 = vmul.f32 %v1693_v49, %v2742_v1  ;;  %v3443_v1 = vrot.slane %v2172_v63, %v2721_v56 }
 0x436   : > { %v3379_v61 = vpop.permute.xlu0 %1777  ;;  %v3381_v3 = vpop.permute.xlu1 %1779  ;;  %5673 = vst [vmem:[#allocation85_spill] sm:$0xff] %v3426_v39  ;;  %5681 = sst [smem:[#allocation90_spill]] %s3533_s14 }
 0x437   : > { %5663 = vst [vmem:[#allocation76_spill] sm:$0xff] %v3379_v61  ;;  %5664 = vst [vmem:[#allocation77_spill] sm:$0xff] %v3381_v3  ;;  %v2173_v3 = vld [vmem:[%s5606_s3 + $0x10] ss:$8 sm:$0x3]  ;;  %v3423_v61 = vmul.f32 %v1693_v49, %v2740_v14  ;;  %v3440_v14 = vrot.slane %v2171_v54, %v2849_v33  ;;  %v3446_v49 = vrot.slane %v2172_v63, %v2849_v33  ;;  %s3771_s14 = sld [smem:[#allocation2 + $0x44]] }
 0x438   : > { %1061 = vrot.lane.b32.xlu0 %v3358_v62, %s5666_s19  ;;  %1063 = vrot.lane.b32.xlu1 %v3361_v48, %s5666_s19  ;;  %v3459_v54 = vrot.slane %v2173_v3, %v2721_v56  ;;  %v3462_v63 = vrot.slane %v2173_v3, %v2849_v33  ;;  %v3479_v3 = vrot.slane %v2175_v32, %v2721_v56 }
 0x439   : > { %5672 = vst [vmem:[#allocation84_spill] sm:$0xff] %v3423_v61  ;;  %v2176_v61 = vld [vmem:[%s5606_s3 + $0x14] ss:$8 sm:$0x3]  ;;  %s5679_s3 = smov 127   ;;  %v3531_v32 = vrot.slane %v2177_v55, %v2721_v56 }
 0x43a   : > { %5667 = sst [smem:[#allocation79_spill]] %s3397_s20  ;;  %v3410_v23 = vpop.permute.xlu0 %1797  ;;  %v3412_v24 = vpop.permute.xlu1 %1799  ;;  %v3496_v37 = vrot.slane %v2176_v61, %v2849_v33 }
 0x43b   : > { %5668 = vst [vmem:[#allocation80_spill] sm:$0xff] %v3410_v23  ;;  %5669 = vst [vmem:[#allocation81_spill] sm:$0xff] %v3412_v24  ;;  %v3493_v23 = vrot.slane %v2176_v61, %v2721_v56  ;;  %s3547_s20 = sld [smem:[#allocation2 + $0x39]]  ;;  %v3615_v56 = vmul.f32 %v5694_v28, %v2979_v20 }
 0x43c   : > { %1075 = vrot.lane.b32.xlu0 %v3358_v62, %s5674_s29  ;;  %1077 = vrot.lane.b32.xlu1 %v3361_v48, %s5674_s29  ;;  %s3481_s29 = sld [smem:[#allocation2 + $0x35]] }
 0x43d   : > { %5695 = vst [vmem:[#allocation97_spill] sm:$0xff] %v3615_v56  ;;  %5718 = sst [smem:[#allocation110_spill]] %s3771_s14 }
 0x43e   : > { %v3483_v39 = vpop.permute.xlu0 %1811  ;;  %v3485_v24 = vpop.permute.xlu1 %1813  ;;  %s3986_s14 = sld [smem:[#allocation2 + $0x4]] }
 0x43f   : > { %5676 = vst [vmem:[#allocation87_spill] sm:$0xff] %v3483_v39  ;;  %5677 = vst [vmem:[#allocation88_spill] sm:$0xff] %v3485_v24  ;;  %v3501_v24 = vrot.slane %v2177_v55, %v2849_v33  ;;  %v5684_v55 = vstv %s3289_s25  ;;  %s3585_s25 = sld [smem:[#allocation2 + $0x3a]] }
 0x440   : > { %1095 = vrot.lane.b32.xlu0 %v3358_v62, %s5679_s3  ;;  %1097 = vrot.lane.b32.xlu1 %v3361_v48, %s5679_s3  ;;  %s3520_s3 = sld [smem:[#allocation2 + $0x37]]  ;;  %v3552_v19 = vmul.f32 %v5684_v55, %v2866_v40  ;;  %v5686_v40 = vmov %v5684_v55 }
 0x441   : > { %5683 = sst [smem:[#allocation91_spill]] %s3547_s20  ;;  %v3567_v55 = vmul.f32 %v5686_v40, %v2869_v41  ;;  %v1656_v40 = vsel %vm559_vm10, %v2913_v58, %v2915_v59 }
 0x442   : > { %5675 = sst [smem:[#allocation86_spill]] %s3481_s29  ;;  %v1826_v46 = vpop.permute.xlu0 %1825  ;;  %v1828_v35 = vpop.permute.xlu1 %1827  ;;  %5685 = vst [vmem:[#allocation92_spill] sm:$0xff] %v3552_v19  ;;  %s5689_s29 = smov 125  }
 0x443   : > { %v3524_v61 = vsel %vm695_vm11, %v1826_v46, %v1828_v35  ;;  %v1830_v33 = vsel %vm695_vm11, %v1828_v35, %v1826_v46  ;;  %v1941_v35 = vsel %vm1250_vm9, %v2899_v51, %v2901_v52  ;;  %5687 = vst [vmem:[#allocation93_spill] sm:$0xff] %v3567_v55  ;;  %s3684_s20 = sld [smem:[#allocation2 + $0x3e]] }
 0x444   : > { %v3536_v38 = vmul.f32 %v1830_v33, %v3501_v24  ;;  %1109 = vrot.lane.b32.xlu0 %v3358_v62, %s5682_s5  ;;  %1111 = vrot.lane.b32.xlu1 %v3361_v48, %s5682_s5  ;;  %v1940_v33 = vsel %vm1250_vm9, %v2901_v52, %v2899_v51  ;;  %v1141_v51 = vsel %vm1140_vm8, %v3141_v57, %v3143_v12 }
 0x445   : > { %v1142_v52 = vsel %vm1140_vm8, %v3143_v12, %v3141_v57  ;;  %5688 = sst [smem:[#allocation94_spill]] %s3585_s25  ;;  %v5690_v57 = vstv %s3295_s26  ;;  %v3629_v55 = vmul.f32 %v3102_v30, %v1141_v51 }
 0x446   : > { %5680 = sst [smem:[#allocation89_spill]] %s3520_s3  ;;  %v1848_v47 = vpop.permute.xlu0 %1847  ;;  %v1850_v44 = vpop.permute.xlu1 %1849  ;;  %v3597_v12 = vmul.f32 %v5690_v57, %v2921_v60  ;;  %v5696_v60 = vmov %v5694_v28  ;;  %s5720_s3 = smov 1  }
 0x447   : > { %v1851_v39 = vsel %vm559_vm10, %v1848_v47, %v1850_v44  ;;  %v3582_v41 = vsel %vm559_vm10, %v1850_v44, %v1848_v47  ;;  %v5692_v44 = vmov %v5690_v57  ;;  %v3620_v57 = vmul.f32 %v5696_v60, %v2981_v21  ;;  %s3653_s26 = sld [smem:[#allocation2 + $0x3c]] }
 0x448   : > { %v3588_v46 = vmul.f32 %v1851_v39, %v3446_v49  ;;  %1123 = vrot.lane.b32.xlu0 %v3358_v62, %s5689_s29  ;;  %1125 = vrot.lane.b32.xlu1 %v3361_v48, %s5689_s29  ;;  %5691 = vst [vmem:[#allocation95_spill] sm:$0xff] %v3597_v12  ;;  %v3602_v47 = vmul.f32 %v5692_v44, %v2923_v4  ;;  %s3752_s25 = sld [smem:[#allocation2 + $0x43]] }
 0x449   : > { %v1655_v39 = vsel %vm559_vm10, %v2915_v59, %v2913_v58  ;;  %5697 = vst [vmem:[#allocation98_spill] sm:$0xff] %v3620_v57  ;;  %v3623_v4 = vmul.f32 %v1940_v33, %v3430_v36  ;;  %v3626_v44 = vmul.f32 %v1941_v35, %v3440_v14  ;;  %v3632_v58 = vmul.f32 %v3105_v34, %v1142_v52 }
 0x44a   : > { %5693 = vst [vmem:[#allocation96_spill] sm:$0xff] %v3602_v47  ;;  %v1862_v59 = vpop.permute.xlu0 %1861  ;;  %v1864_v20 = vpop.permute.xlu1 %1863  ;;  %v5698_v35 = vstv %s3303_s7  ;;  %v1657_v34 = vmul.f32 %v1656_v40, %v3443_v1  ;;  %v1658_v52 = vmul.f32 %v1655_v39, %v3446_v49  ;;  %s3664_s7 = sld [smem:[#allocation2 + $0x3d]]  ;;  %v5703_v40 = vstv %s3305_s8  ;;  %v5769_v47 = vld [vmem:[#allocation31_spill] sm:$0xff] }
 0x44b   : > { %v1865_v21 = vsel %vm585_vm12, %v1862_v59, %v1864_v20  ;;  %v3638_v28 = vsel %vm585_vm12, %v1864_v20, %v1862_v59  ;;  %v3643_v33 = vmul.f32 %v5698_v35, %v3060_v16  ;;  %v5700_v30 = vmov %v5698_v35  ;;  %s3704_s8 = sld [smem:[#allocation2 + $0x3f]] }
 0x44c   : > { %v3648_v51 = vmul.f32 %v5700_v30, %v3063_v17  ;;  %v3656_v59 = vmul.f32 %v1865_v21, %v3462_v63  ;;  %1157 = vrot.lane.b32.xlu0 %v3629_v55, %s5702_s30  ;;  %1159 = vrot.lane.b32.xlu1 %v3632_v58, %s5702_s30  ;;  %v3669_v39 = vmul.f32 %v5703_v40, %v3124_v42 }
 0x44d   : > { %5699 = vst [vmem:[#allocation99_spill] sm:$0xff] %v3643_v33  ;;  %v5705_v20 = vmov %v5703_v40  ;;  %v1669_v35 = vsel %vm585_vm12, %v2927_v7, %v2925_v6  ;;  %v1670_v30 = vsel %vm585_vm12, %v2925_v6, %v2927_v7  ;;  %v5707_v40 = vstv %s3319_s6  ;;  %s3721_s6 = sld [smem:[#allocation2 + $0x40]] }
 0x44e   : > { %5701 = vst [vmem:[#allocation100_spill] sm:$0xff] %v3648_v51  ;;  %5704 = vst [vmem:[#allocation101_spill] sm:$0xff] %v3669_v39  ;;  %v3674_v21 = vmul.f32 %v5705_v20, %v3127_v53  ;;  %v1876_v17 = vpop.permute.xlu0 %1875  ;;  %v1878_v42 = vpop.permute.xlu1 %1877  ;;  %v3689_v16 = vmul.f32 %v5707_v40, %v3623_v4  ;;  %v5709_v53 = vmov %v5707_v40  ;;  %v1683_v60 = vsel %vm611_vm13, %v2935_v9, %v2933_v8  ;;  %5717 = sst [smem:[#allocation109_spill]] %s3752_s25 }
 0x44f   : > { %v3694_v20 = vmul.f32 %v5709_v53, %v3626_v44  ;;  %v1684_v6 = vsel %vm611_vm13, %v2933_v8, %v2935_v9  ;;  %v1879_v7 = vsel %vm611_vm13, %v1876_v17, %v1878_v42  ;;  %v3710_v40 = vsel %vm611_vm13, %v1878_v42, %v1876_v17  ;;  %s3994_s25 = sld [smem:[#allocation2 + $0x54]] }
 0x450   : > { %5706 = vst [vmem:[#allocation102_spill] sm:$0xff] %v3674_v21  ;;  %5708 = vst [vmem:[#allocation103_spill] sm:$0xff] %v3689_v16  ;;  %v5711_v53 = vstv %s3307_s9  ;;  %v3724_v8 = vmul.f32 %v1879_v7, %v3475_v22  ;;  %1171 = vrot.lane.b32.xlu0 %v3629_v55, %s5666_s19  ;;  %1173 = vrot.lane.b32.xlu1 %v3632_v58, %s5666_s19  ;;  %v1671_v9 = vmul.f32 %v1670_v30, %v3459_v54  ;;  %s3740_s9 = sld [smem:[#allocation2 + $0x41]] }
 0x451   : > { %5710 = vst [vmem:[#allocation104_spill] sm:$0xff] %v3694_v20  ;;  %v3714_v20 = vmul.f32 %v5711_v53, %v1657_v34  ;;  %v5713_v16 = vmov %v5711_v53  ;;  %v1672_v34 = vmul.f32 %v1669_v35, %v3462_v63  ;;  %v1685_v17 = vmul.f32 %v1684_v6, %v3466_v31 }
 0x452   : > { %v3718_v33 = vmul.f32 %v5713_v16, %v1658_v52  ;;  %5715 = vst [vmem:[#allocation107_spill] sm:$0xff] %v3724_v8  ;;  %v1703_v52 = vsel %vm643_vm14, %v2943_v10, %v2941_v2  ;;  %v1704_v16 = vsel %vm643_vm14, %v2941_v2, %v2943_v10  ;;  %v1686_v42 = vmul.f32 %v1683_v60, %v3475_v22  ;;  %v1896_v2 = vpop.permute.xlu0 %1895  ;;  %v1898_v10 = vpop.permute.xlu1 %1897 }
 0x453   : > { %5712 = vst [vmem:[#allocation105_spill] sm:$0xff] %v3714_v20  ;;  %v1717_v35 = vsel %vm669_vm15, %v2955_v5, %v2949_v11  ;;  %v1718_v30 = vsel %vm669_vm15, %v2949_v11, %v2955_v5  ;;  %v1731_v60 = vsel %vm695_vm11, %v2973_v18, %v2961_v13  ;;  %v1732_v6 = vsel %vm695_vm11, %v2961_v13, %v2973_v18 }
 0x454   : > { %5714 = vst [vmem:[#allocation106_spill] sm:$0xff] %v3718_v33  ;;  %v3764_v7 = vsel %vm643_vm14, %v1896_v2, %v1898_v10  ;;  %v1900_v11 = vsel %vm643_vm14, %v1898_v10, %v1896_v2  ;;  %v1705_v5 = vmul.f32 %v1703_v52, %v3479_v3  ;;  %v1706_v53 = vmul.f32 %v1704_v16, %v3489_v25 }
 0x455   : > { %v3774_v21 = vmul.f32 %v1900_v11, %v3489_v25  ;;  %1185 = vrot.lane.b32.xlu0 %v3629_v55, %s5720_s3  ;;  %1187 = vrot.lane.b32.xlu1 %v3632_v58, %s5720_s3  ;;  %v5721_v13 = vstv %s3313_s16  ;;  %v1719_v2 = vmul.f32 %v1717_v35, %v3493_v23  ;;  %v1720_v10 = vmul.f32 %v1718_v30, %v3496_v37  ;;  %s5735_s16 = smov 127  }
 0x456   : > { %5716 = sst [smem:[#allocation108_spill]] %s3740_s9  ;;  %v3782_v18 = vmul.f32 %v5721_v13, %v1671_v9  ;;  %v5723_v52 = vmov %v5721_v13  ;;  %v5725_v11 = vstv %s3321_s12  ;;  %v1733_v39 = vmul.f32 %v1731_v60, %v3531_v32  ;;  %v1910_v9 = vpop.permute.xlu0 %1909  ;;  %v1912_v13 = vpop.permute.xlu1 %1911 }
 0x457   : > { %5719 = vst [vmem:[#allocation111_spill] sm:$0xff] %v3774_v21  ;;  %v3786_v16 = vmul.f32 %v5723_v52, %v1672_v34  ;;  %v3792_v51 = vmul.f32 %v5725_v11, %v1685_v17  ;;  %v1734_v20 = vmul.f32 %v1732_v6, %v3501_v24  ;;  %v3804_v17 = vsel %vm669_vm15, %v1910_v9, %v1912_v13  ;;  %s3817_s12 = sld [smem:[#allocation2 + $0x45]] }
 0x458   : > { %5722 = vst [vmem:[#allocation112_spill] sm:$0xff] %v3782_v18  ;;  %v5727_v18 = vmov %v5725_v11  ;;  %v1914_v30 = vsel %vm669_vm15, %v1912_v13, %v1910_v9  ;;  %v5729_v60 = vstv %s3323_s11  ;;  %v942_v13 = vsel %vm559_vm10, %v3027_v50, %v3025_v45  ;;  %s3884_s11 = sld [smem:[#allocation2 + $0x4e]] }
 0x459   : > { %5724 = vst [vmem:[#allocation113_spill] sm:$0xff] %v3786_v16  ;;  %5726 = vst [vmem:[#allocation114_spill] sm:$0xff] %v3792_v51  ;;  %v3799_v34 = vmul.f32 %v5727_v18, %v1686_v42  ;;  %v3810_v6 = vmul.f32 %v5729_v60, %v1705_v5  ;;  %v5731_v52 = vmov %v5729_v60  ;;  %v3820_v42 = vmul.f32 %v1914_v30, %v3496_v37  ;;  %s4031_s9 = sld [smem:[#allocation2 + $0x5]] }
 0x45a   : > { %v3814_v11 = vmul.f32 %v5731_v52, %v1706_v53  ;;  %1205 = vrot.lane.b32.xlu0 %v3629_v55, %s5735_s16  ;;  %1207 = vrot.lane.b32.xlu1 %v3632_v58, %s5735_s16  ;;  %v5736_v18 = vstv %s3329_s10  ;;  %v5740_v60 = vstv %s3331_s13  ;;  %s3866_s10 = sld [smem:[#allocation2 + $0x4d]] }
 0x45b   : > { %5728 = vst [vmem:[#allocation115_spill] sm:$0xff] %v3799_v34  ;;  %5730 = vst [vmem:[#allocation116_spill] sm:$0xff] %v3810_v6  ;;  %v3828_v5 = vmul.f32 %v5736_v18, %v1719_v2  ;;  %v5738_v9 = vmov %v5736_v18  ;;  %v3841_v52 = vmul.f32 %v5740_v60, %v1733_v39  ;;  %v5742_v33 = vmov %v5740_v60  ;;  %v1924_v2 = vpop.permute.xlu0 %1923  ;;  %v5754_v34 = vld [vmem:[#allocation23_spill] sm:$0xff]  ;;  %s3910_s13 = sld [smem:[#allocation2 + $0x4f]] }
 0x45c   : > { %5732 = vst [vmem:[#allocation117_spill] sm:$0xff] %v3814_v11  ;;  %5734 = vst [vmem:[#allocation119_spill] sm:$0xff] %v3820_v42  ;;  %v3832_v53 = vmul.f32 %v5738_v9, %v1720_v10  ;;  %v3845_v35 = vmul.f32 %v5742_v33, %v1734_v20  ;;  %v1926_v10 = vpop.permute.xlu1 %1925  ;;  %v941_v18 = vsel %vm559_vm10, %v3025_v45, %v3027_v50  ;;  %v5745_v20 = vstv %s3345_s15  ;;  %v5757_v11 = vld [vmem:[#allocation26_spill] sm:$0xff]  ;;  %s3956_s15 = sld [smem:[#allocation2 + $0x53]] }
 0x45d   : > { %5733 = sst [smem:[#allocation118_spill]] %s3817_s12  ;;  %5737 = vst [vmem:[#allocation120_spill] sm:$0xff] %v3828_v5  ;;  %5741 = vst [vmem:[#allocation122_spill] sm:$0xff] %v3841_v52  ;;  %v3855_v39 = vsel %vm695_vm11, %v1924_v2, %v1926_v10  ;;  %v1928_v33 = vsel %vm695_vm11, %v1926_v10, %v1924_v2  ;;  %v3862_v9 = vmul.f32 %v5745_v20, %v2992_v27  ;;  %v5748_v45 = vmov %v5745_v20  ;;  %v5752_v10 = vld [vmem:[#allocation22_spill] sm:$0xff] }
 0x45e   : > { %5739 = vst [vmem:[#allocation121_spill] sm:$0xff] %v3832_v53  ;;  %5743 = vst [vmem:[#allocation123_spill] sm:$0xff] %v3845_v35  ;;  %v943_v60 = vmul.f32 %v942_v13, %v3443_v1  ;;  %v3869_v51 = vmul.f32 %v1928_v33, %v3501_v24  ;;  %1219 = vrot.lane.b32.xlu0 %v3629_v55, %s5682_s5  ;;  %1221 = vrot.lane.b32.xlu1 %v3632_v58, %s5682_s5  ;;  %5749 = sst [smem:[#allocation127_spill]] %s3884_s11  ;;  %v5750_v13 = vstv %s3353_s1  ;;  %v5756_v35 = vld [vmem:[#allocation25_spill] sm:$0xff] }
 0x45f   : > { %5744 = vst [vmem:[#allocation124_spill] sm:$0xff] %v3855_v39  ;;  %v3878_v50 = vmul.f32 %v5748_v45, %v2995_v29  ;;  %v956_v27 = vsel %vm585_vm12, %v3053_v15, %v3051_v0  ;;  %v3889_v2 = vmul.f32 %v5750_v13, %v3017_v43  ;;  %v5753_v33 = vstv %s3351_s0  ;;  %v556_v13 = vpop.permute.xlu0 %555  ;;  %s3925_s0 = sld [smem:[#allocation2 + $0x51]] }
 0x460   : > { %5746 = sst [smem:[#allocation125_spill]] %s3866_s10  ;;  %5747 = vst [vmem:[#allocation126_spill] sm:$0xff] %v3869_v51  ;;  %v3894_v20 = vmul.f32 %v5753_v33, %v5752_v10  ;;  %v5755_v30 = vmov %v5753_v33  ;;  %v944_v45 = vmul.f32 %v941_v18, %v3446_v49  ;;  %v955_v52 = vsel %vm585_vm12, %v3051_v0, %v3053_v15  ;;  %v558_v10 = vpop.permute.xlu1 %557  ;;  %v5758_v33 = vld [vmem:[#allocation24_spill] sm:$0xff]  ;;  %v5761_v18 = vld [vmem:[#allocation33_spill] sm:$0xff] }
 0x461   : > { %5751 = vst [vmem:[#allocation128_spill] sm:$0xff] %v3889_v2  ;;  %v3899_v29 = vmul.f32 %v5755_v30, %v5754_v34  ;;  %v970_v43 = vsel %vm611_vm13, %v5757_v11, %v5756_v35  ;;  %v5759_v6 = vstv %s3353_s1  ;;  %v5760_v30 = vld [vmem:[#allocation34_spill] sm:$0xff]  ;;  %v560_v15 = vsel %vm559_vm10, %v556_v13, %v558_v10  ;;  %s3937_s1 = sld [smem:[#allocation2 + $0x52]] }
 0x462   : > { %v3915_v34 = vmul.f32 %v5759_v6, %v5758_v33  ;;  %v1251_v53 = vsel %vm1250_vm9, %v5761_v18, %v5760_v30  ;;  %v1252_v0 = vsel %vm1250_vm9, %v5760_v30, %v5761_v18  ;;  %v561_v5 = vsel %vm559_vm10, %v558_v10, %v556_v13  ;;  %1233 = vrot.lane.b32.xlu0 %v3629_v55, %s5689_s29  ;;  %v5764_v13 = vld [vmem:[#allocation28_spill] sm:$0xff]  ;;  %v5765_v10 = vld [vmem:[#allocation27_spill] sm:$0xff]  ;;  %s3972_s12 = sld [smem:[#allocation2]] }
 0x463   : > { %v5762_v6 = vstv %s3355_s2  ;;  %v957_v16 = vmul.f32 %v956_v27, %v3459_v54  ;;  %v3940_v56 = vmul.f32 %v3446_v49, %v560_v15  ;;  %1235 = vrot.lane.b32.xlu1 %v3632_v58, %s5689_s29  ;;  %v958_v30 = vmul.f32 %v955_v52, %v3462_v63  ;;  %v5766_v15 = vld [vmem:[#allocation30_spill] sm:$0xff]  ;;  %v582_v57 = vpop.permute.xlu0 %581  ;;  %s5775_s11 = sld [smem:[#allocation75_spill]] }
 0x464   : > { %v3933_v33 = vmul.f32 %v5762_v6, %v943_v60  ;;  %v969_v60 = vsel %vm611_vm13, %v5756_v35, %v5757_v11  ;;  %v971_v27 = vmul.f32 %v970_v43, %v3466_v31  ;;  %v989_v18 = vsel %vm643_vm14, %v5765_v10, %v5764_v13  ;;  %v5767_v6 = vld [vmem:[#allocation29_spill] sm:$0xff]  ;;  %v584_v19 = vpop.permute.xlu1 %583  ;;  %s5777_s10 = sld [smem:[#allocation78_spill]] }
 0x465   : > { %v990_v52 = vsel %vm643_vm14, %v5764_v13, %v5765_v10  ;;  %v1003_v35 = vsel %vm669_vm15, %v5767_v6, %v5766_v15  ;;  %v3967_v11 = vmul.f32 %v3430_v36, %v1251_v53  ;;  %v3970_v43 = vmul.f32 %v3440_v14, %v1252_v0  ;;  %v5768_v10 = vld [vmem:[#allocation32_spill] sm:$0xff] }
 0x466   : > { %5763 = vst [vmem:[#allocation22_spill] sm:$0xff] %v3933_v33  ;;  %v1004_v13 = vsel %vm669_vm15, %v5766_v15, %v5767_v6  ;;  %v1017_v12 = vsel %vm695_vm11, %v5769_v47, %v5768_v10  ;;  %v586_v36 = vsel %vm585_vm12, %v582_v57, %v584_v19  ;;  %v587_v14 = vsel %vm585_vm12, %v584_v19, %v582_v57 }
 0x467   : > { %v5770_v53 = vstv %s3355_s2  ;;  %v972_v33 = vmul.f32 %v969_v60, %v3475_v22  ;;  %v3997_v6 = vmul.f32 %v3462_v63, %v586_v36  ;;  %1267 = vrot.lane.b32.xlu0 %v3967_v11, %s5702_s30  ;;  %1269 = vrot.lane.b32.xlu1 %v3970_v43, %s5702_s30  ;;  %v991_v19 = vmul.f32 %v989_v18, %v3479_v3  ;;  %s4010_s2 = sld [smem:[#allocation2 + $0x1]]  ;;  %v608_v51 = vpop.permute.xlu0 %607 }
 0x468   : > { %v3990_v0 = vmul.f32 %v5770_v53, %v944_v45  ;;  %v992_v57 = vmul.f32 %v990_v52, %v3489_v25  ;;  %v1018_v45 = vsel %vm695_vm11, %v5768_v10, %v5769_v47  ;;  %v5771_v36 = vstv %s3367_s4  ;;  %v610_v2 = vpop.permute.xlu1 %609  ;;  %s4056_s4 = sld [smem:[#allocation2 + $0x55]] }
 0x469   : > { %v4014_v53 = vmul.f32 %v5771_v36, %v957_v16  ;;  %v1005_v15 = vmul.f32 %v1003_v35, %v3493_v23  ;;  %v1006_v18 = vmul.f32 %v1004_v13, %v3496_v37  ;;  %v1019_v52 = vmul.f32 %v1017_v12, %v3531_v32 }
 0x46a   : > { %v5773_v47 = vmov %v5771_v36  ;;  %v5774_v60 = vstv %s3369_s27  ;;  %v612_v16 = vsel %vm611_vm13, %v608_v51, %v610_v2  ;;  %v613_v35 = vsel %vm611_vm13, %v610_v2, %v608_v51  ;;  %s5787_s27 = sld [smem:[#allocation79_spill]] }
 0x46b   : > { %5772 = vst [vmem:[#allocation23_spill] sm:$0xff] %v4014_v53  ;;  %v4021_v10 = vmul.f32 %v5773_v47, %v958_v30  ;;  %v4025_v42 = vmul.f32 %v5774_v60, %v971_v27  ;;  %v5778_v12 = vmov %v5774_v60  ;;  %v1020_v30 = vmul.f32 %v1018_v45, %v3501_v24  ;;  %1281 = vrot.lane.b32.xlu0 %v3967_v11, %s5666_s19 }
 0x46c   : > { %v4035_v13 = vmul.f32 %v5778_v12, %v972_v33  ;;  %v4040_v27 = vmul.f32 %v3475_v22, %v612_v16  ;;  %1283 = vrot.lane.b32.xlu1 %v3970_v43, %s5666_s19  ;;  %v5779_v51 = vstv %s3375_s24  ;;  %v5782_v16 = vstv %s5775_s11  ;;  %s4071_s24 = sld [smem:[#allocation2 + $0x2]] }
 0x46d   : > { %5776 = vst [vmem:[#allocation25_spill] sm:$0xff] %v4025_v42  ;;  %v4048_v2 = vmul.f32 %v5779_v51, %v991_v19  ;;  %v5781_v60 = vmov %v5779_v51  ;;  %v4060_v12 = vmul.f32 %v5782_v16, %v1005_v15  ;;  %v5784_v36 = vmov %v5782_v16  ;;  %v642_v51 = vpop.permute.xlu1 %641  ;;  %s4079_s11 = sld [smem:[#allocation2 + $0x6]] }
 0x46e   : > { %v4052_v33 = vmul.f32 %v5781_v60, %v992_v57  ;;  %v4064_v53 = vmul.f32 %v5784_v36, %v1006_v18  ;;  %v5785_v42 = vstv %s5777_s10  ;;  %v573_v19 = vmul.f32 %v3443_v1, %v561_v5  ;;  %v640_v57 = vpop.permute.xlu0 %639  ;;  %s4136_s10 = sld [smem:[#allocation2 + $0x5a]] }
 0x46f   : > { %5780 = vst [vmem:[#allocation26_spill] sm:$0xff] %v4048_v2  ;;  %5783 = vst [vmem:[#allocation24_spill] sm:$0xff] %v4060_v12  ;;  %v4068_v21 = vmul.f32 %v5785_v42, %v1019_v52  ;;  %v575_v60 = vstv %s3972_s12  ;;  %v659_v47 = vstv %s3986_s14  ;;  %v644_v15 = vsel %vm643_vm14, %v640_v57, %v642_v51  ;;  %1295 = vrot.lane.b32.xlu0 %v3967_v11, %s5720_s3  ;;  %s4101_s14 = sld [smem:[#allocation2 + $0x56]] }
 0x470   : > { %v645_v18 = vsel %vm643_vm14, %v642_v51, %v640_v57  ;;  %v4083_v52 = vmul.f32 %v5785_v42, %v1020_v30  ;;  %v657_v36 = vmul.f32 %v3479_v3, %v644_v15  ;;  %1297 = vrot.lane.b32.xlu1 %v3970_v43, %s5720_s3  ;;  %v601_v57 = vstv %s4010_s2  ;;  %s4113_s12 = sld [smem:[#allocation2 + $0x58]] }
 0x471   : > { %5786 = vst [vmem:[#allocation34_spill] sm:$0xff] %v4068_v21  ;;  %v658_v16 = vmul.f32 %v3489_v25, %v645_v18  ;;  %v599_v51 = vmul.f32 %v3459_v54, %v587_v14  ;;  %v5788_v30 = vstv %s5787_s27  ;;  %v576_v5 = vmul.f32 %v575_v60, %v573_v19  ;;  %v668_v2 = vpop.permute.xlu1 %667  ;;  %s4146_s2 = sld [smem:[#allocation2 + $0x8]] }
 0x472   : > { %v4098_v42 = vmul.f32 %v5788_v30, %v3358_v62  ;;  %v577_v15 = vmul.f32 %v575_v60, %v3940_v56  ;;  %v660_v12 = vmul.f32 %v659_v47, %v657_v36  ;;  %v666_v21 = vpop.permute.xlu0 %665  ;;  %v685_v39 = vstv %s4031_s9  ;;  %s4132_s9 = sld [smem:[#allocation2 + $0x59]] }
 0x473   : > { %v661_v18 = vmul.f32 %v659_v47, %v658_v16  ;;  %v670_v45 = vsel %vm669_vm15, %v666_v21, %v668_v2  ;;  %v671_v14 = vsel %vm669_vm15, %v668_v2, %v666_v21  ;;  %v5790_v62 = vmov %v5788_v30  ;;  %1315 = vrot.lane.b32.xlu0 %v3967_v11, %s5735_s16  ;;  %v5792_v21 = vld [vmem:[#allocation36_spill] sm:$0xff]  ;;  %v5793_v2 = vld [vmem:[#allocation35_spill] sm:$0xff]  ;;  %s4472_s27 = sld [smem:[#allocation2 + $0x13]] }
 0x474   : > { %5789 = vst [vmem:[#allocation33_spill] sm:$0xff] %v4098_v42  ;;  %v4111_v30 = vmul.f32 %v5790_v62, %v3361_v48  ;;  %v4115_v56 = vadd.f32 %v660_v12, %v576_v5  ;;  %v683_v19 = vmul.f32 %v3493_v23, %v670_v45  ;;  %v684_v60 = vmul.f32 %v3496_v37, %v671_v14 }
 0x475   : > { %v4117_v47 = vadd.f32 %v661_v18, %v577_v15  ;;  %v1369_v48 = vsel %vm559_vm10, %v5793_v2, %v5792_v21  ;;  %v1370_v12 = vsel %vm559_vm10, %v5792_v21, %v5793_v2  ;;  %v602_v45 = vmul.f32 %v601_v57, %v599_v51  ;;  %1317 = vrot.lane.b32.xlu1 %v3970_v43, %s5735_s16  ;;  %v694_v62 = vpop.permute.xlu1 %693 }
 0x476   : > { %5791 = vst [vmem:[#allocation28_spill] sm:$0xff] %v4111_v30  ;;  %v603_v36 = vmul.f32 %v601_v57, %v3997_v6  ;;  %v625_v16 = vmul.f32 %v3466_v31, %v613_v35  ;;  %v686_v15 = vmul.f32 %v685_v39, %v683_v19  ;;  %v687_v18 = vmul.f32 %v685_v39, %v684_v60  ;;  %v692_v14 = vpop.permute.xlu0 %691  ;;  %v5794_v57 = vld [vmem:[#allocation38_spill] sm:$0xff]  ;;  %v5795_v19 = vld [vmem:[#allocation37_spill] sm:$0xff] }
 0x477   : > { %v627_v21 = vstv %s4071_s24  ;;  %v711_v2 = vstv %s4079_s11  ;;  %v696_v51 = vsel %vm695_vm11, %v692_v14, %v694_v62  ;;  %v697_v5 = vsel %vm695_vm11, %v694_v62, %v692_v14  ;;  %1329 = vrot.lane.b32.xlu0 %v3967_v11, %s5682_s5  ;;  %s4177_s24 = sld [smem:[#allocation2 + $0x7]] }
 0x478   : > { %v4148_v42 = vadd.f32 %v686_v15, %v602_v45  ;;  %v4150_v6 = vadd.f32 %v687_v18, %v603_v36  ;;  %v709_v39 = vmul.f32 %v3531_v32, %v696_v51  ;;  %v710_v35 = vmul.f32 %v3501_v24, %v697_v5  ;;  %s5858_s11 = sld [smem:[#allocation94_spill]] }
 0x479   : > { %v1383_v60 = vsel %vm585_vm12, %v5795_v19, %v5794_v57  ;;  %v1384_v45 = vsel %vm585_vm12, %v5794_v57, %v5795_v19  ;;  %1331 = vrot.lane.b32.xlu1 %v3970_v43, %s5682_s5  ;;  %v5796_v36 = vstv %s3402_s18  ;;  %v628_v14 = vmul.f32 %v627_v21, %v625_v16  ;;  %v740_v57 = vpop.permute.xlu1 %739  ;;  %s4185_s18 = sld [smem:[#allocation2 + $0x9]] }
 0x47a   : > { %v4169_v15 = vmul.f32 %v5796_v36, %v3629_v55  ;;  %v5798_v5 = vmov %v5796_v36  ;;  %v629_v62 = vmul.f32 %v627_v21, %v4040_v27  ;;  %v712_v51 = vmul.f32 %v711_v2, %v709_v39  ;;  %v738_v30 = vpop.permute.xlu0 %737  ;;  %v5804_v36 = vld [vmem:[#allocation39_spill] sm:$0xff] }
 0x47b   : > { %v4174_v18 = vmul.f32 %v5798_v5, %v3632_v58  ;;  %v713_v8 = vmul.f32 %v711_v2, %v710_v35  ;;  %v1371_v19 = vmul.f32 %v1370_v12, %v3443_v1  ;;  %v1372_v55 = vmul.f32 %v1369_v48, %v3446_v49  ;;  %1343 = vrot.lane.b32.xlu0 %v3967_v11, %s5689_s29  ;;  %v5805_v5 = vld [vmem:[#allocation40_spill] sm:$0xff] }
 0x47c   : > { %5797 = vst [vmem:[#allocation27_spill] sm:$0xff] %v4169_v15  ;;  %v741_v58 = vsel %vm559_vm10, %v738_v30, %v740_v57  ;;  %v742_v27 = vsel %vm559_vm10, %v740_v57, %v738_v30  ;;  %v1385_v16 = vmul.f32 %v1384_v45, %v3459_v54  ;;  %v4188_v21 = vadd.f32 %v712_v51, %v628_v14 }
 0x47d   : > { %5799 = vst [vmem:[#allocation30_spill] sm:$0xff] %v4174_v18  ;;  %v4190_v12 = vadd.f32 %v713_v8, %v629_v62  ;;  %v744_v48 = vmul.f32 %v741_v58, %v3446_v49  ;;  %v1386_v2 = vmul.f32 %v1383_v60, %v3462_v63  ;;  %1345 = vrot.lane.b32.xlu1 %v3970_v43, %s5689_s29  ;;  %v5800_v30 = vstv %s3420_s28  ;;  %v754_v58 = vpop.permute.xlu1 %753  ;;  %s4225_s28 = sld [smem:[#allocation2 + $0xb]] }
 0x47e   : > { %v4202_v35 = vmul.f32 %v5800_v30, %v3967_v11  ;;  %v5802_v8 = vmov %v5800_v30  ;;  %v1398_v14 = vsel %vm611_vm13, %v5805_v5, %v5804_v36  ;;  %v752_v57 = vpop.permute.xlu0 %751  ;;  %v5806_v39 = vstv %s3435_s17  ;;  %s4265_s17 = sld [smem:[#allocation2 + $0xc]] }
 0x47f   : > { %v4207_v45 = vmul.f32 %v5802_v8, %v3970_v43  ;;  %v4218_v15 = vmul.f32 %v5806_v39, %v1371_v19  ;;  %v759_v11 = vstv %s4146_s2  ;;  %v755_v30 = vsel %vm585_vm12, %v752_v57, %v754_v58  ;;  %1945 = vrot.lane.b32.xlu0 %v3623_v4, %s5702_s30  ;;  %s4510_s2 = sld [smem:[#allocation2 + $0x14]] }
 0x480   : > { %5801 = vst [vmem:[#allocation29_spill] sm:$0xff] %v4202_v35  ;;  %v756_v43 = vsel %vm585_vm12, %v754_v58, %v752_v57  ;;  %v5808_v8 = vmov %v5806_v39  ;;  %v5810_v60 = vstv %s3452_s22  ;;  %v758_v39 = vmul.f32 %v755_v30, %v3462_v63  ;;  %s4295_s22 = sld [smem:[#allocation2 + $0xd]] }
 0x481   : > { %5803 = vst [vmem:[#allocation32_spill] sm:$0xff] %v4207_v45  ;;  %5807 = vst [vmem:[#allocation31_spill] sm:$0xff] %v4218_v15  ;;  %v4229_v45 = vmul.f32 %v5808_v8, %v1372_v55  ;;  %v4233_v51 = vmul.f32 %v5810_v60, %v1385_v16  ;;  %v757_v19 = vmul.f32 %v756_v43, %v3459_v54  ;;  %v5812_v62 = vmov %v5810_v60  ;;  %v5814_v16 = vld [vmem:[#allocation42_spill] sm:$0xff]  ;;  %v5815_v60 = vld [vmem:[#allocation41_spill] sm:$0xff] }
 0x482   : > { %v4241_v15 = vmul.f32 %v5812_v62, %v1386_v2  ;;  %v1397_v55 = vsel %vm611_vm13, %v5804_v36, %v5805_v5  ;;  %v1399_v57 = vmul.f32 %v1398_v14, %v3466_v31  ;;  %v1417_v58 = vsel %vm643_vm14, %v5815_v60, %v5814_v16  ;;  %1947 = vrot.lane.b32.xlu1 %v3626_v44, %s5702_s30  ;;  %v766_v5 = vpop.permute.xlu0 %765  ;;  %v768_v14 = vpop.permute.xlu1 %767  ;;  %s4369_s30 = sld [smem:[#allocation2 + $0xf]] }
 0x483   : > { %5809 = vst [vmem:[#allocation36_spill] sm:$0xff] %v4229_v45  ;;  %5811 = vst [vmem:[#allocation35_spill] sm:$0xff] %v4233_v51  ;;  %v1418_v2 = vsel %vm643_vm14, %v5814_v16, %v5815_v60  ;;  %v743_v62 = vmul.f32 %v742_v27, %v3443_v1  ;;  %v760_v30 = vmul.f32 %v759_v11, %v757_v19  ;;  %v745_v43 = vstv %s4177_s24  ;;  %s4544_s24 = sld [smem:[#allocation2 + $0x1c]] }
 0x484   : > { %5813 = vst [vmem:[#allocation38_spill] sm:$0xff] %v4241_v15  ;;  %v761_v36 = vmul.f32 %v759_v11, %v758_v39  ;;  %v773_v8 = vstv %s4185_s18  ;;  %v769_v15 = vsel %vm611_vm13, %v766_v5, %v768_v14  ;;  %v770_v51 = vsel %vm611_vm13, %v768_v14, %v766_v5  ;;  %1959 = vrot.lane.b32.xlu0 %v3623_v4, %s5666_s19  ;;  %s4681_s18 = sld [smem:[#allocation2 + $0x20]] }
 0x485   : > { %v4268_v45 = vadd.f32 %v760_v30, %v4115_v56  ;;  %v771_v11 = vmul.f32 %v770_v51, %v3466_v31  ;;  %v772_v19 = vmul.f32 %v769_v15, %v3475_v22  ;;  %v1400_v39 = vmul.f32 %v1397_v55, %v3475_v22  ;;  %v5818_v56 = vld [vmem:[#allocation44_spill] sm:$0xff]  ;;  %v5819_v30 = vld [vmem:[#allocation43_spill] sm:$0xff] }
 0x486   : > { %v4271_v27 = vadd.f32 %v761_v36, %v4117_v47  ;;  %v5816_v16 = vstv %s3471_s21  ;;  %v1419_v5 = vmul.f32 %v1417_v58, %v3479_v3  ;;  %v1431_v47 = vsel %vm669_vm15, %v5819_v30, %v5818_v56  ;;  %1961 = vrot.lane.b32.xlu1 %v3626_v44, %s5666_s19  ;;  %v786_v35 = vpop.permute.xlu0 %785  ;;  %v788_v18 = vpop.permute.xlu1 %787  ;;  %s5822_s19 = sld [smem:[#allocation86_spill]] }
 0x487   : > { %v4280_v60 = vmul.f32 %v5816_v16, %v1399_v57  ;;  %v746_v51 = vmul.f32 %v745_v43, %v743_v62  ;;  %v747_v15 = vmul.f32 %v745_v43, %v744_v48  ;;  %v774_v36 = vmul.f32 %v773_v8, %v771_v11  ;;  %v5821_v43 = vld [vmem:[#allocation45_spill] sm:$0xff] }
 0x488   : > { %v775_v14 = vmul.f32 %v773_v8, %v772_v19  ;;  %v1420_v55 = vmul.f32 %v1418_v2, %v3489_v25  ;;  %v793_v57 = vstv %s4225_s28  ;;  %v789_v58 = vsel %vm643_vm14, %v786_v35, %v788_v18  ;;  %1973 = vrot.lane.b32.xlu0 %v3623_v4, %s5720_s3  ;;  %s5896_s28 = sld [smem:[#allocation109_spill]] }
 0x489   : > { %5817 = vst [vmem:[#allocation37_spill] sm:$0xff] %v4280_v60  ;;  %v790_v16 = vsel %vm643_vm14, %v788_v18, %v786_v35  ;;  %v4298_v60 = vadd.f32 %v774_v36, %v4148_v42  ;;  %v791_v62 = vmul.f32 %v789_v58, %v3479_v3  ;;  %v1432_v18 = vsel %vm669_vm15, %v5818_v56, %v5819_v30  ;;  %v5820_v35 = vld [vmem:[#allocation46_spill] sm:$0xff] }
 0x48a   : > { %v4301_v48 = vadd.f32 %v775_v14, %v4150_v6  ;;  %v792_v2 = vmul.f32 %v790_v16, %v3489_v25  ;;  %v1433_v42 = vmul.f32 %v1431_v47, %v3493_v23  ;;  %v1445_v6 = vsel %vm695_vm11, %v5821_v43, %v5820_v35  ;;  %1975 = vrot.lane.b32.xlu1 %v3626_v44, %s5720_s3  ;;  %v800_v47 = vpop.permute.xlu0 %799  ;;  %v802_v36 = vpop.permute.xlu1 %801  ;;  %s4333_s3 = sld [smem:[#allocation2 + $0xe]] }
 0x48b   : > { %v1446_v8 = vsel %vm695_vm11, %v5820_v35, %v5821_v43  ;;  %v748_v11 = vadd.f32 %v746_v51, %v3862_v9  ;;  %v749_v19 = vadd.f32 %v747_v15, %v3878_v50  ;;  %v794_v56 = vmul.f32 %v793_v57, %v791_v62 }
 0x48c   : > { %v795_v30 = vmul.f32 %v793_v57, %v792_v2  ;;  %v5823_v14 = vstv %s3471_s21  ;;  %v807_v16 = vstv %s4265_s17  ;;  %v803_v35 = vsel %vm669_vm15, %v800_v47, %v802_v36  ;;  %1993 = vrot.lane.b32.xlu0 %v3623_v4, %s5735_s16  ;;  %s5831_s21 = sld [smem:[#allocation89_spill]] }
 0x48d   : > { %v4326_v58 = vmul.f32 %v5823_v14, %v1400_v39  ;;  %v804_v43 = vsel %vm669_vm15, %v802_v36, %v800_v47  ;;  %v4335_v9 = vadd.f32 %v794_v56, %v748_v11  ;;  %v805_v51 = vmul.f32 %v803_v35, %v3493_v23  ;;  %v5832_v35 = vld [vmem:[#allocation47_spill] sm:$0xff]  ;;  %s5905_s17 = sld [smem:[#allocation118_spill]] }
 0x48e   : > { %v4337_v50 = vadd.f32 %v795_v30, %v749_v19  ;;  %v806_v39 = vmul.f32 %v804_v43, %v3496_v37  ;;  %v5825_v15 = vstv %s5822_s19  ;;  %v1434_v62 = vmul.f32 %v1432_v18, %v3496_v37  ;;  %1995 = vrot.lane.b32.xlu1 %v3626_v44, %s5735_s16  ;;  %v814_v14 = vpop.permute.xlu0 %813  ;;  %v816_v18 = vpop.permute.xlu1 %815  ;;  %s5843_s16 = sld [smem:[#allocation91_spill]] }
 0x48f   : > { %5824 = vst [vmem:[#allocation39_spill] sm:$0xff] %v4326_v58  ;;  %v4345_v57 = vmul.f32 %v5825_v15, %v1419_v5  ;;  %v1447_v2 = vmul.f32 %v1445_v6, %v3531_v32  ;;  %v1448_v11 = vmul.f32 %v1446_v8, %v3501_v24  ;;  %v5827_v19 = vmov %v5825_v15  ;;  %v5833_v6 = vld [vmem:[#allocation48_spill] sm:$0xff]  ;;  %s5929_s19 = sld [smem:[#allocation125_spill]] }
 0x490   : > { %v4354_v56 = vmul.f32 %v5827_v19, %v1420_v55  ;;  %v5829_v30 = vstv %s3504_s23  ;;  %v808_v36 = vmul.f32 %v807_v16, %v805_v51  ;;  %v809_v5 = vmul.f32 %v807_v16, %v806_v39  ;;  %2007 = vrot.lane.b32.xlu0 %v3623_v4, %s5682_s5  ;;  %s5842_s23 = sld [smem:[#allocation90_spill]] }
 0x491   : > { %5826 = vst [vmem:[#allocation40_spill] sm:$0xff] %v4345_v57  ;;  %v4358_v47 = vmul.f32 %v5829_v30, %v1433_v42  ;;  %v1468_v8 = vsel %vm559_vm10, %v5833_v6, %v5832_v35  ;;  %v821_v43 = vstv %s4295_s22  ;;  %v817_v55 = vsel %vm695_vm11, %v814_v14, %v816_v18  ;;  %s4780_s22 = sld [smem:[#allocation2 + $0x22]] }
 0x492   : > { %5828 = vst [vmem:[#allocation42_spill] sm:$0xff] %v4354_v56  ;;  %v818_v15 = vsel %vm695_vm11, %v816_v18, %v814_v14  ;;  %v4372_v42 = vadd.f32 %v808_v36, %v4268_v45  ;;  %v4375_v16 = vadd.f32 %v809_v5, %v4271_v27  ;;  %v819_v51 = vmul.f32 %v817_v55, %v3531_v32  ;;  %v5840_v36 = vld [vmem:[#allocation50_spill] sm:$0xff]  ;;  %v5841_v5 = vld [vmem:[#allocation49_spill] sm:$0xff]  ;;  %v848_v55 = vpop.permute.xlu0 %847 }
 0x493   : > { %5830 = vst [vmem:[#allocation41_spill] sm:$0xff] %v4358_v47  ;;  %v820_v39 = vmul.f32 %v818_v15, %v3501_v24  ;;  %v5834_v19 = vmov %v5829_v30  ;;  %v5836_v14 = vstv %s5831_s21  ;;  %v1467_v27 = vsel %vm559_vm10, %v5832_v35, %v5833_v6  ;;  %2009 = vrot.lane.b32.xlu1 %v3626_v44, %s5682_s5  ;;  %v850_v15 = vpop.permute.xlu1 %849  ;;  %s4413_s5 = sld [smem:[#allocation2 + $0x10]] }
 0x494   : > { %v4383_v30 = vmul.f32 %v5834_v19, %v1434_v62  ;;  %v4387_v18 = vmul.f32 %v5836_v14, %v1447_v2  ;;  %v5838_v58 = vmov %v5836_v14  ;;  %v1481_v62 = vsel %vm585_vm12, %v5841_v5, %v5840_v36  ;;  %2021 = vrot.lane.b32.xlu0 %v3623_v4, %s5689_s29  ;;  %s5934_s21 = sld [smem:[#allocation127_spill]] }
 0x495   : > { %v4391_v45 = vmul.f32 %v5838_v58, %v1448_v11  ;;  %v1482_v2 = vsel %vm585_vm12, %v5840_v36, %v5841_v5  ;;  %v822_v58 = vmul.f32 %v821_v43, %v819_v51  ;;  %v823_v11 = vmul.f32 %v821_v43, %v820_v39 }
 0x496   : > { %5835 = vst [vmem:[#allocation44_spill] sm:$0xff] %v4383_v30  ;;  %5837 = vst [vmem:[#allocation43_spill] sm:$0xff] %v4387_v18  ;;  %v1469_v19 = vmul.f32 %v1468_v8, %v3443_v1  ;;  %v855_v35 = vstv %s4333_s3  ;;  %v851_v6 = vsel %vm559_vm10, %v848_v55, %v850_v15  ;;  %v852_v14 = vsel %vm559_vm10, %v850_v15, %v848_v55  ;;  %s4799_s3 = sld [smem:[#allocation2 + $0x23]] }
 0x497   : > { %5839 = vst [vmem:[#allocation46_spill] sm:$0xff] %v4391_v45  ;;  %v4416_v45 = vadd.f32 %v822_v58, %v4298_v60  ;;  %v825_v51 = vadd.f32 %v823_v11, %v4301_v48  ;;  %v853_v43 = vmul.f32 %v852_v14, %v3443_v1  ;;  %v854_v8 = vmul.f32 %v851_v6, %v3446_v49  ;;  %v862_v11 = vpop.permute.xlu0 %861 }
 0x498   : > { %v1470_v39 = vmul.f32 %v1467_v27, %v3446_v49  ;;  %v1483_v36 = vmul.f32 %v1482_v2, %v3459_v54  ;;  %v1484_v5 = vmul.f32 %v1481_v62, %v3462_v63  ;;  %v782_v60 = vadd.f32 %v3894_v20, %v4188_v21  ;;  %2023 = vrot.lane.b32.xlu1 %v3626_v44, %s5689_s29  ;;  %v864_v2 = vpop.permute.xlu1 %863  ;;  %s4442_s29 = sld [smem:[#allocation2 + $0x12]] }
 0x499   : > { %v893_v48 = vadd.f32 %v3915_v34, %v825_v51  ;;  %v783_v58 = vadd.f32 %v3899_v29, %v4190_v12  ;;  %v856_v4 = vmul.f32 %v855_v35, %v853_v43  ;;  %v857_v27 = vmul.f32 %v855_v35, %v854_v8 }
 0x49a   : > { %v5844_v55 = vstv %s5842_s23  ;;  %v869_v15 = vstv %s4369_s30  ;;  %v865_v20 = vsel %vm585_vm12, %v862_v11, %v864_v2  ;;  %v866_v44 = vsel %vm585_vm12, %v864_v2, %v862_v11  ;;  %v5852_v11 = vld [vmem:[#allocation52_spill] sm:$0xff]  ;;  %v5853_v2 = vld [vmem:[#allocation51_spill] sm:$0xff]  ;;  %s4826_s30 = sld [smem:[#allocation2 + $0x24]] }
 0x49b   : > { %v4435_v62 = vmul.f32 %v5844_v55, %v1469_v19  ;;  %v858_v34 = vadd.f32 %v856_v4, %v782_v60  ;;  %v859_v29 = vadd.f32 %v857_v27, %v783_v58  ;;  %v867_v21 = vmul.f32 %v866_v44, %v3459_v54  ;;  %v876_v27 = vpop.permute.xlu0 %875  ;;  %s4872_s23 = sld [smem:[#allocation2 + $0x27]] }
 0x49c   : > { %v868_v12 = vmul.f32 %v865_v20, %v3462_v63  ;;  %v5846_v35 = vmov %v5844_v55  ;;  %v5848_v19 = vstv %s5843_s16  ;;  %v949_v8 = vadd.f32 %v3990_v0, %v893_v48  ;;  %s4987_s16 = sld [smem:[#allocation2 + $0x2f]] }
 0x49d   : > { %5845 = vst [vmem:[#allocation45_spill] sm:$0xff] %v4435_v62  ;;  %v4448_v6 = vmul.f32 %v5846_v35, %v1470_v39  ;;  %v4452_v14 = vmul.f32 %v5848_v19, %v1483_v36  ;;  %v5850_v51 = vmov %v5848_v19  ;;  %v1495_v60 = vsel %vm611_vm13, %v5853_v2, %v5852_v11  ;;  %v878_v36 = vpop.permute.xlu1 %877  ;;  %v5854_v19 = vld [vmem:[#allocation54_spill] sm:$0xff] }
 0x49e   : > { %v4456_v43 = vmul.f32 %v5850_v51, %v1484_v5  ;;  %v1496_v58 = vsel %vm611_vm13, %v5852_v11, %v5853_v2  ;;  %v870_v39 = vmul.f32 %v869_v15, %v867_v21  ;;  %v871_v4 = vmul.f32 %v869_v15, %v868_v12  ;;  %v5855_v51 = vld [vmem:[#allocation53_spill] sm:$0xff] }
 0x49f   : > { %5847 = vst [vmem:[#allocation47_spill] sm:$0xff] %v4448_v6  ;;  %5849 = vst [vmem:[#allocation48_spill] sm:$0xff] %v4452_v14  ;;  %v883_v55 = vstv %s4413_s5  ;;  %v879_v5 = vsel %vm611_vm13, %v876_v27, %v878_v36  ;;  %v880_v0 = vsel %vm611_vm13, %v878_v36, %v876_v27  ;;  %v4475_v48 = vadd.f32 %v4052_v33, %v949_v8  ;;  %v5856_v8 = vld [vmem:[#allocation56_spill] sm:$0xff]  ;;  %v5859_v27 = vld [vmem:[#allocation58_spill] sm:$0xff]  ;;  %s4833_s5 = sld [smem:[#allocation2 + $0x25]] }
 0x4a0   : > { %5851 = vst [vmem:[#allocation50_spill] sm:$0xff] %v4456_v43  ;;  %v4478_v20 = vadd.f32 %v870_v39, %v4335_v9  ;;  %v873_v15 = vadd.f32 %v871_v4, %v4337_v50  ;;  %v881_v44 = vmul.f32 %v880_v0, %v3466_v31  ;;  %v882_v21 = vmul.f32 %v879_v5, %v3475_v22  ;;  %v5857_v50 = vld [vmem:[#allocation55_spill] sm:$0xff]  ;;  %v896_v39 = vpop.permute.xlu0 %895  ;;  %v5860_v36 = vld [vmem:[#allocation57_spill] sm:$0xff] }
 0x4a1   : > { %v1497_v12 = vmul.f32 %v1496_v58, %v3466_v31  ;;  %v1498_v35 = vmul.f32 %v1495_v60, %v3475_v22  ;;  %v1515_v33 = vsel %vm643_vm14, %v5855_v51, %v5854_v19  ;;  %v1516_v9 = vsel %vm643_vm14, %v5854_v19, %v5855_v51  ;;  %v898_v4 = vpop.permute.xlu1 %897 }
 0x4a2   : > { %v1529_v11 = vsel %vm669_vm15, %v5857_v50, %v5856_v8  ;;  %v1530_v2 = vsel %vm669_vm15, %v5856_v8, %v5857_v50  ;;  %v884_v60 = vmul.f32 %v883_v55, %v881_v44  ;;  %v885_v58 = vmul.f32 %v883_v55, %v882_v21 }
 0x4a3   : > { %v1543_v5 = vsel %vm695_vm11, %v5860_v36, %v5859_v27  ;;  %v903_v0 = vstv %s4442_s29  ;;  %v899_v19 = vsel %vm643_vm14, %v896_v39, %v898_v4  ;;  %v900_v51 = vsel %vm643_vm14, %v898_v4, %v896_v39  ;;  %s5007_s29 = sld [smem:[#allocation2 + $0x5b]] }
 0x4a4   : > { %v4513_v8 = vadd.f32 %v884_v60, %v4372_v42  ;;  %v887_v55 = vadd.f32 %v885_v58, %v4375_v16  ;;  %v901_v44 = vmul.f32 %v899_v19, %v3479_v3  ;;  %v902_v21 = vmul.f32 %v900_v51, %v3489_v25 }
 0x4a5   : > { %v5861_v50 = vstv %s5858_s11  ;;  %v1517_v62 = vmul.f32 %v1515_v33, %v3479_v3  ;;  %v1518_v39 = vmul.f32 %v1516_v9, %v3489_v25  ;;  %v1531_v4 = vmul.f32 %v1529_v11, %v3493_v23  ;;  %v4532_v19 = vpop.permute.xlu1 %911  ;;  %v5863_v9 = vld [vmem:[#allocation59_spill] sm:$0xff]  ;;  %v5864_v11 = vld [vmem:[#allocation60_spill] sm:$0xff]  ;;  %s5207_s11 = sld [smem:[#allocation2 + $0x61]] }
 0x4a6   : > { %v4520_v6 = vmul.f32 %v5861_v50, %v1497_v12  ;;  %v1532_v42 = vmul.f32 %v1530_v2, %v3496_v37  ;;  %v1544_v16 = vsel %vm695_vm11, %v5859_v27, %v5860_v36  ;;  %v904_v60 = vmul.f32 %v903_v0, %v901_v44  ;;  %v4530_v12 = vpop.permute.xlu0 %909 }
 0x4a7   : > { %v905_v58 = vmul.f32 %v903_v0, %v902_v21  ;;  %v1545_v33 = vmul.f32 %v1543_v5, %v3531_v32  ;;  %v1566_v2 = vsel %vm559_vm10, %v5864_v11, %v5863_v9  ;;  %v914_v27 = vsel %vm669_vm15, %v4532_v19, %v4530_v12 }
 0x4a8   : > { %5862 = vst [vmem:[#allocation49_spill] sm:$0xff] %v4520_v6  ;;  %v5865_v36 = vmov %v5861_v50  ;;  %v4550_v5 = vadd.f32 %v904_v60, %v858_v34  ;;  %v916_v21 = vmul.f32 %v914_v27, %v3496_v37  ;;  %v5867_v50 = vstv %s3653_s26  ;;  %s4591_s26 = sld [smem:[#allocation2 + $0x1d]] }
 0x4a9   : > { %v4548_v0 = vmul.f32 %v5865_v36, %v1498_v35  ;;  %v907_v44 = vadd.f32 %v905_v58, %v859_v29  ;;  %v4555_v51 = vmul.f32 %v5867_v50, %v1517_v62  ;;  %v5869_v18 = vmov %v5867_v50 }
 0x4aa   : > { %v4559_v6 = vmul.f32 %v5869_v18, %v1518_v39  ;;  %v5871_v30 = vstv %s3664_s7  ;;  %v1546_v43 = vmul.f32 %v1544_v16, %v3501_v24  ;;  %v1565_v34 = vsel %vm559_vm10, %v5863_v9, %v5864_v11  ;;  %v4574_v18 = vpop.permute.xlu0 %923  ;;  %v4576_v39 = vpop.permute.xlu1 %925  ;;  %v5877_v9 = vld [vmem:[#allocation62_spill] sm:$0xff]  ;;  %v5878_v11 = vld [vmem:[#allocation61_spill] sm:$0xff]  ;;  %s5894_s7 = sld [smem:[#allocation108_spill]] }
 0x4ab   : > { %5866 = vst [vmem:[#allocation52_spill] sm:$0xff] %v4548_v0  ;;  %5868 = vst [vmem:[#allocation51_spill] sm:$0xff] %v4555_v51  ;;  %v4563_v47 = vmul.f32 %v5871_v30, %v1531_v4  ;;  %v1567_v29 = vmul.f32 %v1566_v2, %v3443_v1  ;;  %v963_v35 = vadd.f32 %v4021_v10, %v907_v44  ;;  %v5873_v62 = vstv %s4472_s27 }
 0x4ac   : > { %5870 = vst [vmem:[#allocation54_spill] sm:$0xff] %v4559_v6  ;;  %v919_v60 = vmul.f32 %v5873_v62, %v916_v21  ;;  %v4580_v4 = vmul.f32 %v5871_v30, %v1532_v42  ;;  %v5875_v16 = vstv %s3684_s20  ;;  %v928_v10 = vsel %vm695_vm11, %v4576_v39, %v4574_v18  ;;  %v5881_v62 = vld [vmem:[#allocation63_spill] sm:$0xff]  ;;  %v5882_v30 = vld [vmem:[#allocation64_spill] sm:$0xff]  ;;  %s4636_s20 = sld [smem:[#allocation2 + $0x1e]] }
 0x4ad   : > { %5872 = vst [vmem:[#allocation53_spill] sm:$0xff] %v4563_v47  ;;  %v4584_v58 = vmul.f32 %v5875_v16, %v1545_v33  ;;  %v1579_v2 = vsel %vm585_vm12, %v5878_v11, %v5877_v9  ;;  %v1580_v42 = vsel %vm585_vm12, %v5877_v9, %v5878_v11  ;;  %v930_v36 = vmul.f32 %v928_v10, %v3501_v24 }
 0x4ae   : > { %5874 = vst [vmem:[#allocation56_spill] sm:$0xff] %v4580_v4  ;;  %v921_v33 = vadd.f32 %v919_v60, %v873_v15  ;;  %v5879_v44 = vmov %v5875_v16  ;;  %v1568_v50 = vmul.f32 %v1565_v34, %v3446_v49  ;;  %v1594_v16 = vsel %vm611_vm13, %v5882_v30, %v5881_v62  ;;  %v4625_v10 = vpop.permute.xlu0 %1047  ;;  %v4627_v9 = vpop.permute.xlu1 %1049 }
 0x4af   : > { %5876 = vst [vmem:[#allocation55_spill] sm:$0xff] %v4584_v58  ;;  %v4604_v21 = vmul.f32 %v5879_v44, %v1546_v43  ;;  %v4612_v27 = vadd.f32 %v4064_v53, %v963_v35  ;;  %v5883_v6 = vstv %s3704_s8  ;;  %v1593_v15 = vsel %vm611_vm13, %v5881_v62, %v5882_v30  ;;  %v5886_v35 = vld [vmem:[#allocation66_spill] sm:$0xff]  ;;  %v5888_v30 = vld [vmem:[#allocation68_spill] sm:$0xff] }
 0x4b0   : > { %v4616_v51 = vmul.f32 %v5883_v6, %v1567_v29  ;;  %v977_v43 = vadd.f32 %v4035_v13, %v921_v33  ;;  %v5885_v60 = vstv %s4510_s2  ;;  %v1581_v11 = vmul.f32 %v1580_v42, %v3459_v54  ;;  %v5887_v33 = vld [vmem:[#allocation65_spill] sm:$0xff] }
 0x4b1   : > { %5880 = vst [vmem:[#allocation58_spill] sm:$0xff] %v4604_v21  ;;  %v933_v34 = vmul.f32 %v5885_v60, %v930_v36  ;;  %v1582_v53 = vmul.f32 %v1579_v2, %v3462_v63  ;;  %v1051_v29 = vsel %vm559_vm10, %v4625_v10, %v4627_v9  ;;  %v1595_v13 = vmul.f32 %v1594_v16, %v3466_v31  ;;  %v5889_v60 = vld [vmem:[#allocation67_spill] sm:$0xff] }
 0x4b2   : > { %5884 = vst [vmem:[#allocation57_spill] sm:$0xff] %v4616_v51  ;;  %v1613_v36 = vsel %vm643_vm14, %v5887_v33, %v5886_v35  ;;  %v1054_v44 = vmul.f32 %v1051_v29, %v3446_v49  ;;  %v1596_v2 = vmul.f32 %v1593_v15, %v3475_v22  ;;  %v1614_v62 = vsel %vm643_vm14, %v5886_v35, %v5887_v33  ;;  %v5890_v15 = vld [vmem:[#allocation70_spill] sm:$0xff]  ;;  %v5892_v35 = vld [vmem:[#allocation82_spill] sm:$0xff]  ;;  %v4667_v58 = vpop.permute.xlu0 %1061 }
 0x4b3   : > { %v935_v42 = vadd.f32 %v933_v34, %v887_v55  ;;  %v1627_v16 = vsel %vm669_vm15, %v5889_v60, %v5888_v30  ;;  %v4654_v6 = vadd.f32 %v4083_v52, %v977_v43  ;;  %v1628_v55 = vsel %vm669_vm15, %v5888_v30, %v5889_v60  ;;  %v5891_v34 = vld [vmem:[#allocation69_spill] sm:$0xff]  ;;  %v4669_v52 = vpop.permute.xlu1 %1063 }
 0x4b4   : > { %v1641_v29 = vsel %vm695_vm11, %v5891_v34, %v5890_v15  ;;  %v5893_v51 = vstv %s4544_s24  ;;  %v1615_v43 = vmul.f32 %v1613_v36, %v3479_v3  ;;  %v1642_v30 = vsel %vm695_vm11, %v5890_v15, %v5891_v34 }
 0x4b5   : > { %v983_v33 = vadd.f32 %v5892_v35, %v935_v42  ;;  %v1057_v21 = vmul.f32 %v5893_v51, %v1054_v44  ;;  %v1065_v51 = vsel %vm585_vm12, %v4667_v58, %v4669_v52  ;;  %v5895_v42 = vstv %s3704_s8  ;;  %s5901_s8 = sld [smem:[#allocation110_spill]] }
 0x4b6   : > { %v4685_v44 = vmul.f32 %v5895_v42, %v1568_v50  ;;  %v1616_v36 = vmul.f32 %v1614_v62, %v3489_v25  ;;  %v1068_v0 = vmul.f32 %v1065_v51, %v3462_v63  ;;  %v5898_v15 = vstv %s3721_s6  ;;  %v4707_v51 = vpop.permute.xlu0 %1075  ;;  %s4724_s6 = sld [smem:[#allocation2 + $0x21]] }
 0x4b7   : > { %v1059_v35 = vadd.f32 %v1057_v21, %v983_v33  ;;  %v4691_v34 = vmul.f32 %v5898_v15, %v1581_v11  ;;  %v1629_v60 = vmul.f32 %v1627_v16, %v3493_v23  ;;  %v1630_v4 = vmul.f32 %v1628_v55, %v3496_v37  ;;  %v4709_v16 = vpop.permute.xlu1 %1077 }
 0x4b8   : > { %5897 = vst [vmem:[#allocation59_spill] sm:$0xff] %v4685_v44  ;;  %v1643_v47 = vmul.f32 %v1641_v29, %v3531_v32  ;;  %v5900_v14 = vmov %v5898_v15  ;;  %v5903_v42 = vstv %s5894_s7  ;;  %v1644_v21 = vmul.f32 %v1642_v30, %v3501_v24 }
 0x4b9   : > { %5899 = vst [vmem:[#allocation60_spill] sm:$0xff] %v4691_v34  ;;  %v4698_v50 = vmul.f32 %v5900_v14, %v1582_v53  ;;  %v4702_v62 = vmul.f32 %v5903_v42, %v1595_v13  ;;  %v5906_v33 = vstv %s4591_s26  ;;  %v5907_v55 = vmov %v5903_v42  ;;  %v5913_v42 = vld [vmem:[#allocation71_spill] sm:$0xff] }
 0x4ba   : > { %v1071_v11 = vmul.f32 %v5906_v33, %v1068_v0  ;;  %v4713_v29 = vmul.f32 %v5907_v55, %v1596_v2  ;;  %v5909_v15 = vstv %s5896_s28  ;;  %v1079_v13 = vsel %vm611_vm13, %v4707_v51, %v4709_v16  ;;  %v5914_v33 = vld [vmem:[#allocation72_spill] sm:$0xff] }
 0x4bb   : > { %5902 = vst [vmem:[#allocation62_spill] sm:$0xff] %v4698_v50  ;;  %5904 = vst [vmem:[#allocation61_spill] sm:$0xff] %v4702_v62  ;;  %v4717_v14 = vmul.f32 %v5909_v15, %v1615_v43  ;;  %v5911_v0 = vmov %v5909_v15  ;;  %v1754_v2 = vsel %vm559_vm10, %v5914_v33, %v5913_v42  ;;  %v1082_v55 = vmul.f32 %v1079_v13, %v3475_v22  ;;  %v4768_v13 = vpop.permute.xlu1 %1097 }
 0x4bc   : > { %5908 = vst [vmem:[#allocation63_spill] sm:$0xff] %v4713_v29  ;;  %v4728_v30 = vmul.f32 %v5911_v0, %v1616_v36  ;;  %v1073_v43 = vadd.f32 %v1071_v11, %v4475_v48  ;;  %v5915_v15 = vstv %s5901_s8  ;;  %v1753_v36 = vsel %vm559_vm10, %v5913_v42, %v5914_v33  ;;  %v5923_v48 = vld [vmem:[#allocation74_spill] sm:$0xff]  ;;  %v5924_v11 = vld [vmem:[#allocation73_spill] sm:$0xff]  ;;  %v5928_v33 = vld [vmem:[#allocation77_spill] sm:$0xff] }
 0x4bd   : > { %5910 = vst [vmem:[#allocation64_spill] sm:$0xff] %v4717_v14  ;;  %v4738_v53 = vmul.f32 %v5915_v15, %v1629_v60  ;;  %v5917_v50 = vmov %v5915_v15  ;;  %v5919_v14 = vstv %s5905_s17  ;;  %v1767_v60 = vsel %vm585_vm12, %v5924_v11, %v5923_v48 }
 0x4be   : > { %5912 = vst [vmem:[#allocation66_spill] sm:$0xff] %v4728_v30  ;;  %v4742_v34 = vmul.f32 %v5917_v50, %v1630_v4  ;;  %v4746_v44 = vmul.f32 %v5919_v14, %v1643_v47  ;;  %v5921_v0 = vmov %v5919_v14  ;;  %v1768_v4 = vsel %vm585_vm12, %v5923_v48, %v5924_v11  ;;  %v4766_v14 = vpop.permute.xlu0 %1095 }
 0x4bf   : > { %5916 = vst [vmem:[#allocation65_spill] sm:$0xff] %v4738_v53  ;;  %v4754_v30 = vmul.f32 %v5921_v0, %v1644_v21  ;;  %v5925_v47 = vstv %s4636_s20  ;;  %5926 = vst [vmem:[#allocation69_spill] sm:$0xff] %v4766_v14  ;;  %v1755_v42 = vmul.f32 %v1754_v2, %v3443_v1  ;;  %v5927_v21 = vld [vmem:[#allocation76_spill] sm:$0xff]  ;;  %v1100_v48 = vsel %vm643_vm14, %v4768_v13, %v4766_v14  ;;  %v5930_v53 = vld [vmem:[#allocation81_spill] sm:$0xff] }
 0x4c0   : > { %5918 = vst [vmem:[#allocation68_spill] sm:$0xff] %v4742_v34  ;;  %5920 = vst [vmem:[#allocation67_spill] sm:$0xff] %v4746_v44  ;;  %v1085_v50 = vmul.f32 %v5925_v47, %v1082_v55  ;;  %v1782_v15 = vsel %vm611_vm13, %v5928_v33, %v5927_v21  ;;  %v1756_v55 = vmul.f32 %v1753_v36, %v3446_v49  ;;  %v5939_v56 = vstv %s5934_s21 }
 0x4c1   : > { %5922 = vst [vmem:[#allocation70_spill] sm:$0xff] %v4754_v30  ;;  %v1781_v2 = vsel %vm611_vm13, %v5927_v21, %v5928_v33  ;;  %v1102_v47 = vmul.f32 %v1100_v48, %v3489_v25  ;;  %v1769_v0 = vmul.f32 %v1768_v4, %v3459_v54  ;;  %v1770_v34 = vmul.f32 %v1767_v60, %v3462_v63  ;;  %v5931_v30 = vld [vmem:[#allocation80_spill] sm:$0xff]  ;;  %v5933_v21 = vld [vmem:[#allocation87_spill] sm:$0xff] }
 0x4c2   : > { %v1087_v11 = vadd.f32 %v1085_v50, %v4612_v27  ;;  %v1801_v44 = vsel %vm643_vm14, %v5931_v30, %v5930_v53  ;;  %v1802_v36 = vsel %vm643_vm14, %v5930_v53, %v5931_v30  ;;  %v1783_v27 = vmul.f32 %v1782_v15, %v3466_v31  ;;  %v5932_v50 = vld [vmem:[#allocation88_spill] sm:$0xff]  ;;  %v4812_v29 = vpop.permute.xlu0 %1109  ;;  %v4814_v53 = vpop.permute.xlu1 %1111 }
 0x4c3   : > { %v1815_v60 = vsel %vm669_vm15, %v5933_v21, %v5932_v50  ;;  %v1816_v4 = vsel %vm669_vm15, %v5932_v50, %v5933_v21  ;;  %v5935_v33 = vstv %s4681_s18  ;;  %v5936_v30 = vstv %s5929_s19 }
 0x4c4   : > { %v1105_v48 = vmul.f32 %v5935_v33, %v1102_v47  ;;  %v4818_v15 = vmul.f32 %v5936_v30, %v1755_v42  ;;  %v1784_v62 = vmul.f32 %v1781_v2, %v3475_v22  ;;  %v1114_v50 = vsel %vm669_vm15, %v4814_v53, %v4812_v29 }
 0x4c5   : > { %v1803_v47 = vmul.f32 %v1801_v44, %v3479_v3  ;;  %v1804_v21 = vmul.f32 %v1802_v36, %v3489_v25  ;;  %v1116_v42 = vmul.f32 %v1114_v50, %v3496_v37  ;;  %v5938_v2 = vmov %v5936_v30 }
 0x4c6   : > { %5937 = vst [vmem:[#allocation82_spill] sm:$0xff] %v4818_v15  ;;  %v4830_v33 = vadd.f32 %v1105_v48, %v1059_v35  ;;  %v4837_v30 = vmul.f32 %v5938_v2, %v1756_v55  ;;  %v4841_v15 = vmul.f32 %v5939_v56, %v1769_v0  ;;  %v1817_v57 = vmul.f32 %v1815_v60, %v3493_v23  ;;  %v4859_v0 = vpop.permute.xlu1 %1125 }
 0x4c7   : > { %v1818_v44 = vmul.f32 %v1816_v4, %v3496_v37  ;;  %v5941_v36 = vmov %v5939_v56  ;;  %v5943_v35 = vstv %s3910_s13  ;;  %v1831_v55 = vmul.f32 %v3524_v61, %v3531_v32  ;;  %v4857_v56 = vpop.permute.xlu0 %1123  ;;  %s4885_s13 = sld [smem:[#allocation2 + $0x28]] }
 0x4c8   : > { %5940 = vst [vmem:[#allocation71_spill] sm:$0xff] %v4841_v15  ;;  %v4847_v14 = vmul.f32 %v5941_v36, %v1770_v34  ;;  %v4851_v48 = vmul.f32 %v5943_v35, %v1783_v27  ;;  %v5944_v50 = vstv %s4724_s6  ;;  %v5945_v60 = vmov %v5943_v35 }
 0x4c9   : > { %v1119_v2 = vmul.f32 %v5944_v50, %v1116_v42  ;;  %v4863_v34 = vmul.f32 %v5945_v60, %v1784_v62  ;;  %v1853_v27 = vmul.f32 %v3582_v41, %v3443_v1  ;;  %v1128_v61 = vsel %vm695_vm11, %v4859_v0, %v4857_v56 }
 0x4ca   : > { %5942 = vst [vmem:[#allocation72_spill] sm:$0xff] %v4847_v14  ;;  %v5946_v42 = vstv %s3925_s0  ;;  %v1130_v41 = vmul.f32 %v1128_v61, %v3501_v24  ;;  %v5948_v60 = vstv %s3937_s1  ;;  %s4917_s0 = sld [smem:[#allocation2 + $0x29]] }
 0x4cb   : > { %v4876_v36 = vmul.f32 %v5946_v42, %v1803_v47  ;;  %v5947_v35 = vmov %v5946_v42  ;;  %v4882_v62 = vadd.f32 %v1119_v2, %v1073_v43  ;;  %v4889_v4 = vmul.f32 %v5948_v60, %v1817_v57  ;;  %s4930_s1 = sld [smem:[#allocation2 + $0x2a]] }
 0x4cc   : > { %v4880_v50 = vmul.f32 %v5947_v35, %v1804_v21  ;;  %v5950_v14 = vmov %v5948_v60  ;;  %v1867_v47 = vmul.f32 %v3638_v28, %v3459_v54  ;;  %v5952_v21 = vstv %s3956_s15  ;;  %v4913_v35 = vpop.permute.xlu0 %1157  ;;  %v4915_v28 = vpop.permute.xlu1 %1159  ;;  %s4941_s15 = sld [smem:[#allocation2 + $0x2b]] }
 0x4cd   : > { %5949 = vst [vmem:[#allocation74_spill] sm:$0xff] %v4889_v4  ;;  %v4893_v15 = vmul.f32 %v5950_v14, %v1818_v44  ;;  %v4900_v43 = vmul.f32 %v5952_v21, %v1831_v55  ;;  %v5953_v2 = vmov %v5952_v21  ;;  %v913_v57 = vsel %vm669_vm15, %v4530_v12, %v4532_v19 }
 0x4ce   : > { %v4905_v61 = vmul.f32 %v5953_v2, %v3536_v38  ;;  %v5955_v14 = vstv %s4780_s22  ;;  %v5956_v55 = vstv %s3994_s25  ;;  %v1881_v38 = vmul.f32 %v3710_v40, %v3466_v31  ;;  %s4955_s25 = sld [smem:[#allocation2 + $0x2c]]  ;;  %v5966_v40 = vld [vmem:[#allocation107_spill] sm:$0xff] }
 0x4cf   : > { %5951 = vst [vmem:[#allocation73_spill] sm:$0xff] %v4893_v15  ;;  %v1133_v44 = vmul.f32 %v5955_v14, %v1130_v41  ;;  %v4921_v60 = vmul.f32 %v5956_v55, %v1853_v27  ;;  %v1161_v12 = vsel %vm559_vm10, %v4913_v35, %v4915_v28  ;;  %v5958_v41 = vmov %v5956_v55 }
 0x4d0   : > { %5954 = vst [vmem:[#allocation76_spill] sm:$0xff] %v4905_v61  ;;  %v4935_v21 = vmul.f32 %v5958_v41, %v3588_v46  ;;  %v1164_v27 = vmul.f32 %v1161_v12, %v3446_v49  ;;  %v5960_v14 = vstv %s4056_s4  ;;  %v1901_v46 = vmul.f32 %v3764_v7, %v3479_v3  ;;  %v5962_v12 = vld [vmem:[#allocation28_spill] sm:$0xff]  ;;  %v4969_v41 = vpop.permute.xlu1 %1173  ;;  %s4971_s4 = sld [smem:[#allocation2 + $0x2e]] }
 0x4d1   : > { %5957 = vst [vmem:[#allocation77_spill] sm:$0xff] %v4921_v60  ;;  %v4937_v2 = vadd.f32 %v1133_v44, %v1087_v11  ;;  %v4945_v55 = vmul.f32 %v5960_v14, %v1867_v47  ;;  %v5961_v19 = vmov %v5960_v14  ;;  %v915_v11 = vmul.f32 %v913_v57, %v3493_v23  ;;  %v4967_v57 = vpop.permute.xlu0 %1171 }
 0x4d2   : > { %5959 = vst [vmem:[#allocation81_spill] sm:$0xff] %v4935_v21  ;;  %v4950_v42 = vmul.f32 %v5961_v19, %v3656_v59  ;;  %v1915_v44 = vmul.f32 %v3804_v17, %v3493_v23  ;;  %v927_v47 = vsel %vm695_vm11, %v4574_v18, %v4576_v39  ;;  %v1093_v59 = vadd.f32 %v5962_v12, %v4654_v6  ;;  %v5969_v12 = vld [vmem:[#allocation124_spill] sm:$0xff] }
 0x4d3   : > { %v5963_v19 = vstv %s4799_s3  ;;  %v5964_v17 = vstv %s4101_s14  ;;  %v1175_v6 = vsel %vm585_vm12, %v4967_v57, %v4969_v41  ;;  %s4993_s14 = sld [smem:[#allocation2 + $0x30]]  ;;  %v5972_v21 = vld [vmem:[#allocation111_spill] sm:$0xff] }
 0x4d4   : > { %v1167_v7 = vmul.f32 %v5963_v19, %v1164_v27  ;;  %v4975_v14 = vmul.f32 %v5964_v17, %v1881_v38  ;;  %v5967_v18 = vmov %v5964_v17  ;;  %v1929_v19 = vmul.f32 %v5969_v12, %v3531_v32 }
 0x4d5   : > { %v4980_v39 = vmul.f32 %v5967_v18, %v5966_v40  ;;  %v1178_v17 = vmul.f32 %v1175_v6, %v3462_v63  ;;  %v5970_v40 = vstv %s4113_s12  ;;  %v5975_v27 = vstv %s4472_s27  ;;  %v5977_v6 = vld [vmem:[#allocation119_spill] sm:$0xff]  ;;  %s5021_s12 = sld [smem:[#allocation2 + $0x5c]] }
 0x4d6   : > { %5965 = vst [vmem:[#allocation80_spill] sm:$0xff] %v4975_v14  ;;  %v1169_v38 = vadd.f32 %v1167_v7, %v1093_v59  ;;  %v4997_v18 = vmul.f32 %v5970_v40, %v1901_v46  ;;  %v918_v15 = vmul.f32 %v5975_v27, %v915_v11  ;;  %v929_v12 = vmul.f32 %v927_v47, %v3531_v32  ;;  %v5980_v11 = vld [vmem:[#allocation128_spill] sm:$0xff]  ;;  %s5083_s27 = sld [smem:[#allocation2 + $0x60]] }
 0x4d7   : > { %5968 = vst [vmem:[#allocation88_spill] sm:$0xff] %v4980_v39  ;;  %v5973_v39 = vmov %v5970_v40  ;;  %v5976_v59 = vstv %s4132_s9  ;;  %v5979_v46 = vstv %s4826_s30  ;;  %v892_v47 = vadd.f32 %v5980_v11, %v4416_v45  ;;  %s5032_s9 = sld [smem:[#allocation2 + $0x5d]] }
 0x4d8   : > { %5971 = vst [vmem:[#allocation87_spill] sm:$0xff] %v4997_v18  ;;  %v5002_v14 = vmul.f32 %v5973_v39, %v5972_v21  ;;  %v5011_v7 = vmul.f32 %v5976_v59, %v1915_v44  ;;  %v5978_v60 = vmov %v5976_v59  ;;  %v1181_v40 = vmul.f32 %v5979_v46, %v1178_v17  ;;  %v1186_v21 = vpop.permute.xlu0 %1185  ;;  %v1188_v39 = vpop.permute.xlu1 %1187 }
 0x4d9   : > { %v5016_v4 = vmul.f32 %v5978_v60, %v5977_v6  ;;  %v1066_v44 = vsel %vm585_vm12, %v4669_v52, %v4667_v58  ;;  %v1189_v60 = vsel %vm611_vm13, %v1186_v21, %v1188_v39  ;;  %v5981_v17 = vstv %s4136_s10  ;;  %v5983_v6 = vld [vmem:[#allocation126_spill] sm:$0xff]  ;;  %s5077_s10 = sld [smem:[#allocation2 + $0x5f]] }
 0x4da   : > { %5974 = vst [vmem:[#allocation28_spill] sm:$0xff] %v5002_v14  ;;  %v5036_v59 = vmul.f32 %v5981_v17, %v1929_v19  ;;  %v5984_v46 = vmov %v5981_v17  ;;  %v1183_v45 = vadd.f32 %v1181_v40, %v4830_v33  ;;  %v1192_v58 = vmul.f32 %v1189_v60, %v3475_v22  ;;  %v5995_v40 = vld [vmem:[#allocation83_spill] sm:$0xff] }
 0x4db   : > { %v5041_v18 = vmul.f32 %v5984_v46, %v5983_v6  ;;  %v920_v52 = vadd.f32 %v918_v15, %v4478_v20  ;;  %v5986_v11 = vstv %s4510_s2  ;;  %v1113_v27 = vsel %vm669_vm15, %v4812_v29, %v4814_v53  ;;  %v5988_v15 = vld [vmem:[#allocation22_spill] sm:$0xff]  ;;  %s6108_s2 = sld [smem:[#allocation9_spill]] }
 0x4dc   : > { %5982 = vst [vmem:[#allocation107_spill] sm:$0xff] %v5036_v59  ;;  %v932_v14 = vmul.f32 %v5986_v11, %v929_v12  ;;  %v1067_v17 = vmul.f32 %v1066_v44, %v3459_v54  ;;  %v5987_v59 = vstv %s4833_s5  ;;  %v5056_v46 = vpop.permute.xlu0 %1205  ;;  %v5058_v33 = vpop.permute.xlu1 %1207  ;;  %v948_v12 = vadd.f32 %v5988_v15, %v892_v47 }
 0x4dd   : > { %5985 = vst [vmem:[#allocation124_spill] sm:$0xff] %v5041_v18  ;;  %v1195_v6 = vmul.f32 %v5987_v59, %v1192_v58  ;;  %v1190_v60 = vsel %vm611_vm13, %v1188_v39, %v1186_v21  ;;  %v1210_v29 = vsel %vm643_vm14, %v5058_v33, %v5056_v46  ;;  %v1052_v44 = vsel %vm559_vm10, %v4627_v9, %v4625_v10  ;;  %v5989_v21 = vld [vmem:[#allocation25_spill] sm:$0xff]  ;;  %v5996_v18 = vld [vmem:[#allocation34_spill] sm:$0xff] }
 0x4de   : > { %v1115_v59 = vmul.f32 %v1113_v27, %v3493_v23  ;;  %v1212_v47 = vmul.f32 %v1210_v29, %v3489_v25  ;;  %v976_v39 = vadd.f32 %v5989_v21, %v920_v52  ;;  %v934_v11 = vadd.f32 %v932_v14, %v4513_v8 }
 0x4df   : > { %v1197_v58 = vadd.f32 %v1195_v6, %v4882_v62  ;;  %v5990_v10 = vstv %s4591_s26  ;;  %v1080_v62 = vsel %vm611_vm13, %v4709_v16, %v4707_v51  ;;  %v1191_v27 = vmul.f32 %v1190_v60, %v3466_v31 }
 0x4e0   : > { %v1070_v9 = vmul.f32 %v5990_v10, %v1067_v17  ;;  %v5991_v6 = vstv %s4872_s23  ;;  %v1220_v20 = vpop.permute.xlu0 %1219  ;;  %v1222_v52 = vpop.permute.xlu1 %1221  ;;  %v1053_v8 = vmul.f32 %v1052_v44, %v3443_v1  ;;  %v1981_v17 = vstv %s5032_s9  ;;  %v5992_v10 = vld [vmem:[#allocation26_spill] sm:$0xff] }
 0x4e1   : > { %v1215_v29 = vmul.f32 %v5991_v6, %v1212_v47  ;;  %v1224_v14 = vsel %vm669_vm15, %v1222_v52, %v1220_v20  ;;  %v996_v53 = vadd.f32 %v5992_v10, %v948_v12  ;;  %v5993_v15 = vstv %s4724_s6  ;;  %v5994_v47 = vld [vmem:[#allocation23_spill] sm:$0xff]  ;;  %s229_s26 = sand.u32 1, %s6108_s2  }
 0x4e2   : > { %v1118_v51 = vmul.f32 %v5993_v15, %v1115_v59  ;;  %v1226_v60 = vmul.f32 %v1224_v14, %v3496_v37  ;;  %v962_v6 = vadd.f32 %v5994_v47, %v4550_v5  ;;  %v982_v19 = vadd.f32 %v5995_v40, %v934_v11 }
 0x4e3   : > { %v5102_v16 = vadd.f32 %v1215_v29, %v1169_v38  ;;  %v1081_v44 = vmul.f32 %v1080_v62, %v3466_v31  ;;  %v1024_v21 = vadd.f32 %v5996_v18, %v976_v39  ;;  %v1072_v61 = vadd.f32 %v1070_v9, %v996_v53  ;;  %v6000_v18 = vld [vmem:[#allocation69_spill] sm:$0xff] }
 0x4e4   : > { %v1127_v38 = vsel %vm695_vm11, %v4857_v56, %v4859_v0  ;;  %v5997_v12 = vstv %s4833_s5  ;;  %v5998_v15 = vstv %s4885_s13  ;;  %v1234_v5 = vpop.permute.xlu0 %1233  ;;  %v1236_v40 = vpop.permute.xlu1 %1235  ;;  %v5999_v11 = vstv %s4544_s24  ;;  %s6109_s24 = sld [smem:[#allocation12_spill]] }
 0x4e5   : > { %v1194_v59 = vmul.f32 %v5997_v12, %v1191_v27  ;;  %v1229_v29 = vmul.f32 %v5998_v15, %v1226_v60  ;;  %v1056_v62 = vmul.f32 %v5999_v11, %v1053_v8  ;;  %v1099_v53 = vsel %vm643_vm14, %v6000_v18, %v4768_v13  ;;  %v6004_v11 = vld [vmem:[#allocation24_spill] sm:$0xff]  ;;  %v6005_v18 = vld [vmem:[#allocation33_spill] sm:$0xff] }
 0x4e6   : > { %v1237_v39 = vsel %vm695_vm11, %v1234_v5, %v1236_v40  ;;  %v1238_v56 = vsel %vm695_vm11, %v1236_v40, %v1234_v5  ;;  %v1120_v0 = vadd.f32 %v1118_v51, %v1072_v61  ;;  %v6001_v10 = vstv %s4636_s20  ;;  %s2162_s20 = sshll.u32 %s229_s26, 5 }
 0x4e7   : > { %v5128_v9 = vadd.f32 %v1229_v29, %v1183_v45  ;;  %v1239_v27 = vmul.f32 %v1237_v39, %v3531_v32  ;;  %v1240_v14 = vmul.f32 %v1238_v56, %v3501_v24  ;;  %v1084_v8 = vmul.f32 %v6001_v10, %v1081_v44 }
 0x4e8   : > { %v1129_v60 = vmul.f32 %v1127_v38, %v3531_v32  ;;  %v2001_v47 = vstv %s5077_s10  ;;  %v2015_v12 = vstv %s5083_s27  ;;  %v1162_v13 = vsel %vm559_vm10, %v4915_v28, %v4913_v35  ;;  %v1268_v5 = vpop.permute.xlu0 %1267  ;;  %v1270_v40 = vpop.permute.xlu1 %1269 }
 0x4e9   : > { %v1196_v15 = vadd.f32 %v1194_v59, %v1120_v0  ;;  %v6002_v61 = vstv %s4917_s0  ;;  %v1010_v44 = vadd.f32 %v6004_v11, %v962_v6  ;;  %v1101_v38 = vmul.f32 %v1099_v53, %v3479_v3  ;;  %v6007_v6 = vld [vmem:[#allocation30_spill] sm:$0xff]  ;;  %v6008_v53 = vld [vmem:[#allocation29_spill] sm:$0xff] }
 0x4ea   : > { %v1242_v45 = vmul.f32 %v6002_v61, %v1239_v27  ;;  %v6003_v51 = vmov %v6002_v61  ;;  %v1092_v39 = vadd.f32 %v6005_v18, %v1024_v21  ;;  %v1271_v56 = vsel %vm559_vm10, %v1268_v5, %v1270_v40  ;;  %v6013_v18 = vld [vmem:[#allocation36_spill] sm:$0xff]  ;;  %s2283_s7 = sshll.u32 %s6109_s24, 9 }
 0x4eb   : > { %v1243_v29 = vmul.f32 %v6003_v51, %v1240_v14  ;;  %v1058_v10 = vadd.f32 %v1056_v62, %v982_v19  ;;  %v1274_v59 = vmul.f32 %v1271_v56, %v3446_v49  ;;  %v1086_v0 = vadd.f32 %v1084_v8, %v1010_v44  ;;  %v6009_v62 = vld [vmem:[#allocation32_spill] sm:$0xff] }
 0x4ec   : > { %v1244_v35 = vadd.f32 %v1242_v45, %v1196_v15  ;;  %v6006_v27 = vstv %s4780_s22  ;;  %v1163_v61 = vmul.f32 %v1162_v13, %v3443_v1  ;;  %v1203_v51 = vadd.f32 %v6007_v6, %v4937_v2  ;;  %v1282_v8 = vpop.permute.xlu0 %1281  ;;  %s6114_s22 = sld [smem:[#allocation134_spill]] }
 0x4ed   : > { %v1245_v28 = vadd.f32 %v1243_v29, %v1197_v58  ;;  %v1132_v14 = vmul.f32 %v6006_v27, %v1129_v60  ;;  %v1176_v21 = vsel %vm585_vm12, %v4969_v41, %v4967_v57  ;;  %v6010_v15 = vstv %s4930_s1  ;;  %v1284_v29 = vpop.permute.xlu1 %1283  ;;  %v6012_v41 = vld [vmem:[#allocation31_spill] sm:$0xff] }
 0x4ee   : > { %v1312_v19 = vadd.f32 %v6008_v53, %v1244_v35  ;;  %v1277_v45 = vmul.f32 %v6010_v15, %v1274_v59  ;;  %v6011_v60 = vstv %s4681_s18  ;;  %v1209_v2 = vsel %vm643_vm14, %v5056_v46, %v5058_v33  ;;  %v6016_v53 = vld [vmem:[#allocation42_spill] sm:$0xff]  ;;  %s231_s18 = scalar_lea.vmem [#allocation5], %s2162_s20 }
 0x4ef   : > { %v1313_v58 = vadd.f32 %v6009_v62, %v1245_v28  ;;  %v1104_v11 = vmul.f32 %v6011_v60, %v1101_v38  ;;  %v1223_v13 = vsel %vm669_vm15, %v1220_v20, %v1222_v52  ;;  %v1285_v57 = vsel %vm585_vm12, %v1282_v8, %v1284_v29  ;;  %v6015_v52 = vld [vmem:[#allocation40_spill] sm:$0xff]  ;;  %s2082_s8 = sshll.u32 %s231_s18, 4  ;;  %s5409_s8 = int_to_ptr.vmem [resolvable:$true] %s2082_s8 }
 0x4f0   : > { %v1376_v44 = vadd.f32 %v6012_v41, %v1312_v19  ;;  %v1272_v35 = vsel %vm559_vm10, %v1270_v40, %v1268_v5  ;;  %v1279_v38 = vadd.f32 %v1277_v45, %v1203_v51  ;;  %v1134_v28 = vadd.f32 %v1132_v14, %v1086_v0  ;;  %v6019_v45 = vld [vmem:[#allocation50_spill] sm:$0xff]  ;;  %s2438_s21 = scalar_lea.vmem %s5409_s8, 512 }
 0x4f1   : > { %v1377_v56 = vadd.f32 %v6013_v18, %v1313_v58  ;;  %v6014_v59 = vstv %s4799_s3  ;;  %v1177_v46 = vmul.f32 %v1176_v21, %v3459_v54  ;;  %v1288_v33 = vmul.f32 %v1285_v57, %v3462_v63  ;;  %v1296_v58 = vpop.permute.xlu0 %1295  ;;  %v1298_v5 = vpop.permute.xlu1 %1297  ;;  %v6018_v21 = vld [vmem:[#allocation48_spill] sm:$0xff]  ;;  %v6021_v18 = vld [vmem:[#allocation53_spill] sm:$0xff]  ;;  %s5411_s3 = scalar_lea.sflag [#allocation3], %s229_s26  ;;  %p2439_p9 = scmp.ne.s32.totalorder %s5409_s8, %s2438_s21 }
 0x4f2   : > { %v1166_v27 = vmul.f32 %v6014_v59, %v1163_v61  ;;  %v1211_v20 = vmul.f32 %v1209_v2, %v3479_v3  ;;  %v1424_v6 = vadd.f32 %v6015_v52, %v1376_v44  ;;  %v1286_v62 = vsel %vm585_vm12, %v1284_v29, %v1282_v8  ;;  %s5405_s19 = scalar_lea.hbm %s6114_s22, %s2283_s7 }
 0x4f3   : > { %v1425_v19 = vadd.f32 %v6016_v53, %v1377_v56  ;;  %v1225_v40 = vmul.f32 %v1223_v13, %v3493_v23  ;;  %v1273_v0 = vmul.f32 %v1272_v35, %v3443_v1  ;;  %v6017_v14 = vstv %s4941_s15  ;;  %v6022_v35 = vld [vmem:[#allocation56_spill] sm:$0xff]  ;;  %p2440_p10 = pnand %p2439_p9, %p2589_p5 }
 0x4f4   : > { %v1291_v61 = vmul.f32 %v6017_v14, %v1288_v33  ;;  %v1299_v51 = vsel %vm611_vm13, %v1296_v58, %v1298_v5  ;;  %v1488_v15 = vadd.f32 %v6018_v21, %v1424_v6  ;;  %v1300_v8 = vsel %vm611_vm13, %v1298_v5, %v1296_v58  ;;  %v6023_v33 = vld [vmem:[#allocation27_spill] sm:$0xff] }
 0x4f5   : > { %v1489_v60 = vadd.f32 %v6019_v45, %v1425_v19  ;;  %v1302_v29 = vmul.f32 %v1299_v51, %v3475_v22  ;;  %v1106_v2 = vadd.f32 %v1104_v11, %v1058_v10  ;;  %v6020_v13 = vstv %s4826_s30  ;;  %v1316_v19 = vpop.permute.xlu0 %1315  ;;  %v1318_v14 = vpop.permute.xlu1 %1317  ;;  %v6028_v51 = vld [vmem:[#allocation61_spill] sm:$0xff]  ;;  %p2441_p12 = pneg %p2440_p10  ;;  %s2519_s30 = smov [#allocation5]  }
 0x4f6   : > { %v1180_v57 = vmul.f32 %v6020_v13, %v1177_v46  ;;  %v1287_v41 = vmul.f32 %v1286_v62, %v3459_v54  ;;  %v1293_v44 = vadd.f32 %v1291_v61, %v5102_v16  ;;  %v1536_v56 = vadd.f32 %v6021_v18, %v1488_v15  ;;  %v6029_v15 = vld [vmem:[#allocation63_spill] sm:$0xff]  ;;  %s2442_s5 = sshll.u32 %s2519_s30, 4  ;;  %s2443_s5 = int_to_ptr.vmem [resolvable:$false] %s2442_s5 }
 0x4f7   : > { %v1537_v59 = vadd.f32 %v6022_v35, %v1489_v60  ;;  %v1202_v52 = vadd.f32 %v6023_v33, %v1134_v28  ;;  %v6024_v6 = vstv %s4955_s25  ;;  %v6025_v58 = vstv %s4872_s23  ;;  %v6031_v13 = vld [vmem:[#allocation67_spill] sm:$0xff]  ;;  %s2444_s23 = scalar_lea.vmem %s2443_s5, 1024  ;;  %p2445_p13 = scmp.lt.s32.totalorder %s5409_s8, %s2443_s5 }
 0x4f8   : > { %v1305_v53 = vmul.f32 %v6024_v6, %v1302_v29  ;;  %v1214_v10 = vmul.f32 %v6025_v58, %v1211_v20  ;;  %v6026_v11 = vstv %s4885_s13  ;;  %v6027_v5 = vstv %s4930_s1  ;;  %p2446_p0 = scmp.lt.s32.totalorder %s2444_s23, %s2438_s21 }
 0x4f9   : > { %v1228_v46 = vmul.f32 %v6026_v11, %v1225_v40  ;;  %v1276_v62 = vmul.f32 %v6027_v5, %v1273_v0  ;;  %v1301_v16 = vmul.f32 %v1300_v8, %v3466_v31  ;;  %v1168_v61 = vadd.f32 %v1166_v27, %v1092_v39  ;;  %v1330_v8 = vpop.permute.xlu0 %1329  ;;  %v1332_v33 = vpop.permute.xlu1 %1331 }
 0x4fa   : > { %v1600_v21 = vadd.f32 %v6028_v51, %v1536_v56  ;;  %v1601_v28 = vadd.f32 %v6029_v15, %v1537_v59  ;;  %v1307_v45 = vadd.f32 %v1305_v53, %v5128_v9  ;;  %v1182_v60 = vadd.f32 %v1180_v57, %v1106_v2  ;;  %v6032_v56 = vld [vmem:[#allocation70_spill] sm:$0xff]  ;;  %p2447_p1 = por %p2446_p0, %p2445_p13 }
 0x4fb   : > { %v6030_v29 = vstv %s4941_s15  ;;  %v1319_v40 = vsel %vm643_vm14, %v1316_v19, %v1318_v14  ;;  %v1320_v0 = vsel %vm643_vm14, %v1318_v14, %v1316_v19  ;;  %v1216_v9 = vadd.f32 %v1214_v10, %v1168_v61 }
 0x4fc   : > { %v1290_v20 = vmul.f32 %v6030_v29, %v1287_v41  ;;  %v1321_v39 = vmul.f32 %v1319_v40, %v3479_v3  ;;  %v1322_v27 = vmul.f32 %v1320_v0, %v3489_v25  ;;  %v1648_v18 = vadd.f32 %v6031_v13, %v1600_v21  ;;  %v6040_v13 = vld [vmem:[#allocation35_spill] sm:$0xff]  ;;  %p2448_p2 = pnand %p2447_p1, %p2441_p12 }
 0x4fd   : > { %v1649_v35 = vadd.f32 %v6032_v56, %v1601_v28  ;;  %v1230_v59 = vadd.f32 %v1228_v46, %v1182_v60  ;;  %v1278_v2 = vadd.f32 %v1276_v62, %v1202_v52  ;;  %v6033_v57 = vmov %v6024_v6  ;;  %v6036_v52 = vld [vmem:[#allocation84_spill] sm:$0xff]  ;;  %v1344_v15 = vpop.permute.xlu0 %1343 }
 0x4fe   : > { %v1304_v41 = vmul.f32 %v6033_v57, %v1301_v16  ;;  %v6034_v6 = vstv %s4971_s4  ;;  %v1333_v11 = vsel %vm669_vm15, %v1330_v8, %v1332_v33  ;;  %v1334_v5 = vsel %vm669_vm15, %v1332_v33, %v1330_v8  ;;  %v6037_v16 = vld [vmem:[#allocation85_spill] sm:$0xff]  ;;  %v6043_v33 = vld [vmem:[#allocation44_spill] sm:$0xff] }
 0x4ff   : > { %v1324_v53 = vmul.f32 %v6034_v6, %v1321_v39  ;;  %v6035_v19 = vmov %v6034_v6  ;;  %v1335_v10 = vmul.f32 %v1333_v11, %v3493_v23  ;;  %v1336_v46 = vmul.f32 %v1334_v5, %v3496_v37  ;;  %v6041_v57 = vld [vmem:[#allocation38_spill] sm:$0xff]  ;;  %v6045_v5 = vld [vmem:[#allocation37_spill] sm:$0xff] }
 0x500   : > { %v1325_v58 = vmul.f32 %v6035_v19, %v1322_v27  ;;  %v1696_v62 = vadd.f32 %v6036_v52, %v1648_v18  ;;  %v1697_v14 = vadd.f32 %v6037_v16, %v1649_v35  ;;  %v1292_v61 = vadd.f32 %v1290_v20, %v1216_v9  ;;  %v1346_v27 = vpop.permute.xlu1 %1345  ;;  %v6044_v19 = vld [vmem:[#allocation82_spill] sm:$0xff] }
 0x501   : > { %v1326_v51 = vadd.f32 %v1324_v53, %v1278_v2  ;;  %v2029_v28 = vstv %s5207_s11  ;;  %v1306_v60 = vadd.f32 %v1304_v41, %v1230_v59  ;;  %v6038_v29 = vstv %s4987_s16  ;;  %v6042_v41 = vld [vmem:[#allocation41_spill] sm:$0xff]  ;;  %v1946_v53 = vpop.permute.xlu0 %1945 }
 0x502   : > { %v1327_v21 = vadd.f32 %v1325_v58, %v1279_v38  ;;  %v1338_v40 = vmul.f32 %v6038_v29, %v1335_v10  ;;  %v6039_v0 = vmov %v6038_v29  ;;  %v1761_v8 = vadd.f32 %v4837_v30, %v1697_v14  ;;  %v6050_v29 = vld [vmem:[#allocation52_spill] sm:$0xff] }
 0x503   : > { %v1339_v39 = vmul.f32 %v6039_v0, %v1336_v46  ;;  %v1390_v56 = vadd.f32 %v6040_v13, %v1326_v51  ;;  %v1347_v20 = vsel %vm695_vm11, %v1344_v15, %v1346_v27  ;;  %v1348_v38 = vsel %vm695_vm11, %v1346_v27, %v1344_v15  ;;  %v6046_v46 = vld [vmem:[#allocation39_spill] sm:$0xff]  ;;  %v6052_v27 = vld [vmem:[#allocation46_spill] sm:$0xff] }
 0x504   : > { %v1391_v18 = vadd.f32 %v6041_v57, %v1327_v21  ;;  %v1340_v35 = vadd.f32 %v1338_v40, %v1292_v61  ;;  %v1349_v59 = vmul.f32 %v1347_v20, %v3531_v32  ;;  %v1350_v2 = vmul.f32 %v1348_v38, %v3501_v24  ;;  %v1948_v51 = vpop.permute.xlu1 %1947  ;;  %v6049_v21 = vld [vmem:[#allocation49_spill] sm:$0xff]  ;;  %v6053_v57 = vld [vmem:[#allocation55_spill] sm:$0xff]  ;;  %v6054_v20 = vld [vmem:[#allocation58_spill] sm:$0xff] }
 0x505   : > { %v1341_v9 = vadd.f32 %v1339_v39, %v1293_v44  ;;  %v1438_v30 = vadd.f32 %v6042_v41, %v1390_v56  ;;  %v1760_v58 = vadd.f32 %v6044_v19, %v1696_v62  ;;  %v1809_v11 = vadd.f32 %v4880_v50, %v1761_v8  ;;  %v6051_v50 = vld [vmem:[#allocation43_spill] sm:$0xff]  ;;  %v6058_v19 = vld [vmem:[#allocation93_spill] sm:$0xff] }
 0x506   : > { %v1439_v6 = vadd.f32 %v6043_v33, %v1391_v18  ;;  %v1404_v10 = vadd.f32 %v6045_v5, %v1340_v35  ;;  %v6047_v16 = vstv %s4993_s14  ;;  %v1949_v0 = vsel %vm559_vm10, %v1946_v53, %v1948_v51 }
 0x507   : > { %v1405_v52 = vadd.f32 %v6046_v46, %v1341_v9  ;;  %v1352_v14 = vmul.f32 %v6047_v16, %v1349_v59  ;;  %v6048_v44 = vmov %v6047_v16  ;;  %v1502_v15 = vadd.f32 %v6049_v21, %v1438_v30  ;;  %v1960_v59 = vpop.permute.xlu0 %1959  ;;  %v6056_v30 = vld [vmem:[#allocation96_spill] sm:$0xff]  ;;  %v6060_v46 = vld [vmem:[#allocation98_spill] sm:$0xff]  ;;  %v6064_v21 = vld [vmem:[#allocation45_spill] sm:$0xff] }
 0x508   : > { %v1353_v61 = vmul.f32 %v6048_v44, %v1350_v2  ;;  %v1503_v40 = vadd.f32 %v6050_v29, %v1439_v6  ;;  %v1950_v62 = vsel %vm559_vm10, %v1948_v51, %v1946_v53  ;;  %v1452_v39 = vadd.f32 %v6051_v50, %v1404_v10  ;;  %v6055_v2 = vld [vmem:[#allocation95_spill] sm:$0xff]  ;;  %v6057_v6 = vld [vmem:[#allocation92_spill] sm:$0xff] }
 0x509   : > { %v1453_v8 = vadd.f32 %v6052_v27, %v1405_v52  ;;  %v1354_v13 = vadd.f32 %v1352_v14, %v1306_v60  ;;  %v1550_v18 = vadd.f32 %v6053_v57, %v1502_v15  ;;  %v1951_v35 = vmul.f32 %v1950_v62, %v3443_v1  ;;  %v1962_v60 = vpop.permute.xlu1 %1961  ;;  %v6065_v29 = vld [vmem:[#allocation47_spill] sm:$0xff] }
 0x50a   : > { %v1355_v56 = vadd.f32 %v1353_v61, %v1307_v45  ;;  %v1551_v38 = vadd.f32 %v6054_v20, %v1503_v40  ;;  %v1952_v9 = vmul.f32 %v1949_v0, %v3446_v49  ;;  %v1508_v41 = vadd.f32 %v6055_v2, %v1452_v39  ;;  %v6059_v45 = vld [vmem:[#allocation97_spill] sm:$0xff]  ;;  %v6063_v61 = vld [vmem:[#allocation59_spill] sm:$0xff]  ;;  %v6066_v0 = vld [vmem:[#allocation106_spill] sm:$0xff] }
 0x50b   : > { %v1509_v33 = vadd.f32 %v6056_v30, %v1453_v8  ;;  %v1410_v53 = vadd.f32 %v6057_v6, %v1354_v13  ;;  %v1606_v10 = vadd.f32 %v6059_v45, %v1550_v18  ;;  %v6061_v16 = vstv %s5007_s29  ;;  %v6062_v49 = vld [vmem:[#allocation57_spill] sm:$0xff]  ;;  %v6070_v18 = vld [vmem:[#allocation51_spill] sm:$0xff] }
 0x50c   : > { %v1411_v5 = vadd.f32 %v6058_v19, %v1355_v56  ;;  %v1607_v52 = vadd.f32 %v6060_v46, %v1551_v38  ;;  %v5287_v14 = vmul.f32 %v6061_v16, %v1951_v35  ;;  %v1808_v1 = vadd.f32 %v4876_v36, %v1760_v58  ;;  %v1974_v36 = vpop.permute.xlu0 %1973  ;;  %v6068_v58 = vld [vmem:[#allocation64_spill] sm:$0xff]  ;;  %v6069_v56 = vld [vmem:[#allocation66_spill] sm:$0xff] }
 0x50d   : > { %v1572_v44 = vadd.f32 %v6062_v49, %v1508_v41  ;;  %v1573_v51 = vadd.f32 %v6063_v61, %v1509_v33  ;;  %v1474_v15 = vadd.f32 %v6064_v21, %v1410_v53  ;;  %v6067_v50 = vmov %v6061_v16  ;;  %v6071_v38 = vld [vmem:[#allocation54_spill] sm:$0xff]  ;;  %v1976_v2 = vpop.permute.xlu1 %1975  ;;  %v6072_v41 = vld [vmem:[#allocation105_spill] sm:$0xff] }
 0x50e   : > { %v1475_v40 = vadd.f32 %v6065_v29, %v1411_v5  ;;  %v1663_v62 = vadd.f32 %v6066_v0, %v1607_v52  ;;  %v1955_v39 = vmul.f32 %v6067_v50, %v1952_v9  ;;  %v1963_v27 = vsel %vm585_vm12, %v1960_v59, %v1962_v60  ;;  %v6074_v19 = vld [vmem:[#allocation62_spill] sm:$0xff] }
 0x50f   : > { %v1964_v8 = vsel %vm585_vm12, %v1962_v60, %v1960_v59  ;;  %v1620_v13 = vadd.f32 %v6068_v58, %v1572_v44  ;;  %v1621_v57 = vadd.f32 %v6069_v56, %v1573_v51  ;;  %v1522_v20 = vadd.f32 %v6070_v18, %v1474_v15  ;;  %v6073_v59 = vld [vmem:[#allocation60_spill] sm:$0xff]  ;;  %v6075_v60 = vld [vmem:[#allocation112_spill] sm:$0xff]  ;;  %v6076_v46 = vld [vmem:[#allocation113_spill] sm:$0xff] }
 0x510   : > { %v1523_v35 = vadd.f32 %v6071_v38, %v1475_v40  ;;  %v1662_v30 = vadd.f32 %v6072_v41, %v1606_v10  ;;  %v1965_v9 = vmul.f32 %v1964_v8, %v3459_v54  ;;  %v1872_v33 = vadd.f32 %v4945_v55, %v1808_v1  ;;  %v1994_v55 = vpop.permute.xlu0 %1993  ;;  %v6078_v1 = vld [vmem:[#allocation65_spill] sm:$0xff]  ;;  %v6080_v51 = vld [vmem:[#allocation120_spill] sm:$0xff] }
 0x511   : > { %v1873_v6 = vadd.f32 %v4950_v42, %v1809_v11  ;;  %v1586_v53 = vadd.f32 %v6073_v59, %v1522_v20  ;;  %v1676_v45 = vadd.f32 %v6075_v60, %v1620_v13  ;;  %v1677_v52 = vadd.f32 %v6076_v46, %v1621_v57  ;;  %v6079_v11 = vld [vmem:[#allocation68_spill] sm:$0xff]  ;;  %v6081_v15 = vld [vmem:[#allocation121_spill] sm:$0xff]  ;;  %v1996_v40 = vpop.permute.xlu1 %1995  ;;  %v6085_v57 = vld [vmem:[#allocation114_spill] sm:$0xff] }
 0x512   : > { %v1587_v5 = vadd.f32 %v6074_v19, %v1523_v35  ;;  %v1966_v16 = vmul.f32 %v1963_v27, %v3462_v63  ;;  %v6077_v49 = vstv %s5021_s12  ;;  %v5317_v10 = vadd.f32 %v5011_v7, %v1872_v33  ;;  %v6082_v7 = vld [vmem:[#allocation116_spill] sm:$0xff]  ;;  %v6083_v27 = vld [vmem:[#allocation117_spill] sm:$0xff]  ;;  %v6084_v13 = vld [vmem:[#allocation115_spill] sm:$0xff] }
 0x513   : > { %v1968_v44 = vmul.f32 %v6077_v49, %v1965_v9  ;;  %v1921_v54 = vadd.f32 %v5016_v4, %v1873_v6  ;;  %v1634_v42 = vadd.f32 %v6078_v1, %v1586_v53  ;;  %v1724_v21 = vadd.f32 %v6080_v51, %v1676_v45  ;;  %v6086_v35 = vld [vmem:[#allocation71_spill] sm:$0xff]  ;;  %v6093_v45 = vld [vmem:[#allocation73_spill] sm:$0xff]  ;;  %v6095_v1 = vld [vmem:[#allocation102_spill] sm:$0xff] }
 0x514   : > { %v1635_v61 = vadd.f32 %v6079_v11, %v1587_v5  ;;  %v1725_v29 = vadd.f32 %v6081_v15, %v1677_v52  ;;  %v1977_v63 = vsel %vm611_vm13, %v1974_v36, %v1976_v2  ;;  %v1978_v0 = vsel %vm611_vm13, %v1976_v2, %v1974_v36  ;;  %v6087_v2 = vld [vmem:[#allocation72_spill] sm:$0xff]  ;;  %v2008_v59 = vpop.permute.xlu0 %2007  ;;  %v6094_v52 = vld [vmem:[#allocation101_spill] sm:$0xff] }
 0x515   : > { %v1710_v50 = vadd.f32 %v6082_v7, %v1662_v30  ;;  %v1711_v4 = vadd.f32 %v6083_v27, %v1663_v62  ;;  %v1788_v8 = vadd.f32 %v4851_v48, %v1724_v21  ;;  %v1690_v18 = vadd.f32 %v6085_v57, %v1634_v42  ;;  %v6088_v30 = vld [vmem:[#allocation76_spill] sm:$0xff]  ;;  %v2010_v53 = vpop.permute.xlu1 %2009  ;;  %v6096_v42 = vld [vmem:[#allocation100_spill] sm:$0xff]  ;;  %v6100_v27 = vld [vmem:[#allocation81_spill] sm:$0xff] }
 0x516   : > { %v1789_v58 = vadd.f32 %v4863_v34, %v1725_v29  ;;  %v1691_v56 = vadd.f32 %v6084_v13, %v1635_v61  ;;  %v1979_v20 = vmul.f32 %v1978_v0, %v3466_v31  ;;  %v1980_v38 = vmul.f32 %v1977_v63, %v3475_v22  ;;  %v6089_v48 = vld [vmem:[#allocation123_spill] sm:$0xff]  ;;  %v6090_v34 = vld [vmem:[#allocation122_spill] sm:$0xff]  ;;  %v6098_v29 = vld [vmem:[#allocation80_spill] sm:$0xff] }
 0x517   : > { %v1774_v36 = vadd.f32 %v6086_v35, %v1710_v50  ;;  %v1775_v41 = vadd.f32 %v6087_v2, %v1711_v4  ;;  %v1836_v62 = vadd.f32 %v4900_v43, %v1788_v8  ;;  %v1738_v6 = vadd.f32 %v6090_v34, %v1690_v18  ;;  %v6092_v22 = vld [vmem:[#allocation74_spill] sm:$0xff]  ;;  %v6097_v61 = vld [vmem:[#allocation99_spill] sm:$0xff]  ;;  %v6101_v8 = vld [vmem:[#allocation77_spill] sm:$0xff] }
 0x518   : > { %v1837_v9 = vadd.f32 %v6088_v30, %v1789_v58  ;;  %v1739_v33 = vadd.f32 %v6089_v48, %v1691_v56  ;;  %v6091_v19 = vmov %v6077_v49  ;;  %v1983_v31 = vmul.f32 %v1981_v17, %v1980_v38  ;;  %v6102_v13 = vld [vmem:[#allocation107_spill] sm:$0xff]  ;;  %v6103_v57 = vld [vmem:[#allocation124_spill] sm:$0xff]  ;;  %v2022_v2 = vpop.permute.xlu0 %2021 }
 0x519   : > { %v1969_v5 = vmul.f32 %v6091_v19, %v1966_v16  ;;  %v1822_v60 = vadd.f32 %v6092_v22, %v1774_v36  ;;  %v1823_v46 = vadd.f32 %v6093_v45, %v1775_v41  ;;  %v1892_v49 = vadd.f32 %v6094_v52, %v1836_v62  ;;  %v6099_v16 = vld [vmem:[#allocation88_spill] sm:$0xff]  ;;  %v2024_v41 = vpop.permute.xlu1 %2023  ;;  %v6106_v62 = vld [vmem:[#allocation103_spill] sm:$0xff] }
 0x51a   : > { %v1893_v43 = vadd.f32 %v6095_v1, %v1837_v9  ;;  %v1795_v11 = vadd.f32 %v6096_v42, %v1739_v33  ;;  %v1794_v51 = vadd.f32 %v6097_v61, %v1738_v6  ;;  %v1982_v21 = vmul.f32 %v1981_v17, %v1979_v20  ;;  %v6104_v20 = vld [vmem:[#allocation28_spill] sm:$0xff] }
 0x51b   : > { %v1985_v15 = vadd.f32 %v1983_v31, %v1921_v54  ;;  %v1886_v63 = vadd.f32 %v6098_v29, %v1822_v60  ;;  %v1887_v0 = vadd.f32 %v6099_v16, %v1823_v46  ;;  %v1956_v7 = vadd.f32 %v5287_v14, %v1892_v49  ;;  %v6105_v14 = vld [vmem:[#allocation87_spill] sm:$0xff]  ;;  %v6107_v9 = vld [vmem:[#allocation104_spill] sm:$0xff] }
 0x51c   : > { %v1957_v50 = vadd.f32 %v1955_v39, %v1893_v43  ;;  %v1859_v4 = vadd.f32 %v6100_v27, %v1795_v11  ;;  %v1858_v58 = vadd.f32 %v6101_v8, %v1794_v51  ;;  %v1997_v17 = vsel %vm643_vm14, %v1994_v55, %v1996_v40  ;;  %v6113_v27 = vld [vmem:[#allocation18_spill] sm:$0xff]  ;;  %v6115_v8 = vld [vmem:[#allocation21_spill] sm:$0xff] }
 0x51d   : > { %v1934_v56 = vadd.f32 %v6102_v13, %v1886_v63  ;;  %v1935_v18 = vadd.f32 %v6103_v57, %v1887_v0  ;;  %v1998_v54 = vsel %vm643_vm14, %v1996_v40, %v1994_v55  ;;  %v1999_v35 = vmul.f32 %v1997_v17, %v3479_v3  ;;  %v6110_v63 = vld [vmem:[#allocation17_spill] sm:$0xff]  ;;  %v6116_v13 = vld [vmem:[#allocation19_spill] sm:$0xff] }
 0x51e   : > { %v1907_v38 = vadd.f32 %v6104_v20, %v1859_v4  ;;  %v1906_v39 = vadd.f32 %v6105_v14, %v1858_v58  ;;  %v2000_v36 = vmul.f32 %v1998_v54, %v3489_v25  ;;  %v2011_v33 = vsel %vm669_vm15, %v2008_v59, %v2010_v53 }
 0x51f   : > { %v1990_v30 = vadd.f32 %v6106_v62, %v1934_v56  ;;  %v1991_v48 = vadd.f32 %v6107_v9, %v1935_v18  ;;  %v2012_v55 = vsel %vm669_vm15, %v2010_v53, %v2008_v59  ;;  %v2002_v3 = vmul.f32 %v2001_v47, %v1999_v35 }
 0x520   : > { %v1970_v40 = vadd.f32 %v1968_v44, %v1906_v39  ;;  %v1971_v34 = vadd.f32 %v1969_v5, %v1907_v38  ;;  %v2003_v25 = vmul.f32 %v2001_v47, %v2000_v36  ;;  %v2013_v6 = vmul.f32 %v2011_v33, %v3493_v23 }
 0x521   : > { %v2014_v19 = vmul.f32 %v2012_v55, %v3496_v37  ;;  %v2025_v31 = vsel %vm695_vm11, %v2022_v2, %v2024_v41  ;;  %v2026_v22 = vsel %vm695_vm11, %v2024_v41, %v2022_v2  ;;  %v2004_v60 = vadd.f32 %v2002_v3, %v1956_v7  ;;  %v6112_v7 = vld [vmem:[#allocation20_spill] sm:$0xff] }
 0x522   : > { %v2005_v59 = vadd.f32 %v2003_v25, %v1957_v50  ;;  %v2027_v44 = vmul.f32 %v2025_v31, %v3531_v32  ;;  %v2028_v53 = vmul.f32 %v2026_v22, %v3501_v24  ;;  %v1984_v5 = vadd.f32 %v1982_v21, %v5317_v10 }
 0x523   : > { %v2016_v47 = vmul.f32 %v2015_v12, %v2013_v6  ;;  %v2017_v23 = vmul.f32 %v2015_v12, %v2014_v19  ;;  %v2036_v45 = vadd.f32 %v2004_v60, %v1990_v30 }
 0x524   : > { %v2037_v37 = vadd.f32 %v2005_v59, %v1991_v48  ;;  %v2030_v46 = vmul.f32 %v2029_v28, %v2027_v44  ;;  %v2031_v52 = vmul.f32 %v2029_v28, %v2028_v53 }
 0x525   : > { %v2018_v26 = vadd.f32 %v2016_v47, %v1970_v40  ;;  %v2019_v49 = vadd.f32 %v2017_v23, %v1971_v34 }
 0x526   : > { %v2032_v1 = vadd.f32 %v2030_v46, %v1984_v5  ;;  %v2033_v43 = vadd.f32 %v2031_v52, %v1985_v15 }
 0x528   : > { %v2034_v32 = vadd.f32 %v2032_v1, %v2018_v26  ;;  %v2035_v42 = vadd.f32 %v2033_v43, %v2019_v49 }
 0x52a   : > { %v2038_v24 = vadd.f32 %v2036_v45, %v2034_v32  ;;  %v2039_v10 = vadd.f32 %v2037_v37, %v2035_v42 }
 0x52c   : > { %v2275_v11 = vmul.f32 -1.442695, %v2038_v24  ;;  %v2276_v61 = vmul.f32 -1.442695, %v2039_v10 }
 0x52e   : > { %2415 = vpow2.f32 %v2275_v11 }
 0x52f   : > { %2417 = vpow2.f32 %v2276_v61 }
 0x53b   : > { %v2416_v12 = vpop.eup %2415 }
 0x53c   : > { %v2418_v51 = vpop.eup %2417  ;;  %v2046_v21 = vadd.f32 1.0, %v2416_v12 }
 0x53d   : > { %v2047_v29 = vadd.f32 1.0, %v2418_v51 }
 0x53e   : > { %2419 = vrcp.f32 %v2046_v21 }
 0x53f   : > { %2421 = vrcp.f32 %v2047_v29 }
 0x54b   : > { %v2420_v28 = vpop.eup %2419 }
 0x54c   : > { %v2422_v15 = vpop.eup %2421  ;;  %v2055_v16 = vrot.slane %v2420_v28, %v6110_v63 }
 0x54d   : > { %v2059_v0 = vrot.slane %v2422_v15, %v6110_v63 }
 0x54e   : > { %v2060_v50 = vmul.f32 %v2055_v16, %v6112_v7  ;;  %v2062_v4 = vmul.f32 %v2055_v16, %v6113_v27 }
 0x54f   : > { %v2061_v58 = vmul.f32 %v2059_v0, %v6115_v8  ;;  %v2063_v56 = vmul.f32 %v2059_v0, %v6116_v13 }
 0x550   : > { %2064 = vst [vmem:[%s231_s18] sm:$0xff] %v2060_v50  ;;  %2066 = vst [vmem:[%s231_s18 + $0x10] sm:$0xff] %v2062_v4 }
 0x551   : > { %2065 = vst [vmem:[%s231_s18 + $0x8] sm:$0xff] %v2061_v58  ;;  %2067 = vst [vmem:[%s231_s18 + $0x18] sm:$0xff] %v2063_v56 }
 0x552   : > { %2451 = shalt.err (!%p2448_p2)
}
 0x553   : > { %s2452_s13 = scalar_lea.hbm %s5405_s19, 512  ;;  %s2456_s15 = scalar_lea.hbm %s6114_s22, 1024 }
 0x554   : > { %p2453_p3 = scmp.ne.s32.totalorder %s5405_s19, %s2452_s13  ;;  %p2457_p8 = scmp.lt.s32.totalorder %s5405_s19, %s6114_s22 }
 0x555   : > { %p2458_p11 = scmp.lt.s32.totalorder %s2456_s15, %s2452_s13 }
 0x556   : > { %p2454_p4 = pnand %p2453_p3, %p2589_p5 }
 0x557   : > { %p2459_p9 = por %p2458_p11, %p2457_p8 }
 0x558   : > { %p2455_p7 = pneg %p2454_p4 }
 0x55a   : > { %p2460_p10 = pnand %p2459_p9, %p2455_p7 }
 0x55c   : > { %2463 = shalt.err (!%p2460_p10)
}
 0x55d   : > { %s2520_s16 = smov 256   ;;  %s6117_s14 = smov 16  }
 0x55e   : > { %2350 = dma.vmem_to_hbm [thread:$0]  (%p2589_p5), %s5409_s8, 512, %s5405_s19, %s5411_s3, %s2520_s16, %s2520_s16, %s6117_s14  }
 0x55f PF: > { %s6118_s29 = sld [smem:[#allocation11_spill]] }
 0x560   : > { %s6119_s12 = sld [smem:[#allocation8_spill]] }
 0x565   : > { %p2362_p12 = scmp.ge.s32.totalorder %s6118_s29, 2 }
 0x566   : > { %s2097_s10 = sand.u32 1, %s6119_s12  }
 0x567   : > { %p2357_p13 = pnand %p2362_p12, %p2593_p6  ;;  %s2098_s27 = scalar_lea.sflag [#allocation3], %s2097_s10 }
 0x569   : > { %p2358_p0 = pneg %p2357_p13 }
 0x56b   : > { %2485 = dma.done.wait (%p2358_p0), %s2098_s27, 512  }
 0x56c   : > { %2487 = vsyncadd (%p2358_p0), %s2098_s27, 4294966784  ;;  %s6121_s21 = sld [smem:[#allocation13_spill]] }
 0x56d   : > { %s6122_s18 = sld [smem:[#allocation9_spill]] }
 0x56e   : > { %s6123_s19 = sld [smem:[#allocation10_spill]] }
 0x56f   : > { %s6124_s20 = sld [smem:[#allocation14_spill]] }
 0x572   : > { %p16_p1 = scmp.ge.s32.totalorder %s6121_s21, 4  }
 0x574   :  { %18 = sbr.rel (!%p16_p1) target bundleno = 11 (0xb), region = 91 }
 0x579   :  { %2103 = vsyncpa [#allocation3], 1 }
 0x57a   :  { %2105 = vsyncpa [#allocation3 + $0x1], 1 }
 0x57b   :  { %2106 = vsyncpa [#allocation4], 1 }
 0x57c   :  { %2108 = vsyncpa [#allocation4 + $0x1], 1 }

</bundles_post_ra>
